<compile_context>
chip_gen: v7x
topology: tpu7x:2x2x1
jax: 0.10.0
libtpu: 0.0.40
codegen_flags: <defaults>
</compile_context>

<pallas_src>
import numpy as np
import jax
import jax.numpy as jnp
from jax import lax
from jax.experimental import pallas as pl
from jax.experimental.pallas import tpu as pltpu

# ---------------- config (small, consistent with the module) ----------------
B, L = 2, 8            # batch, sequence length (token ids)
VOCAB, EMB = 50, 32    # vocab_size, emb_size
NF = 16                # num_filters
LABELS = 8             # labels_num
DA = 30                # TAE attention dim (TAE(30, NF, NF))
DAP = 32               # DA padded to a lane-friendly 32
KHS = (2, 4, 8)        # conv kernel heights
PADS = (1, 3, 7)       # conv paddings along sequence
MAXPAD = 7
KH = 8                 # merged-conv kernel height
F3 = 3 * NF            # merged filters (48)
LBL3 = 3 * LABELS      # per-branch logit blocks (24)
VP = 64                # vocab padded to 64: one-hot lane block per kh-slot
LOUT = L + 2 * MAXPAD - KH + 1          # 15 merged conv time positions
TR = ((LOUT + 7) // 8) * 8              # 16 rows per sequence (sublane aligned)
BT = 8                 # sequences packed per grid step
M = BT * TR            # 128 MXU rows per grid step
OUTL = 128             # lane-dense output width (logits live in lanes [0, LABELS))


# ------------------------------- Pallas kernel ------------------------------
def cnntae_kernel(idx_ref, wconv_ref, bconv_ref, tw1b_ref, tb1t_ref, tw2b_ref,
                  wfold_ref, vmask_ref, selT_ref, fsel_ref, cbias_ref, out_ref):
    f32, bf16 = jnp.float32, jnp.bfloat16

    # 1) one-hot slab (M, KH*VP): embedding gather + zero-padding + im2col are all
    #    pre-folded into the conv weight.  Lane j*VP+v is hot iff kh-slot j of this
    #    merged conv position reads token v (sentinel -1 => pad/guard/absent => zeros).
    idx = idx_ref[...]                                              # (M, KH) int32
    lanes = lax.broadcasted_iota(jnp.int32, (M, KH * VP), 1)
    hit = lanes == idx[:, 0:1]
    for j in range(1, KH):
        hit = jnp.logical_or(hit, lanes == idx[:, j:j + 1])
    slab = hit.astype(bf16)                                         # 0/1 exact in bf16

    # 2) embedding lookup + all three conv branches as ONE bf16 MXU matmul (K=512).
    h = jnp.dot(slab, wconv_ref[...], preferred_element_type=f32) + bconv_ref[...]
    h = jnp.maximum(h, 0.0)                                         # (M, 48) f32
    hb = h.astype(bf16)

    # 3) TAE for all branches via block-diagonal weights (bf16 MXU, f32 VPU/EUP).
    u = jnp.tanh(jnp.dot(hb, tw1b_ref[...], preferred_element_type=f32)
                 + tb1t_ref[...])                                   # (M, 96)
    s = jnp.dot(u.astype(bf16), tw2b_ref[...], preferred_element_type=f32)  # (M, 24)
    g = jnp.dot(hb, wfold_ref[...], preferred_element_type=f32)     # (M, 24) tw3@fc1 fold

    # 4) masked softmax over time + pooling as selector matmuls (no sublane reductions,
    #    no per-batch loop).  Scores are tanh-bounded (|s| <~ 13) so exp() is safe
    #    without a running-max subtraction; the {0,1} mask zeroes invalid time rows.
    e = jnp.exp(s) * vmask_ref[...]                                  # (M, 24) f32
    selT = selT_ref[...]                                             # (BT, M)
    den = jnp.dot(selT, e, preferred_element_type=f32)               # (BT, 24)
    num = jnp.dot(selT, e * g, preferred_element_type=f32)           # (BT, 24)
    pooled = num * pl.reciprocal(den, approx=True)                   # (BT, 24)

    # 5) 3-branch sum + scatter into a lane-dense (BT, 128) block via selector matmul.
    out_ref[...] = (jnp.dot(pooled, fsel_ref[...], preferred_element_type=f32)
                    + cbias_ref[...])


# --------------------------------- wrapper ----------------------------------
def _build_indices(tokens_padded):
    """(Bp, L) int32 tokens (padded rows = -1) -> (Bp*TR, KH) one-hot lane indices."""
    o = np.arange(TR).reshape(TR, 1)
    jj = np.arange(KH).reshape(1, KH)
    seq = o - MAXPAD + jj                       # sequence index read by slot j at pos o
    valid = (seq >= 0) & (seq < L)
    seq_c = np.clip(seq, 0, L - 1)
    off = (jj * VP).astype(np.int32)            # (1, KH) lane-block offsets

    bp = tokens_padded.shape[0]
    gathered = jnp.take(tokens_padded, jnp.asarray(seq_c.reshape(-1), jnp.int32), axis=1)
    gathered = gathered.reshape(bp, TR, KH)
    idx = jnp.where(jnp.asarray(valid)[None] & (gathered >= 0),
                    gathered + jnp.asarray(off)[None], -1)
    return idx.reshape(bp * TR, KH).astype(jnp.int32)


def cnntae_forward(tokens, kp):
    bsz = tokens.shape[0]
    nb = pl.cdiv(bsz, BT)
    bp = nb * BT
    tok_p = jnp.full((bp, L), -1, jnp.int32).at[:bsz].set(tokens.astype(jnp.int32))
    idx = _build_indices(tok_p)                                     # (bp*TR, KH)

    def const(shape):                     # weights: DMA once, stay VMEM-resident
        return pl.BlockSpec(shape, lambda i: (0, 0))

    out = pl.pallas_call(
        cnntae_kernel,
        out_shape=jax.ShapeDtypeStruct((bp, OUTL), jnp.float32),
        grid=(nb,),
        in_specs=[
            pl.BlockSpec((M, KH), lambda i: (i, 0)),                # streamed indices
            const((KH * VP, F3)), const((1, F3)),                   # folded conv
            const((F3, 3 * DAP)), const((1, 3 * DAP)),              # TAE scorer W1/b1
            const((3 * DAP, LBL3)), const((F3, LBL3)),              # TAE w2 / tw3@fc1
            const((M, LBL3)), const((BT, M)),                       # vmask / region sel
            const((LBL3, OUTL)), const((1, OUTL)),                  # branch fold / bias
        ],
        out_specs=pl.BlockSpec((BT, OUTL), lambda i: (i, 0)),
        compiler_params=pltpu.CompilerParams(dimension_semantics=("parallel",)),
    )(idx, kp["wconv"], kp["bconv"], kp["tw1b"], kp["tb1t"], kp["tw2b"],
      kp["wfold"], kp["vmask"], kp["selT"], kp["fsel"], kp["cbias"])
    return out[:bsz, :LABELS]


# -------------------- one-time weight folding / padding ---------------------
def prepare_params(p):
    """Fold / pad / block-diagonalize weights once (model-load time, not per call)."""
    f32, bf16 = jnp.float32, jnp.bfloat16
    kp = {}
    emb_p = jnp.zeros((VP, EMB), f32).at[:VOCAB].set(p["emb"])      # vocab-padded emb

    # merged conv weights (KH*EMB, 3*NF): branch br occupies kh-slots [0, kh_br).
    wconv_e = jnp.zeros((KH * EMB, F3), f32)
    bconv = jnp.zeros((1, F3), f32)
    for br, (kh, name) in enumerate(zip(KHS, ("1", "2", "3"))):
        w = p["wc" + name]                                          # (kh, EMB, NF)
        wconv_e = wconv_e.at[:kh * EMB, br * NF:(br + 1) * NF].set(w.reshape(kh * EMB, NF))
        bconv = bconv.at[:, br * NF:(br + 1) * NF].set(p["bc" + name])
    # fold embedding into the conv: W[j*VP+v, f] = sum_e emb_p[v,e]*wconv_e[j*EMB+e, f]
    wfold_conv = jnp.einsum("ve,jef->jvf", emb_p,
                            wconv_e.reshape(KH, EMB, F3)).reshape(KH * VP, F3)
    kp["wconv"] = wfold_conv.astype(bf16)
    kp["bconv"] = bconv

    # TAE block weights (shared TAE applied per branch), DA padded 30 -> 32.
    tw1p = jnp.zeros((NF, DAP), f32).at[:, :DA].set(p["tw1"])
    tb1p = jnp.zeros((1, DAP), f32).at[:, :DA].set(p["tb1"])
    tw2p = jnp.zeros((DAP,), f32).at[:DA].set(p["tw2"][:, 0])
    tw1b = jnp.zeros((F3, 3 * DAP), f32)
    tw2b = jnp.zeros((3 * DAP, LBL3), f32)
    wfold = jnp.zeros((F3, LBL3), f32)
    fcw_sum = jnp.zeros((NF, LABELS), f32)
    for br in range(3):
        tw1b = tw1b.at[br * NF:(br + 1) * NF, br * DAP:(br + 1) * DAP].set(tw1p)
        tw2b = tw2b.at[br * DAP:(br + 1) * DAP, br * LABELS:(br + 1) * LABELS].set(
            jnp.tile(tw2p[:, None], (1, LABELS)))
        fcw_br = p["fcw"][br * NF:(br + 1) * NF, :]                 # (NF, LABELS)
        wfold = wfold.at[br * NF:(br + 1) * NF, br * LABELS:(br + 1) * LABELS].set(
            p["tw3"] @ fcw_br)
        fcw_sum = fcw_sum + fcw_br
    kp["tw1b"] = tw1b.astype(bf16)
    kp["tb1t"] = jnp.tile(tb1p, (1, 3))
    kp["tw2b"] = tw2b.astype(bf16)
    kp["wfold"] = wfold.astype(bf16)

    # multiplicative {0,1} validity mask per merged time row & branch, tiled over BT.
    vmask = np.zeros((TR, LBL3), np.float32)
    for br, (kh, pad) in enumerate(zip(KHS, PADS)):
        lo, hi = MAXPAD - pad, L + pad - kh + MAXPAD
        vmask[lo:hi + 1, br * LABELS:(br + 1) * LABELS] = 1.0
    assert float(vmask.sum(axis=0).min()) > 0.0, "fully-masked branch column"
    kp["vmask"] = jnp.asarray(np.tile(vmask, (BT, 1)))              # (M, 24)

    # region selector (BT, M): row b sums sequence b's TR time rows.
    selT = np.zeros((BT, M), np.float32)
    for b in range(BT):
        selT[b, b * TR:(b + 1) * TR] = 1.0
    kp["selT"] = jnp.asarray(selT)

    # branch-sum + lane-dense scatter selector (LBL3, OUTL) and folded bias (1, OUTL).
    fsel = np.zeros((LBL3, OUTL), np.float32)
    for br in range(3):
        for lbl in range(LABELS):
            fsel[br * LABELS + lbl, lbl] = 1.0
    kp["fsel"] = jnp.asarray(fsel)
    cb = p["tb3"] @ fcw_sum + p["fcb"]                              # (1, LABELS)
    kp["cbias"] = jnp.zeros((1, OUTL), f32).at[:, :LABELS].set(cb)
    return kp


# ------------------------- deterministic param init -------------------------
def _xavier(key, shape, fan_in, fan_out):
    bound = float(np.sqrt(6.0 / (fan_in + fan_out)))
    return jax.random.uniform(key, shape, jnp.float32, -bound, bound)


def init_params(key):
    ks = jax.random.split(key, 16)
    p = {}
    emb = jax.random.normal(ks[0], (VOCAB, EMB), jnp.float32)
    p["emb"] = emb.at[0].set(0.0)                       # padding_idx = 0
    for idx, (kh, name) in enumerate(zip(KHS, ("1", "2", "3"))):
        fan_in, fan_out = 1 * kh * EMB, NF * kh * EMB
        p["wc" + name] = _xavier(ks[1 + idx], (kh, EMB, NF), fan_in, fan_out)
        bb = 1.0 / float(np.sqrt(fan_in))
        p["bc" + name] = jax.random.uniform(ks[4 + idx], (1, NF), jnp.float32, -bb, bb)
    # TAE params: W1 (NF->DA), b1, w2 (DA->1), W3 (NF->NF), b3
    p["tw1"] = _xavier(ks[7], (NF, DA), NF, DA)
    p["tb1"] = jnp.zeros((1, DA), jnp.float32)
    p["tw2"] = _xavier(ks[8], (DA, 1), DA, 1)
    p["tw3"] = _xavier(ks[9], (NF, NF), NF, NF)
    p["tb3"] = jnp.zeros((1, NF), jnp.float32)
    # fc1: Linear(3*NF -> LABELS), stored transposed for x @ W
    p["fcw"] = _xavier(ks[10], (3 * NF, LABELS), 3 * NF, LABELS)
    bb = 1.0 / float(np.sqrt(3 * NF))
    p["fcb"] = jax.random.uniform(ks[11], (1, LABELS), jnp.float32, -bb, bb)
    return p


# ---------------------------- pure-JAX reference ----------------------------
def reference(tokens, p):
    x = jnp.take(p["emb"], tokens, axis=0)              # (B, L, E)

    def branch(w, b, kh, pad):
        xp = jnp.pad(x, ((0, 0), (pad, pad), (0, 0)))
        l_out = L + 2 * pad - kh + 1
        y = sum(jnp.einsum("ble,ef->blf", xp[:, j:j + l_out, :], w[j]) for j in range(kh))
        return jax.nn.relu(y + b[None])                  # (B, L_out, NF)

    def tae(h):
        u = jnp.tanh(jnp.einsum("btf,fd->btd", h, p["tw1"]) + p["tb1"][None])
        s = jnp.einsum("btd,do->bto", u, p["tw2"])[..., 0]
        alpha = jax.nn.softmax(s, axis=-1)
        pooled = jnp.einsum("bt,btf->bf", alpha, h)
        return pooled @ p["tw3"] + p["tb3"]

    feats = jnp.concatenate([tae(branch(p["wc1"], p["bc1"], 2, 1)),
                             tae(branch(p["wc2"], p["bc2"], 4, 3)),
                             tae(branch(p["wc3"], p["bc3"], 8, 7))], axis=-1)
    return feats @ p["fcw"] + p["fcb"]


if __name__ == "__main__":
    key = jax.random.PRNGKey(0)
    pkey, tkey, tkey2 = jax.random.split(key, 3)
    params = init_params(pkey)
    kparams = prepare_params(params)                    # one-time weight preprocessing
    fwd = jax.jit(cnntae_forward)

    # small demo batch (B=2, L=8)
    tokens = jax.random.randint(tkey, (B, L), 0, VOCAB, dtype=jnp.int32)
    out = jax.block_until_ready(fwd(tokens, kparams))
    ref = reference(tokens, params)
    # bf16 MXU operands + approx reciprocal => ~1e-3..1e-2 deviation from f32 reference.
    np.testing.assert_allclose(np.asarray(out), np.asarray(ref), rtol=2e-2, atol=2e-2)
    assert out.shape == (B, LABELS)

    # larger packed batch: 2 grid steps, weights stay resident, batch axis "parallel".
    tokens2 = jax.random.randint(tkey2, (10, L), 0, VOCAB, dtype=jnp.int32)
    out2 = jax.block_until_ready(fwd(tokens2, kparams))
    ref2 = reference(tokens2, params)
    np.testing.assert_allclose(np.asarray(out2), np.asarray(ref2), rtol=2e-2, atol=2e-2)

    print("KERNEL_OK")
</pallas_src>

<mosaic_0001>
module attributes {stable_mosaic.version = 11 : i64} {
  func.func @cnntae_kernel(%arg0: i32, %arg1: memref<128x8xi32, #tpu.memory_space<vmem>>, %arg2: memref<512x48xbf16, #tpu.memory_space<vmem>>, %arg3: memref<1x48xf32, #tpu.memory_space<vmem>>, %arg4: memref<48x96xbf16, #tpu.memory_space<vmem>>, %arg5: memref<1x96xf32, #tpu.memory_space<vmem>>, %arg6: memref<96x24xbf16, #tpu.memory_space<vmem>>, %arg7: memref<48x24xbf16, #tpu.memory_space<vmem>>, %arg8: memref<128x24xf32, #tpu.memory_space<vmem>>, %arg9: memref<8x128xf32, #tpu.memory_space<vmem>>, %arg10: memref<24x128xf32, #tpu.memory_space<vmem>>, %arg11: memref<1x128xf32, #tpu.memory_space<vmem>>, %arg12: memref<8x128xf32, #tpu.memory_space<vmem>>) attributes {dimension_semantics = [#tpu.dimension_semantics<parallel>], iteration_bounds = array<i64: 1>, scalar_prefetch = 0 : i64, scratch_operands = 0 : i64, tpu.core_type = #tpu.core_type<tc>, window_params = [{transform_indices = @transform_0, window_bounds = array<i64: 128, 8>}, {pipeline_mode = #tpu.pipeline_mode<synchronous>, transform_indices = @transform_1, window_bounds = array<i64: 512, 48>}, {pipeline_mode = #tpu.pipeline_mode<synchronous>, transform_indices = @transform_2, window_bounds = array<i64: 1, 48>}, {pipeline_mode = #tpu.pipeline_mode<synchronous>, transform_indices = @transform_3, window_bounds = array<i64: 48, 96>}, {pipeline_mode = #tpu.pipeline_mode<synchronous>, transform_indices = @transform_4, window_bounds = array<i64: 1, 96>}, {pipeline_mode = #tpu.pipeline_mode<synchronous>, transform_indices = @transform_5, window_bounds = array<i64: 96, 24>}, {pipeline_mode = #tpu.pipeline_mode<synchronous>, transform_indices = @transform_6, window_bounds = array<i64: 48, 24>}, {pipeline_mode = #tpu.pipeline_mode<synchronous>, transform_indices = @transform_7, window_bounds = array<i64: 128, 24>}, {pipeline_mode = #tpu.pipeline_mode<synchronous>, transform_indices = @transform_8, window_bounds = array<i64: 8, 128>}, {pipeline_mode = #tpu.pipeline_mode<synchronous>, transform_indices = @transform_9, window_bounds = array<i64: 24, 128>}, {pipeline_mode = #tpu.pipeline_mode<synchronous>, transform_indices = @transform_10, window_bounds = array<i64: 1, 128>}, {transform_indices = @transform_11, window_bounds = array<i64: 8, 128>}]} {
    %c0 = arith.constant 0 : index
    %c0_0 = arith.constant 0 : index
    %0 = vector.load %arg1[%c0, %c0_0] : memref<128x8xi32, #tpu.memory_space<vmem>>, vector<128x8xi32>
    %1 = tpu.iota {dimensions = array<i32: 1>} : vector<128x512xi32>
    %2 = vector.extract_strided_slice %0 {offsets = [0, 0], sizes = [128, 1], strides = [1, 1]} : vector<128x8xi32> to vector<128x1xi32>
    %3 = vector.broadcast %2 : vector<128x1xi32> to vector<128x512xi32>
    %4 = arith.cmpi eq, %1, %3 : vector<128x512xi32>
    %5 = vector.extract_strided_slice %0 {offsets = [0, 1], sizes = [128, 1], strides = [1, 1]} : vector<128x8xi32> to vector<128x1xi32>
    %6 = vector.broadcast %5 : vector<128x1xi32> to vector<128x512xi32>
    %7 = arith.cmpi eq, %1, %6 : vector<128x512xi32>
    %8 = arith.ori %4, %7 : vector<128x512xi1>
    %9 = vector.extract_strided_slice %0 {offsets = [0, 2], sizes = [128, 1], strides = [1, 1]} : vector<128x8xi32> to vector<128x1xi32>
    %10 = vector.broadcast %9 : vector<128x1xi32> to vector<128x512xi32>
    %11 = arith.cmpi eq, %1, %10 : vector<128x512xi32>
    %12 = arith.ori %8, %11 : vector<128x512xi1>
    %13 = vector.extract_strided_slice %0 {offsets = [0, 3], sizes = [128, 1], strides = [1, 1]} : vector<128x8xi32> to vector<128x1xi32>
    %14 = vector.broadcast %13 : vector<128x1xi32> to vector<128x512xi32>
    %15 = arith.cmpi eq, %1, %14 : vector<128x512xi32>
    %16 = arith.ori %12, %15 : vector<128x512xi1>
    %17 = vector.extract_strided_slice %0 {offsets = [0, 4], sizes = [128, 1], strides = [1, 1]} : vector<128x8xi32> to vector<128x1xi32>
    %18 = vector.broadcast %17 : vector<128x1xi32> to vector<128x512xi32>
    %19 = arith.cmpi eq, %1, %18 : vector<128x512xi32>
    %20 = arith.ori %16, %19 : vector<128x512xi1>
    %21 = vector.extract_strided_slice %0 {offsets = [0, 5], sizes = [128, 1], strides = [1, 1]} : vector<128x8xi32> to vector<128x1xi32>
    %22 = vector.broadcast %21 : vector<128x1xi32> to vector<128x512xi32>
    %23 = arith.cmpi eq, %1, %22 : vector<128x512xi32>
    %24 = arith.ori %20, %23 : vector<128x512xi1>
    %25 = vector.extract_strided_slice %0 {offsets = [0, 6], sizes = [128, 1], strides = [1, 1]} : vector<128x8xi32> to vector<128x1xi32>
    %26 = vector.broadcast %25 : vector<128x1xi32> to vector<128x512xi32>
    %27 = arith.cmpi eq, %1, %26 : vector<128x512xi32>
    %28 = arith.ori %24, %27 : vector<128x512xi1>
    %29 = vector.extract_strided_slice %0 {offsets = [0, 7], sizes = [128, 1], strides = [1, 1]} : vector<128x8xi32> to vector<128x1xi32>
    %30 = vector.broadcast %29 : vector<128x1xi32> to vector<128x512xi32>
    %31 = arith.cmpi eq, %1, %30 : vector<128x512xi32>
    %32 = arith.ori %28, %31 : vector<128x512xi1>
    %33 = arith.extui %32 : vector<128x512xi1> to vector<128x512xi32>
    %34 = arith.sitofp %33 : vector<128x512xi32> to vector<128x512xf32>
    %35 = arith.truncf %34 : vector<128x512xf32> to vector<128x512xbf16>
    %c0_1 = arith.constant 0 : index
    %c0_2 = arith.constant 0 : index
    %36 = vector.load %arg2[%c0_1, %c0_2] : memref<512x48xbf16, #tpu.memory_space<vmem>>, vector<512x48xbf16>
    %cst = arith.constant dense<0.000000e+00> : vector<128x48xf32>
    %37 = tpu.matmul %35, %36, %cst {dimension_numbers = #tpu.dot_dimension_numbers<[1], [0], [0], [1], [0, 0, 1, 1], [], []>} : vector<128x512xbf16>, vector<512x48xbf16>, vector<128x48xf32> -> vector<128x48xf32>
    %c0_3 = arith.constant 0 : index
    %c0_4 = arith.constant 0 : index
    %38 = vector.load %arg3[%c0_3, %c0_4] : memref<1x48xf32, #tpu.memory_space<vmem>>, vector<1x48xf32>
    %39 = vector.broadcast %38 : vector<1x48xf32> to vector<128x48xf32>
    %40 = arith.addf %37, %39 : vector<128x48xf32>
    %cst_5 = arith.constant 0.000000e+00 : f32
    %41 = vector.broadcast %cst_5 : f32 to vector<128x48xf32>
    %42 = arith.maximumf %40, %41 : vector<128x48xf32>
    %43 = arith.truncf %42 : vector<128x48xf32> to vector<128x48xbf16>
    %c0_6 = arith.constant 0 : index
    %c0_7 = arith.constant 0 : index
    %44 = vector.load %arg4[%c0_6, %c0_7] : memref<48x96xbf16, #tpu.memory_space<vmem>>, vector<48x96xbf16>
    %cst_8 = arith.constant dense<0.000000e+00> : vector<128x96xf32>
    %45 = tpu.matmul %43, %44, %cst_8 {dimension_numbers = #tpu.dot_dimension_numbers<[1], [0], [0], [1], [0, 0, 1, 1], [], []>} : vector<128x48xbf16>, vector<48x96xbf16>, vector<128x96xf32> -> vector<128x96xf32>
    %c0_9 = arith.constant 0 : index
    %c0_10 = arith.constant 0 : index
    %46 = vector.load %arg5[%c0_9, %c0_10] : memref<1x96xf32, #tpu.memory_space<vmem>>, vector<1x96xf32>
    %47 = vector.broadcast %46 : vector<1x96xf32> to vector<128x96xf32>
    %48 = arith.addf %45, %47 : vector<128x96xf32>
    %49 = math.tanh %48 : vector<128x96xf32>
    %50 = arith.truncf %49 : vector<128x96xf32> to vector<128x96xbf16>
    %c0_11 = arith.constant 0 : index
    %c0_12 = arith.constant 0 : index
    %51 = vector.load %arg6[%c0_11, %c0_12] : memref<96x24xbf16, #tpu.memory_space<vmem>>, vector<96x24xbf16>
    %cst_13 = arith.constant dense<0.000000e+00> : vector<128x24xf32>
    %52 = tpu.matmul %50, %51, %cst_13 {dimension_numbers = #tpu.dot_dimension_numbers<[1], [0], [0], [1], [0, 0, 1, 1], [], []>} : vector<128x96xbf16>, vector<96x24xbf16>, vector<128x24xf32> -> vector<128x24xf32>
    %c0_14 = arith.constant 0 : index
    %c0_15 = arith.constant 0 : index
    %53 = vector.load %arg7[%c0_14, %c0_15] : memref<48x24xbf16, #tpu.memory_space<vmem>>, vector<48x24xbf16>
    %cst_16 = arith.constant dense<0.000000e+00> : vector<128x24xf32>
    %54 = tpu.matmul %43, %53, %cst_16 {dimension_numbers = #tpu.dot_dimension_numbers<[1], [0], [0], [1], [0, 0, 1, 1], [], []>} : vector<128x48xbf16>, vector<48x24xbf16>, vector<128x24xf32> -> vector<128x24xf32>
    %55 = math.exp %52 : vector<128x24xf32>
    %c0_17 = arith.constant 0 : index
    %c0_18 = arith.constant 0 : index
    %56 = vector.load %arg8[%c0_17, %c0_18] : memref<128x24xf32, #tpu.memory_space<vmem>>, vector<128x24xf32>
    %57 = arith.mulf %55, %56 : vector<128x24xf32>
    %c0_19 = arith.constant 0 : index
    %c0_20 = arith.constant 0 : index
    %58 = vector.load %arg9[%c0_19, %c0_20] : memref<8x128xf32, #tpu.memory_space<vmem>>, vector<8x128xf32>
    %cst_21 = arith.constant dense<0.000000e+00> : vector<8x24xf32>
    %59 = tpu.matmul %58, %57, %cst_21 {dimension_numbers = #tpu.dot_dimension_numbers<[1], [0], [0], [1], [0, 0, 1, 1], [], []>} : vector<8x128xf32>, vector<128x24xf32>, vector<8x24xf32> -> vector<8x24xf32>
    %60 = arith.mulf %57, %54 : vector<128x24xf32>
    %cst_22 = arith.constant dense<0.000000e+00> : vector<8x24xf32>
    %61 = tpu.matmul %58, %60, %cst_22 {dimension_numbers = #tpu.dot_dimension_numbers<[1], [0], [0], [1], [0, 0, 1, 1], [], []>} : vector<8x128xf32>, vector<128x24xf32>, vector<8x24xf32> -> vector<8x24xf32>
    %62 = tpu.reciprocal %59 {approx = true} : vector<8x24xf32> -> vector<8x24xf32>
    %63 = arith.mulf %61, %62 : vector<8x24xf32>
    %c0_23 = arith.constant 0 : index
    %c0_24 = arith.constant 0 : index
    %64 = vector.load %arg10[%c0_23, %c0_24] : memref<24x128xf32, #tpu.memory_space<vmem>>, vector<24x128xf32>
    %cst_25 = arith.constant dense<0.000000e+00> : vector<8x128xf32>
    %65 = tpu.matmul %63, %64, %cst_25 {dimension_numbers = #tpu.dot_dimension_numbers<[1], [0], [0], [1], [0, 0, 1, 1], [], []>} : vector<8x24xf32>, vector<24x128xf32>, vector<8x128xf32> -> vector<8x128xf32>
    %c0_26 = arith.constant 0 : index
    %c0_27 = arith.constant 0 : index
    %66 = vector.load %arg11[%c0_26, %c0_27] : memref<1x128xf32, #tpu.memory_space<vmem>>, vector<1x128xf32>
    %67 = vector.broadcast %66 : vector<1x128xf32> to vector<8x128xf32>
    %68 = arith.addf %65, %67 : vector<8x128xf32>
    %c0_28 = arith.constant 0 : index
    %c0_29 = arith.constant 0 : index
    %69 = vector.load %arg12[%c0_28, %c0_29] : memref<8x128xf32, #tpu.memory_space<vmem>>, vector<8x128xf32>
    tpu.vector_store %arg12[%c0_28, %c0_29], %68 {strides = array<i32>} : memref<8x128xf32, #tpu.memory_space<vmem>>, vector<8x128xf32>,
    return
  }
  func.func @transform_0(%arg0: i32) -> (i32, i32) {
    %c0_i32 = arith.constant 0 : i32
    %c0_i32_0 = arith.constant 0 : i32
    return %arg0, %c0_i32 : i32, i32
  }
  func.func @transform_1(%arg0: i32) -> (i32, i32) {
    %c0_i32 = arith.constant 0 : i32
    %c0_i32_0 = arith.constant 0 : i32
    %c0_i32_1 = arith.constant 0 : i32
    return %c0_i32, %c0_i32_0 : i32, i32
  }
  func.func @transform_2(%arg0: i32) -> (i32, i32) {
    %c0_i32 = arith.constant 0 : i32
    %c0_i32_0 = arith.constant 0 : i32
    %c0_i32_1 = arith.constant 0 : i32
    return %c0_i32, %c0_i32_0 : i32, i32
  }
  func.func @transform_3(%arg0: i32) -> (i32, i32) {
    %c0_i32 = arith.constant 0 : i32
    %c0_i32_0 = arith.constant 0 : i32
    %c0_i32_1 = arith.constant 0 : i32
    return %c0_i32, %c0_i32_0 : i32, i32
  }
  func.func @transform_4(%arg0: i32) -> (i32, i32) {
    %c0_i32 = arith.constant 0 : i32
    %c0_i32_0 = arith.constant 0 : i32
    %c0_i32_1 = arith.constant 0 : i32
    return %c0_i32, %c0_i32_0 : i32, i32
  }
  func.func @transform_5(%arg0: i32) -> (i32, i32) {
    %c0_i32 = arith.constant 0 : i32
    %c0_i32_0 = arith.constant 0 : i32
    %c0_i32_1 = arith.constant 0 : i32
    return %c0_i32, %c0_i32_0 : i32, i32
  }
  func.func @transform_6(%arg0: i32) -> (i32, i32) {
    %c0_i32 = arith.constant 0 : i32
    %c0_i32_0 = arith.constant 0 : i32
    %c0_i32_1 = arith.constant 0 : i32
    return %c0_i32, %c0_i32_0 : i32, i32
  }
  func.func @transform_7(%arg0: i32) -> (i32, i32) {
    %c0_i32 = arith.constant 0 : i32
    %c0_i32_0 = arith.constant 0 : i32
    %c0_i32_1 = arith.constant 0 : i32
    return %c0_i32, %c0_i32_0 : i32, i32
  }
  func.func @transform_8(%arg0: i32) -> (i32, i32) {
    %c0_i32 = arith.constant 0 : i32
    %c0_i32_0 = arith.constant 0 : i32
    %c0_i32_1 = arith.constant 0 : i32
    return %c0_i32, %c0_i32_0 : i32, i32
  }
  func.func @transform_9(%arg0: i32) -> (i32, i32) {
    %c0_i32 = arith.constant 0 : i32
    %c0_i32_0 = arith.constant 0 : i32
    %c0_i32_1 = arith.constant 0 : i32
    return %c0_i32, %c0_i32_0 : i32, i32
  }
  func.func @transform_10(%arg0: i32) -> (i32, i32) {
    %c0_i32 = arith.constant 0 : i32
    %c0_i32_0 = arith.constant 0 : i32
    %c0_i32_1 = arith.constant 0 : i32
    return %c0_i32, %c0_i32_0 : i32, i32
  }
  func.func @transform_11(%arg0: i32) -> (i32, i32) {
    %c0_i32 = arith.constant 0 : i32
    %c0_i32_0 = arith.constant 0 : i32
    return %arg0, %c0_i32 : i32, i32
  }
}

</mosaic_0001>

<bundles_post_ra>
// kernel: cnntae_forward.1
= control target key start
LH: loop header
LB: loop body
LE: loop exit
PB: predicated region body
PF: predicated region fallthrough
CT: control target
= control target key end

     0   :  { %v6928_v0 = vmov 3   ;;  %v6925_v1 = vmov 1   ;;  %v6932_v5 = vmov 4   ;;  %v6924_v7 = vmov 2   ;;  %s6908_s0 = inlined_call_operand.vmem [shape: s32[128,8], index: 0, kind: input, shape index: {}]   ;;  %s6909_s1 = inlined_call_operand.vmem [shape: bf16[512,48], index: 1, kind: input, shape index: {}]   ;;  %s6910_s2 = inlined_call_operand.vmem [shape: f32[1,48], index: 2, kind: input, shape index: {}]   ;;  %s6911_s3 = inlined_call_operand.vmem [shape: bf16[48,96], index: 3, kind: input, shape index: {}]   ;;  %s6912_s6 = inlined_call_operand.vmem [shape: bf16[48,24], index: 6, kind: input, shape index: {}]   ;;  %s6913_s5 = inlined_call_operand.vmem [shape: bf16[96,24], index: 5, kind: input, shape index: {}]   ;;  %s6914_s4 = inlined_call_operand.vmem [shape: f32[1,96], index: 4, kind: input, shape index: {}]   ;;  %s6915_s7 = inlined_call_operand.vmem [shape: f32[128,24], index: 7, kind: input, shape index: {}]   ;;  %s6916_s8 = inlined_call_operand.vmem [shape: f32[8,128], index: 8, kind: input, shape index: {}]   ;;  %s6917_s9 = inlined_call_operand.vmem [shape: f32[24,128], index: 9, kind: input, shape index: {}]   ;;  %s6918_s10 = inlined_call_operand.vmem [shape: f32[1,128], index: 10, kind: input, shape index: {}]   ;;  %s6919_s11 = inlined_call_operand.vmem [shape: f32[8,128], index: 11, kind: output, shape index: {}]  }
   0x1   :  { %3385 = vset.pattern.permute.xlu0 %v6928_v0  ;;  %3382 = vset.pattern.permute.xlu1 %v6925_v1  ;;  %v3647_v2 = vld [vmem:[%s6908_s0 + $0x8] sm:$0xff]  ;;  %v3652_v3 = vld [vmem:[%s6908_s0] sm:$0xff]  ;;  %v3659_v4 = vld [vmem:[%s6908_s0 + $0x18] sm:$0xff]  ;;  %v6926_v8 = vmov 6   ;;  %v6931_v12 = vmov 5   ;;  %v6922_v13 = vmov 7  }
   0x2   :  { %528 = vperm.xlu0 %3385, %v3647_v2   ;;  %173 = vperm.xlu1 %3382, %v3652_v3   ;;  %v3667_v6 = vld [vmem:[%s6908_s0 + $0x20] sm:$0xff]  ;;  %v3679_v9 = vld [vmem:[%s6908_s0 + $0x10] sm:$0xff]  ;;  %v3687_v10 = vld [vmem:[%s6908_s0 + $0x38] sm:$0xff]  ;;  %v6920_v16 = vmov 0  }
   0x3   :  { %v3694_v11 = vld [vmem:[%s6908_s0 + $0x40] sm:$0xff]  ;;  %v3707_v14 = vld [vmem:[%s6908_s0 + $0x48] sm:$0xff]  ;;  %v3715_v15 = vld [vmem:[%s6908_s0 + $0x50] sm:$0xff] }
   0x4   :  { %v3726_v17 = vld [vmem:[%s6908_s0 + $0x28] sm:$0xff]  ;;  %v3734_v18 = vld [vmem:[%s6908_s0 + $0x30] sm:$0xff]  ;;  %v3742_v19 = vld [vmem:[%s6908_s0 + $0x58] sm:$0xff] }
   0x5   :  { %v3749_v20 = vld [vmem:[%s6908_s0 + $0x60] sm:$0xff]  ;;  %v3461_v25 = vld [vmem:[%s6909_s1 + $0x48] sm:$0xff]   ;;  %v3465_v29 = vld [vmem:[%s6909_s1 + $0x50] sm:$0xff]  }
   0x6   :  { %3395 = vset.pattern.permute.xlu0 %v6932_v5  ;;  %176 = vperm.xlu1 %3382, %v3647_v2   ;;  %v3457_v21 = vld [vmem:[%s6909_s1 + $0x40] sm:$0xff]   ;;  %v3462_v26 = vld [vmem:[%s6909_s1 + $0xc8] sm:$0xff]   ;;  %v3466_v30 = vld [vmem:[%s6909_s1 + $0xd0] sm:$0xff]  }
   0x7   :  { %710 = vperm.xlu0 %3395, %v3659_v4   ;;  %v3458_v22 = vld [vmem:[%s6909_s1 + $0xc0] sm:$0xff]   ;;  %2961 = vmatprep.subr.bf16.mxu0 %v3457_v21  ;;  %v3463_v27 = vld [vmem:[%s6909_s1 + $0x8] sm:$0xff]   ;;  %v3467_v31 = vld [vmem:[%s6909_s1 + $0x10] sm:$0xff]  }
   0x8   :  { %v3459_v23 = vld [vmem:[%s6909_s1] sm:$0xff]   ;;  %3025 = vmatprep.subr.bf16.mxu1 %v3458_v22  ;;  %v3464_v28 = vld [vmem:[%s6909_s1 + $0x88] sm:$0xff]   ;;  %v3468_v32 = vld [vmem:[%s6909_s1 + $0x90] sm:$0xff]  }
   0x9   :  { %v3460_v24 = vld [vmem:[%s6909_s1 + $0x80] sm:$0xff]   ;;  %2962 = vmatpush3.bf16.msra.mxu0 %v3459_v23  ;;  %v3469_v33 = vld [vmem:[%s6909_s1 + $0x58] sm:$0xff]   ;;  %v3477_v41 = vld [vmem:[%s6909_s1 + $0x68] sm:$0xff]  }
   0xa   :  { %3383 = vset.pattern.permute.xlu1 %v6924_v7  ;;  %3026 = vmatpush3.bf16.msra.mxu1 %v3460_v24  ;;  %v3470_v34 = vld [vmem:[%s6909_s1 + $0xd8] sm:$0xff]   ;;  %v3473_v37 = vld [vmem:[%s6909_s1 + $0x60] sm:$0xff]   ;;  %v3478_v42 = vld [vmem:[%s6909_s1 + $0xe8] sm:$0xff]  }
   0xb   :  { %713 = vperm.xlu0 %3395, %v3667_v6   ;;  %352 = vperm.xlu1 %3383, %v3647_v2   ;;  %v3471_v35 = vld [vmem:[%s6909_s1 + $0x18] sm:$0xff]   ;;  %v3474_v38 = vld [vmem:[%s6909_s1 + $0xe0] sm:$0xff]   ;;  %v3479_v43 = vld [vmem:[%s6909_s1 + $0x28] sm:$0xff]  }
   0xc   :  { %2963 = vmatprep.subr.bf16.mxu0 %v3461_v25  ;;  %3027 = vmatprep.subr.bf16.mxu1 %v3462_v26  ;;  %v3472_v36 = vld [vmem:[%s6909_s1 + $0x98] sm:$0xff]   ;;  %v3475_v39 = vld [vmem:[%s6909_s1 + $0x20] sm:$0xff]   ;;  %v3480_v44 = vld [vmem:[%s6909_s1 + $0xa8] sm:$0xff]  }
   0xd   :  { %2964 = vmatpush3.bf16.msra.mxu0 %v3463_v27  ;;  %v3476_v40 = vld [vmem:[%s6909_s1 + $0xa0] sm:$0xff]   ;;  %v3855_v45 = vld [vmem:[%s6908_s0 + $0x68] sm:$0xff]  ;;  %v3481_v46 = vld [vmem:[%s6909_s1 + $0x70] sm:$0xff]  }
   0xe   :  { %3028 = vmatpush3.bf16.msra.mxu1 %v3464_v28  ;;  %2965 = vmatprep.subr.bf16.mxu0 %v3465_v29  ;;  %v3482_v47 = vld [vmem:[%s6909_s1 + $0xf0] sm:$0xff]   ;;  %v3485_v50 = vld [vmem:[%s6909_s1 + $0x78] sm:$0xff]  }
   0xf   :  { %3403 = vset.pattern.permute.xlu0 %v6926_v8  ;;  %3384 = vset.pattern.permute.xlu1 %v6928_v0  ;;  %v3483_v48 = vld [vmem:[%s6909_s1 + $0x30] sm:$0xff]   ;;  %v3486_v51 = vld [vmem:[%s6909_s1 + $0xf8] sm:$0xff]  }
  0x10   :  { %1056 = vperm.xlu0 %3403, %v3647_v2   ;;  %525 = vperm.xlu1 %3384, %v3652_v3   ;;  %v3484_v49 = vld [vmem:[%s6909_s1 + $0xb0] sm:$0xff]   ;;  %v3487_v53 = vld [vmem:[%s6909_s1 + $0x38] sm:$0xff]  }
  0x11   :  { %3029 = vmatprep.subr.bf16.mxu1 %v3466_v30  ;;  %2966 = vmatpush3.bf16.msra.mxu0 %v3467_v31  ;;  %v3881_v52 = vld [vmem:[%s6908_s0 + $0x70] sm:$0xff]  ;;  %v3488_v54 = vld [vmem:[%s6909_s1 + $0xb8] sm:$0xff]  }
  0x12   :  { %3030 = vmatpush3.bf16.msra.mxu1 %v3468_v32  ;;  %2967 = vmatprep.subr.bf16.mxu0 %v3469_v33  ;;  %v3908_v56 = vld [vmem:[%s6908_s0 + $0x78] sm:$0xff] }
  0x13   :  { %3031 = vmatprep.subr.bf16.mxu1 %v3470_v34 }
  0x14   :  { %1059 = vperm.xlu0 %3403, %v3679_v9   ;;  %3386 = vset.pattern.permute.xlu1 %v6932_v5 }
  0x15   :  { %701 = vperm.xlu1 %3386, %v3652_v3   ;;  %2968 = vmatpush3.bf16.msra.mxu0 %v3471_v35 }
  0x16   :  { %3032 = vmatpush3.bf16.msra.mxu1 %v3472_v36  ;;  %2969 = vmatprep.subr.bf16.mxu0 %v3473_v37 }
  0x17   :  { %3033 = vmatprep.subr.bf16.mxu1 %v3474_v38 }
  0x18   :  { %1074 = vperm.xlu0 %3403, %v3687_v10  }
  0x19   :  { %704 = vperm.xlu1 %3386, %v3647_v2   ;;  %2970 = vmatpush3.bf16.msra.mxu0 %v3475_v39  ;;  %v55_v39 = vlaneseq }
  0x1a   :  { %3034 = vmatpush3.bf16.msra.mxu1 %v3476_v40  ;;  %2971 = vmatprep.subr.bf16.mxu0 %v3477_v41 }
  0x1b   :  { %3035 = vmatprep.subr.bf16.mxu1 %v3478_v42  ;;  %v4030_v42 = vand.u32 127, %v55_v39  ;;  %v6955_v39 = vmov 0 }
  0x1c   :  { %1077 = vperm.xlu0 %3403, %v3694_v11  }
  0x1d   :  { %3387 = vset.pattern.permute.xlu1 %v6931_v12  ;;  %2972 = vmatpush3.bf16.msra.mxu0 %v3479_v43  ;;  %v4034_v43 = vadd.s32 128, %v4030_v42 }
  0x1e   :  { %880 = vperm.xlu1 %3387, %v3647_v2   ;;  %3036 = vmatpush3.bf16.msra.mxu1 %v3480_v44 }
  0x1f   :  { %2973 = vmatprep.subr.bf16.mxu0 %v3481_v46  ;;  %3037 = vmatprep.subr.bf16.mxu1 %v3482_v47  ;;  %v4041_v47 = vadd.s32 256, %v4030_v42 }
  0x20   :  { %3422 = vset.pattern.permute.xlu0 %v6922_v13 }
  0x21   :  { %1238 = vperm.xlu0 %3422, %v3659_v4   ;;  %2974 = vmatpush3.bf16.msra.mxu0 %v3483_v48  ;;  %v4049_v48 = vadd.s32 384, %v4030_v42 }
  0x22   :  { %3388 = vset.pattern.permute.xlu1 %v6926_v8  ;;  %3038 = vmatpush3.bf16.msra.mxu1 %v3484_v49 }
  0x23   :  { %1053 = vperm.xlu1 %3388, %v3652_v3   ;;  %2975 = vmatprep.subr.bf16.mxu0 %v3485_v50 }
  0x24   :  { %3039 = vmatprep.subr.bf16.mxu1 %v3486_v51  ;;  %v6929_v51 = vmov 0.0  }
  0x25   :  { %1241 = vperm.xlu0 %3422, %v3667_v6   ;;  %2976 = vmatpush3.bf16.msra.mxu0 %v3487_v53 }
  0x26   :  { %3040 = vmatpush3.bf16.msra.mxu1 %v3488_v54  ;;  %v6945_v54 = vmov 0 }
  0x27   :  { %3389 = vset.pattern.permute.xlu1 %v6922_v13 }
  0x28   :  { %1229 = vperm.xlu1 %3389, %v3652_v3  }
  0x29   :  { %1256 = vperm.xlu0 %3422, %v3707_v14  }
  0x2c   :  { %1232 = vperm.xlu1 %3389, %v3647_v2  }
  0x2d   :  { %1259 = vperm.xlu0 %3422, %v3715_v15  }
  0x30   :  { %3390 = vset.pattern.permute.xlu1 %v6920_v16 }
  0x31   :  { %3432 = vset.pattern.permute.xlu0 %v6924_v7  ;;  %70 = vperm.xlu1 %3390, %v3659_v4  }
  0x32   :  { %349 = vperm.xlu0 %3432, %v3652_v3  }
  0x35   :  { %3391 = vset.pattern.permute.xlu1 %v6925_v1 }
  0x36   :  { %364 = vperm.xlu0 %3432, %v3726_v17   ;;  %179 = vperm.xlu1 %3391, %v3679_v9  }
  0x3a   :  { %367 = vperm.xlu0 %3432, %v3734_v18   ;;  %3392 = vset.pattern.permute.xlu1 %v6924_v7 }
  0x3b   :  { %355 = vperm.xlu1 %3392, %v3679_v9  }
  0x3e   :  { %382 = vperm.xlu0 %3432, %v3742_v19  }
  0x3f   :  { %358 = vperm.xlu1 %3392, %v3659_v4  }
  0x42   :  { %385 = vperm.xlu0 %3432, %v3749_v20  }
  0x43   :  { %3393 = vset.pattern.permute.xlu1 %v6928_v0 }
  0x44   :  { %534 = vperm.xlu1 %3393, %v3659_v4  }
  0x46   :  { %3436 = vset.pattern.permute.xlu0 %v6931_v12 }
  0x47   :  { %877 = vperm.xlu0 %3436, %v3652_v3  }
  0x48   :  { %3394 = vset.pattern.permute.xlu1 %v6932_v5 }
  0x49   :  { %707 = vperm.xlu1 %3394, %v3679_v9  }
  0x4b   :  { %892 = vperm.xlu0 %3436, %v3726_v17  }
  0x4d   :  { %3396 = vset.pattern.permute.xlu1 %v6931_v12 }
  0x4e   :  { %883 = vperm.xlu1 %3396, %v3679_v9  }
  0x4f   :  { %895 = vperm.xlu0 %3436, %v3734_v18  }
  0x52   :  { %886 = vperm.xlu1 %3396, %v3659_v4  }
  0x53   :  { %910 = vperm.xlu0 %3436, %v3742_v19  }
  0x56   :  { %3397 = vset.pattern.permute.xlu1 %v6926_v8 }
  0x57   :  { %913 = vperm.xlu0 %3436, %v3749_v20   ;;  %1062 = vperm.xlu1 %3397, %v3659_v4  }
  0x5b   :  { %3440 = vset.pattern.permute.xlu0 %v6920_v16  ;;  %3398 = vset.pattern.permute.xlu1 %v6922_v13 }
  0x5c   :  { %61 = vperm.xlu0 %3440, %v3652_v3   ;;  %1235 = vperm.xlu1 %3398, %v3679_v9  }
  0x60   :  { %64 = vperm.xlu0 %3440, %v3647_v2   ;;  %3399 = vset.pattern.permute.xlu1 %v6920_v16 }
  0x61   :  { %73 = vperm.xlu1 %3399, %v3667_v6  }
  0x64   :  { %67 = vperm.xlu0 %3440, %v3679_v9  }
  0x65   :  { %76 = vperm.xlu1 %3399, %v3726_v17  }
  0x68   :  { %82 = vperm.xlu0 %3440, %v3687_v10  }
  0x69   :  { %3400 = vset.pattern.permute.xlu1 %v6925_v1 }
  0x6a   :  { %188 = vperm.xlu1 %3400, %v3726_v17  }
  0x6c   :  { %85 = vperm.xlu0 %3440, %v3694_v11  }
  0x6e   :  { %3401 = vset.pattern.permute.xlu1 %v6924_v7 }
  0x6f   :  { %361 = vperm.xlu1 %3401, %v3667_v6  }
  0x70   :  { %100 = vperm.xlu0 %3440, %v3855_v45  }
  0x73   :  { %3402 = vset.pattern.permute.xlu1 %v6928_v0 }
  0x74   :  { %103 = vperm.xlu0 %3440, %v3881_v52   ;;  %537 = vperm.xlu1 %3402, %v3667_v6  }
  0x78   :  { %3444 = vset.pattern.permute.xlu0 %v6925_v1  ;;  %540 = vperm.xlu1 %3402, %v3726_v17  }
  0x79   :  { %182 = vperm.xlu0 %3444, %v3659_v4  }
  0x7c   :  { %3404 = vset.pattern.permute.xlu1 %v6932_v5 }
  0x7d   :  { %185 = vperm.xlu0 %3444, %v3667_v6   ;;  %716 = vperm.xlu1 %3404, %v3726_v17  }
  0x81   :  { %200 = vperm.xlu0 %3444, %v3707_v14   ;;  %3405 = vset.pattern.permute.xlu1 %v6931_v12  ;;  %v3900_v55 = vpop.permute.xlu0 %528  ;;  %v3931_v62 = vpop.permute.xlu1 %173 }
  0x82   :  { %889 = vperm.xlu1 %3405, %v3667_v6   ;;  %vm220_vm2 = vcmp.eq.s32.totalorder %v4030_v42, %v3931_v62  ;;  %vm221_vm5 = vcmp.eq.s32.totalorder %v4034_v43, %v3931_v62  ;;  %vm222_vm13 = vcmp.eq.s32.totalorder %v4041_v47, %v3931_v62 }
  0x85   :  { %203 = vperm.xlu0 %3444, %v3715_v15   ;;  %v3940_v2 = vpop.permute.xlu1 %176 }
  0x86   :  { %3406 = vset.pattern.permute.xlu1 %v6926_v8  ;;  %v3910_v57 = vpop.permute.xlu0 %710  ;;  %vm225_vm11 = vcmp.eq.s32.totalorder %v4034_v43, %v3940_v2  ;;  %vm224_vm14 = vcmp.eq.s32.totalorder %v4030_v42, %v3940_v2 }
  0x87   :  { %1065 = vperm.xlu1 %3406, %v3667_v6  }
  0x89   :  { %218 = vperm.xlu0 %3444, %v3908_v56  }
  0x8a   :  { %v3914_v58 = vpop.permute.xlu0 %713  ;;  %v3950_v6 = vpop.permute.xlu1 %352 }
  0x8b   :  { %1068 = vperm.xlu1 %3406, %v3726_v17  }
  0x8d   :  { %3447 = vset.pattern.permute.xlu0 %v6928_v0 }
  0x8e   :  { %531 = vperm.xlu0 %3447, %v3679_v9  }
  0x8f   :  { %3407 = vset.pattern.permute.xlu1 %v6922_v13  ;;  %v3920_v59 = vpop.permute.xlu0 %1056 }
  0x90   :  { %1244 = vperm.xlu1 %3407, %v3726_v17   ;;  %v3957_v17 = vpop.permute.xlu1 %525 }
  0x92   :  { %546 = vperm.xlu0 %3447, %v3687_v10  }
  0x93   :  { %v3924_v60 = vpop.permute.xlu0 %1059 }
  0x94   :  { %3408 = vset.pattern.permute.xlu1 %v6920_v16  ;;  %v3966_v22 = vpop.permute.xlu1 %701 }
  0x95   :  { %79 = vperm.xlu1 %3408, %v3734_v18  }
  0x96   :  { %549 = vperm.xlu0 %3447, %v3694_v11  }
  0x97   :  { %v3929_v61 = vpop.permute.xlu0 %1074 }
  0x98   :  { %v3976_v25 = vpop.permute.xlu1 %704 }
  0x99   :  { %3409 = vset.pattern.permute.xlu1 %v6925_v1 }
  0x9a   :  { %191 = vperm.xlu1 %3409, %v3734_v18   ;;  %564 = vperm.xlu0 %3447, %v3855_v45  }
  0x9b   :  { %v3936_v63 = vpop.permute.xlu0 %1077 }
  0x9d   :  { %v3984_v27 = vpop.permute.xlu1 %880 }
  0x9e   :  { %194 = vperm.xlu1 %3409, %v3687_v10   ;;  %567 = vperm.xlu0 %3447, %v3881_v52  }
  0xa0   :  { %v3942_v3 = vpop.permute.xlu0 %1238 }
  0xa2   :  { %3410 = vset.pattern.permute.xlu1 %v6924_v7  ;;  %3449 = vset.pattern.permute.xlu0 %v6932_v5  ;;  %v3990_v29 = vpop.permute.xlu1 %1053 }
  0xa3   :  { %370 = vperm.xlu1 %3410, %v3687_v10   ;;  %728 = vperm.xlu0 %3449, %v3707_v14  }
  0xa4   :  { %v3948_v4 = vpop.permute.xlu0 %1241 }
  0xa7   :  { %3411 = vset.pattern.permute.xlu1 %v6928_v0  ;;  %731 = vperm.xlu0 %3449, %v3715_v15   ;;  %v3996_v31 = vpop.permute.xlu1 %1229 }
  0xa8   :  { %543 = vperm.xlu1 %3411, %v3734_v18   ;;  %v3955_v9 = vpop.permute.xlu0 %1256 }
  0xab   :  { %746 = vperm.xlu0 %3449, %v3908_v56   ;;  %v4003_v33 = vpop.permute.xlu1 %1232 }
  0xac   :  { %3412 = vset.pattern.permute.xlu1 %v6932_v5  ;;  %v3961_v21 = vpop.permute.xlu0 %1259 }
  0xad   :  { %719 = vperm.xlu1 %3412, %v3734_v18  }
  0xaf   :  { %3452 = vset.pattern.permute.xlu0 %v6926_v8 }
  0xb0   :  { %1092 = vperm.xlu0 %3452, %v3855_v45  }
  0xb1   :  { %722 = vperm.xlu1 %3412, %v3687_v10   ;;  %v3969_v23 = vpop.permute.xlu0 %349 }
  0xb2   :  { %vm397_vm8 = vcmp.eq.s32.totalorder %v4034_v43, %v3969_v23 }
  0xb4   :  { %1095 = vperm.xlu0 %3452, %v3881_v52  }
  0xb5   :  { %3413 = vset.pattern.permute.xlu1 %v6931_v12  ;;  %v3973_v24 = vpop.permute.xlu0 %364 }
  0xb6   :  { %898 = vperm.xlu1 %3413, %v3687_v10  }
  0xb8   :  { %3456 = vset.pattern.permute.xlu0 %v6922_v13 }
  0xb9   :  { %v3979_v26 = vpop.permute.xlu0 %367  ;;  %1274 = vperm.xlu0 %3456, %v3908_v56  }
  0xba   :  { %3414 = vset.pattern.permute.xlu1 %v6926_v8 }
  0xbb   :  { %1071 = vperm.xlu1 %3414, %v3734_v18  }
  0xbd   :  { %v3986_v28 = vpop.permute.xlu0 %382 }
  0xbf   :  { %3415 = vset.pattern.permute.xlu1 %v6922_v13 }
  0xc0   :  { %1247 = vperm.xlu1 %3415, %v3734_v18  }
  0xc1   :  { %v3992_v30 = vpop.permute.xlu0 %385 }
  0xc4   :  { %1250 = vperm.xlu1 %3415, %v3687_v10   ;;  %v4009_v10 = vpop.permute.xlu1 %70 }
  0xc6   :  { %v3998_v32 = vpop.permute.xlu0 %877 }
  0xc8   :  { %3416 = vset.pattern.permute.xlu1 %v6920_v16  ;;  %v4014_v35 = vpop.permute.xlu1 %179 }
  0xc9   :  { %88 = vperm.xlu1 %3416, %v3707_v14  }
  0xca   :  { %v4005_v18 = vpop.permute.xlu0 %892 }
  0xcc   :  { %v4021_v37 = vpop.permute.xlu1 %355 }
  0xcd   :  { %3417 = vset.pattern.permute.xlu1 %v6925_v1 }
  0xce   :  { %197 = vperm.xlu1 %3417, %v3694_v11   ;;  %v4011_v34 = vpop.permute.xlu0 %895 }
  0xd0   :  { %v4028_v40 = vpop.permute.xlu1 %358 }
  0xd2   :  { %3418 = vset.pattern.permute.xlu1 %v6924_v7  ;;  %v4016_v36 = vpop.permute.xlu0 %910 }
  0xd3   :  { %373 = vperm.xlu1 %3418, %v3694_v11  }
  0xd4   :  { %v4036_v44 = vpop.permute.xlu1 %534 }
  0xd6   :  { %v4023_v38 = vpop.permute.xlu0 %913 }
  0xd7   :  { %376 = vperm.xlu1 %3418, %v3707_v14  }
  0xd8   :  { %v4068_v50 = vpop.permute.xlu1 %707 }
  0xdb   :  { %3419 = vset.pattern.permute.xlu1 %v6928_v0  ;;  %v62_v41 = vpop.permute.xlu0 %61 }
  0xdc   :  { %552 = vperm.xlu1 %3419, %v3707_v14   ;;  %vm108_vm0 = vcmp.eq.s32.totalorder %v4030_v42, %v62_v41  ;;  %vm109_vm1 = vcmp.eq.s32.totalorder %v4034_v43, %v62_v41  ;;  %vm110_vm4 = vcmp.eq.s32.totalorder %v4041_v47, %v62_v41  ;;  %vm111_vm12 = vcmp.eq.s32.totalorder %v4049_v48, %v62_v41  ;;  %v4155_v41 = vpop.permute.xlu1 %883 }
  0xdd   :  { %vm4054_vm6 = vmor %vm108_vm0, %vm220_vm2  ;;  %vm573_vm0 = vcmp.eq.s32.totalorder %v4034_v43, %v3957_v17 }
  0xde   :  { %vm4061_vm9 = vmor %vm109_vm1, %vm221_vm5  ;;  %vm226_vm5 = vcmp.eq.s32.totalorder %v4041_v47, %v3940_v2 }
  0xdf   :  { %v65_v46 = vpop.permute.xlu0 %64  ;;  %vm4084_vm1 = vmor %vm110_vm4, %vm222_vm13  ;;  %vm223_vm4 = vcmp.eq.s32.totalorder %v4049_v48, %v3931_v62  ;;  %v6974_v62 = vmov 7  }
  0xe0   :  { %3420 = vset.pattern.permute.xlu1 %v6932_v5  ;;  %vm113_vm3 = vcmp.eq.s32.totalorder %v4034_v43, %v65_v46  ;;  %vm112_vm7 = vcmp.eq.s32.totalorder %v4030_v42, %v65_v46  ;;  %vm114_vm10 = vcmp.eq.s32.totalorder %v4041_v47, %v65_v46  ;;  %vm4117_vm2 = vmor %vm111_vm12, %vm223_vm4  ;;  %vm6952_vm12 = vcmp.eq.s32.totalorder %v4049_v48, %v65_v46  ;;  %v4175_v46 = vpop.permute.xlu1 %886 }
  0xe1   :  { %725 = vperm.xlu1 %3420, %v3694_v11   ;;  %vm4075_vm15 = vmor %vm113_vm3, %vm225_vm11  ;;  %vm577_vm11 = vcmp.eq.s32.totalorder %v4034_v43, %v3900_v55 }
  0xe2   :  { %vm4093_vm3 = vmor %vm112_vm7, %vm224_vm14  ;;  %vm401_vm7 = vcmp.eq.s32.totalorder %v4034_v43, %v3950_v6 }
  0xe3   :  { %vm4104_vm13 = vmor %vm114_vm10, %vm226_vm5  ;;  %vm227_vm10 = vcmp.eq.s32.totalorder %v4049_v48, %v3940_v2  ;;  %v6953_v2 = vmov 0 }
  0xe4   :  { %v6946_v54 = vsel %vm4104_vm13, 4294967295, %v6945_v54  ;;  %vm461_vm14 = vmor %vm4061_vm9, %vm397_vm8  ;;  %vm400_vm13 = vcmp.eq.s32.totalorder %v4030_v42, %v3950_v6  ;;  %vm6949_vm8 = vcmp.eq.s32.totalorder %v4030_v42, %v3969_v23 }
  0xe5   :  { %3421 = vset.pattern.permute.xlu1 %v6931_v12  ;;  %vm465_vm5 = vmor %vm4075_vm15, %vm401_vm7 }
  0xe6   :  { %901 = vperm.xlu1 %3421, %v3694_v11   ;;  %vm4134_vm9 = vmor %vm4054_vm6, %vm6949_vm8  ;;  %vm749_vm6 = vcmp.eq.s32.totalorder %v4034_v43, %v3966_v22  ;;  %vm925_vm8 = vcmp.eq.s32.totalorder %v4034_v43, %v3998_v32 }
  0xe7   :  { %vm4140_vm4 = vmor %vm6952_vm12, %vm227_vm10  ;;  %vm1105_vm10 = vcmp.eq.s32.totalorder %v4034_v43, %v3920_v59 }
  0xe8   :  { %v6954_v2 = vsel %vm4140_vm4, 4294967295, %v6953_v2  ;;  %vm637_vm15 = vmor %vm461_vm14, %vm573_vm0  ;;  %vm753_vm0 = vcmp.eq.s32.totalorder %v4034_v43, %v3976_v25 }
  0xe9   :  { %vm4146_vm7 = vmor %vm4093_vm3, %vm400_vm13 }
  0xea   :  { %904 = vperm.xlu1 %3421, %v3707_v14   ;;  %v6956_v39 = vsel %vm4146_vm7, 4294967295, %v6955_v39  ;;  %vm813_vm14 = vmor %vm637_vm15, %vm749_vm6  ;;  %vm1101_vm7 = vcmp.eq.s32.totalorder %v4034_v43, %v3990_v29  ;;  %vm1277_vm6 = vcmp.eq.s32.totalorder %v4034_v43, %v3996_v31 }
  0xeb   :  { %vm989_vm13 = vmor %vm813_vm14, %vm925_vm8  ;;  %vm402_vm8 = vcmp.eq.s32.totalorder %v4041_v47, %v3950_v6 }
  0xec   :  { %vm1165_vm4 = vmor %vm989_vm13, %vm1101_vm7  ;;  %vm1281_vm7 = vcmp.eq.s32.totalorder %v4034_v43, %v4003_v33  ;;  %vm6959_vm13 = vnez %v6946_v54 }
  0xed   :  { %vm1341_vm14 = vmor %vm1165_vm4, %vm1277_vm6  ;;  %vm403_vm4 = vcmp.eq.s32.totalorder %v4049_v48, %v3950_v6 }
  0xee   :  { %3423 = vset.pattern.permute.xlu1 %v6926_v8  ;;  %v2826_v52 = vsel %vm1341_vm14, 1.0, %v6929_v51  ;;  %vm575_vm14 = vcmp.eq.s32.totalorder %v4049_v48, %v3957_v17 }
  0xef   :  { %1080 = vperm.xlu1 %3423, %v3707_v14  }
  0xf3   :  { %3424 = vset.pattern.permute.xlu1 %v6922_v13 }
  0xf4   :  { %1253 = vperm.xlu1 %3424, %v3694_v11   ;;  %v6947_v11 = vmov 0 }
  0xf5   :  { %v6948_v11 = vsel %vm4117_vm2, 4294967295, %v6947_v11  ;;  %vm641_vm2 = vmor %vm465_vm5, %vm577_vm11  ;;  %vm929_vm11 = vcmp.eq.s32.totalorder %v4034_v43, %v3984_v27  ;;  %vm398_vm5 = vcmp.eq.s32.totalorder %v4041_v47, %v3969_v23 }
  0xf6   :  { %vm817_vm3 = vmor %vm641_vm2, %vm753_vm0  ;;  %vm399_vm2 = vcmp.eq.s32.totalorder %v4049_v48, %v3969_v23  ;;  %v4236_v23 = vpop.permute.xlu1 %1062 }
  0xf7   :  { %vm993_vm12 = vmor %vm817_vm3, %vm929_vm11  ;;  %vm576_vm3 = vcmp.eq.s32.totalorder %v4030_v42, %v3900_v55  ;;  %vm579_vm11 = vcmp.eq.s32.totalorder %v4049_v48, %v3900_v55 }
  0xf8   :  { %3425 = vset.pattern.permute.xlu1 %v6920_v16  ;;  %vm1169_vm15 = vmor %vm993_vm12, %vm1105_vm10  ;;  %vm6962_vm12 = vnez %v6948_v11  ;;  %v4213_v16 = vpop.permute.xlu0 %67 }
  0xf9   :  { %91 = vperm.xlu1 %3425, %v3715_v15   ;;  %vm4179_vm0 = vmor %vm4084_vm1, %vm398_vm5  ;;  %vm572_vm5 = vcmp.eq.s32.totalorder %v4030_v42, %v3957_v17 }
  0xfa   :  { %vm4191_vm10 = vmor %vm6959_vm13, %vm402_vm8  ;;  %vm6965_vm8 = vnez %v6954_v2 }
  0xfb   :  { %vm1345_vm1 = vmor %vm1169_vm15, %vm1281_vm7 }
  0xfc   :  { %v2830_v53 = vsel %vm1345_vm1, 1.0, %v6929_v51  ;;  %vm463_vm6 = vmor %vm6962_vm12, %vm399_vm2  ;;  %vm6966_vm2 = vnez %v6956_v39 }
  0xfd   :  { %94 = vperm.xlu1 %3425, %v3742_v19   ;;  %vm4209_vm15 = vmor %vm4134_vm9, %vm572_vm5  ;;  %v1533_v13 = vpack.c.bf16 %v2830_v53, %v2826_v52  ;;  %vm751_vm5 = vcmp.eq.s32.totalorder %v4049_v48, %v3966_v22 }
  0xfe   :  { %vm467_vm7 = vmor %vm6965_vm8, %vm403_vm4  ;;  %vm927_vm4 = vcmp.eq.s32.totalorder %v4049_v48, %v3998_v32 }
  0xff   :  { %vm4225_vm9 = vmor %vm6966_vm2, %vm576_vm3  ;;  %1859 = vmatprep.mubr.bf16.mxu0 %v1533_v13  ;;  %vm755_vm3 = vcmp.eq.s32.totalorder %v4049_v48, %v3976_v25  ;;  %v4248_v13 = vpop.permute.xlu0 %82 }
 0x100   :  { %vm639_vm13 = vmor %vm463_vm6, %vm575_vm14  ;;  %vm931_vm6 = vcmp.eq.s32.totalorder %v4049_v48, %v3984_v27 }
 0x101   :  { %3426 = vset.pattern.permute.xlu1 %v6925_v1  ;;  %vm643_vm1 = vmor %vm467_vm7, %vm579_vm11  ;;  %vm1107_vm11 = vcmp.eq.s32.totalorder %v4049_v48, %v3920_v59  ;;  %vm578_vm7 = vcmp.eq.s32.totalorder %v4041_v47, %v3900_v55  ;;  %v4262_v55 = vpop.permute.xlu1 %1235 }
 0x102   :  { %206 = vperm.xlu1 %3426, %v3742_v19   ;;  %vm815_vm12 = vmor %vm639_vm13, %vm751_vm5  ;;  %vm1103_vm13 = vcmp.eq.s32.totalorder %v4049_v48, %v3990_v29 }
 0x103   :  { %vm819_vm8 = vmor %vm643_vm1, %vm755_vm3  ;;  %vm574_vm1 = vcmp.eq.s32.totalorder %v4041_v47, %v3957_v17  ;;  %v4284_v49 = vpop.permute.xlu0 %85 }
 0x104   :  { %vm991_vm14 = vmor %vm815_vm12, %vm927_vm4  ;;  %vm1279_vm12 = vcmp.eq.s32.totalorder %v4049_v48, %v3996_v31 }
 0x105   :  { %vm995_vm2 = vmor %vm819_vm8, %vm931_vm6  ;;  %vm1283_vm6 = vcmp.eq.s32.totalorder %v4049_v48, %v4003_v33  ;;  %v4295_v14 = vpop.permute.xlu1 %73 }
 0x106   :  { %3427 = vset.pattern.permute.xlu1 %v6924_v7  ;;  %vm1167_vm5 = vmor %vm991_vm14, %vm1103_vm13 }
 0x107   :  { %379 = vperm.xlu1 %3427, %v3715_v15   ;;  %vm4256_vm4 = vmor %vm4179_vm0, %vm574_vm1  ;;  %vm748_vm0 = vcmp.eq.s32.totalorder %v4030_v42, %v3966_v22  ;;  %vm1104_vm1 = vcmp.eq.s32.totalorder %v4030_v42, %v3920_v59  ;;  %v4305_v52 = vpop.permute.xlu0 %100 }
 0x108   :  { %vm1171_vm3 = vmor %vm995_vm2, %vm1107_vm11  ;;  %vm924_vm11 = vcmp.eq.s32.totalorder %v4030_v42, %v3998_v32 }
 0x109   :  { %vm4266_vm8 = vmor %vm4191_vm10, %vm578_vm7  ;;  %vm752_vm10 = vcmp.eq.s32.totalorder %v4030_v42, %v3976_v25 }
 0x10a   :  { %vm1343_vm14 = vmor %vm1167_vm5, %vm1279_vm12  ;;  %vm928_vm5 = vcmp.eq.s32.totalorder %v4030_v42, %v3984_v27 }
 0x10b   :  { %3428 = vset.pattern.permute.xlu1 %v6928_v0  ;;  %vm1347_vm2 = vmor %vm1171_vm3, %vm1283_vm6  ;;  %v2828_v17 = vsel %vm1343_vm14, 1.0, %v6929_v51  ;;  %vm1100_vm6 = vcmp.eq.s32.totalorder %v4030_v42, %v3990_v29 }
 0x10c   :  { %555 = vperm.xlu1 %3428, %v3715_v15   ;;  %v2832_v2 = vsel %vm1347_vm2, 1.0, %v6929_v51  ;;  %vm812_vm7 = vmor %vm4209_vm15, %vm748_vm0  ;;  %vm1280_vm0 = vcmp.eq.s32.totalorder %v4030_v42, %v4003_v33 }
 0x10d   :  { %v1535_v39 = vpack.c.bf16 %v2832_v2, %v2828_v17  ;;  %vm816_vm13 = vmor %vm4225_vm9, %vm752_vm10  ;;  %vm1276_vm9 = vcmp.eq.s32.totalorder %v4030_v42, %v3996_v31  ;;  %vm926_vm10 = vcmp.eq.s32.totalorder %v4041_v47, %v3998_v32  ;;  %v4328_v32 = vpop.permute.xlu0 %103 }
 0x10e   :  { %vm988_vm3 = vmor %vm812_vm7, %vm924_vm11  ;;  %vm750_vm11 = vcmp.eq.s32.totalorder %v4041_v47, %v3966_v22  ;;  %6973 = vst [vmem:[#allocation2_spill] sm:$0xff] %v4328_v32 }
 0x10f   :  { %1956 = vmatprep.mubr.bf16.mxu1 %v1535_v39  ;;  %vm992_vm12 = vmor %vm816_vm13, %vm928_vm5  ;;  %vm754_vm13 = vcmp.eq.s32.totalorder %v4041_v47, %v3976_v25  ;;  %v4321_v25 = vpop.permute.xlu1 %76  ;;  %v6975_v39 = vmov 0  }
 0x110   :  { %558 = vperm.xlu1 %3428, %v3742_v19   ;;  %vm1164_vm15 = vmor %vm988_vm3, %vm1100_vm6  ;;  %vm1106_vm3 = vcmp.eq.s32.totalorder %v4041_v47, %v3920_v59 }
 0x111   :  { %vm1168_vm14 = vmor %vm992_vm12, %vm1104_vm1  ;;  %vm930_vm12 = vcmp.eq.s32.totalorder %v4041_v47, %v3984_v27 }
 0x112   :  { %vm1340_vm2 = vmor %vm1164_vm15, %vm1276_vm9 }
 0x113   :  { %vm1344_vm7 = vmor %vm1168_vm14, %vm1280_vm0  ;;  %v2825_v53 = vsel %vm1340_vm2, 1.0, %v6929_v51  ;;  %vm1282_vm0 = vcmp.eq.s32.totalorder %v4041_v47, %v4003_v33  ;;  %v4333_v59 = vpop.permute.xlu1 %188 }
 0x114   :  { %3429 = vset.pattern.permute.xlu1 %v6932_v5  ;;  %v2829_v54 = vsel %vm1344_vm7, 1.0, %v6929_v51  ;;  %vm814_vm1 = vmor %vm4256_vm4, %vm750_vm11  ;;  %vm1102_vm4 = vcmp.eq.s32.totalorder %v4041_v47, %v3990_v29  ;;  %vm117_vm7 = vcmp.eq.s32.totalorder %v4034_v43, %v4213_v16 }
 0x115   :  { %734 = vperm.xlu1 %3429, %v3742_v19   ;;  %v1532_v22 = vpack.c.bf16 %v2829_v54, %v2825_v53  ;;  %vm818_vm5 = vmor %vm4266_vm8, %vm754_vm13  ;;  %vm1278_vm8 = vcmp.eq.s32.totalorder %v4041_v47, %v3996_v31  ;;  %v183_v31 = vpop.permute.xlu0 %182  ;;  %vm118_vm13 = vcmp.eq.s32.totalorder %v4041_v47, %v4213_v16 }
 0x116   :  { %vm990_vm6 = vmor %vm814_vm1, %vm926_vm10  ;;  %vm116_vm10 = vcmp.eq.s32.totalorder %v4030_v42, %v4213_v16  ;;  %vm228_vm1 = vcmp.eq.s32.totalorder %v4030_v42, %v4014_v35 }
 0x117   :  { %1860 = vmatmul.mubr.bf16.vlgmr.msra.gmra.mrb[0].mxu0 %v1532_v22  ;;  %vm994_vm15 = vmor %vm818_vm5, %vm930_vm12  ;;  %v4339_v11 = vpop.permute.xlu1 %361  ;;  %vm119_vm5 = vcmp.eq.s32.totalorder %v4049_v48, %v4213_v16  ;;  %v4492_v22 = vld [vmem:[%s6908_s0 + $0x60] sm:$0xff] }
 0x118   :  { %vm1166_vm14 = vmor %vm990_vm6, %vm1102_vm4  ;;  %vm230_vm6 = vcmp.eq.s32.totalorder %v4041_v47, %v4014_v35  ;;  %vm233_vm4 = vcmp.eq.s32.totalorder %v4034_v43, %v183_v31 }
 0x119   :  { %3430 = vset.pattern.permute.xlu1 %v6931_v12  ;;  %vm1170_vm9 = vmor %vm994_vm15, %vm1106_vm3  ;;  %v4342_v33 = vpop.permute.xlu0 %185  ;;  %vm229_vm3 = vcmp.eq.s32.totalorder %v4034_v43, %v4014_v35 }
 0x11a   :  { %907 = vperm.xlu1 %3430, %v3715_v15   ;;  %vm1342_vm2 = vmor %vm1166_vm14, %vm1278_vm8  ;;  %vm231_vm14 = vcmp.eq.s32.totalorder %v4049_v48, %v4014_v35  ;;  %vm232_vm8 = vcmp.eq.s32.totalorder %v4030_v42, %v183_v31  ;;  %v7052_v35 = vmov 0 }
 0x11b   :  { %vm1346_vm11 = vmor %vm1170_vm9, %vm1282_vm0  ;;  %v2827_v27 = vsel %vm1342_vm2, 1.0, %v6929_v51  ;;  %v4346_v17 = vpop.permute.xlu1 %537  ;;  %vm121_vm2 = vcmp.eq.s32.totalorder %v4034_v43, %v4009_v10 }
 0x11c   :  { %v2831_v29 = vsel %vm1346_vm11, 1.0, %v6929_v51  ;;  %vm4370_vm12 = vmor %vm116_vm10, %vm228_vm1  ;;  %vm235_vm11 = vcmp.eq.s32.totalorder %v4049_v48, %v183_v31  ;;  %vm120_vm10 = vcmp.eq.s32.totalorder %v4030_v42, %v4009_v10  ;;  %vm234_vm1 = vcmp.eq.s32.totalorder %v4041_v47, %v183_v31 }
 0x11d   :  { %v1534_v6 = vpack.c.bf16 %v2831_v29, %v2827_v27  ;;  %v4348_v2 = vpop.permute.xlu0 %200  ;;  %vm4378_vm15 = vmor %vm117_vm7, %vm229_vm3  ;;  %v6982_v27 = vmov 0  ;;  %vm409_vm3 = vcmp.eq.s32.totalorder %v4034_v43, %v4028_v40  ;;  %v6987_v31 = vmov 0 }
 0x11e   :  { %3431 = vset.pattern.permute.xlu1 %v6926_v8  ;;  %vm4386_vm9 = vmor %vm118_vm13, %vm230_vm6  ;;  %vm123_vm13 = vcmp.eq.s32.totalorder %v4049_v48, %v4009_v10  ;;  %v7049_v8 = vmov 0 }
 0x11f   :  { %1083 = vperm.xlu1 %3431, %v3715_v15   ;;  %1957 = vmatmul.mubr.bf16.vlgmr.msra.gmra.mrb[0].mxu1 %v1534_v6  ;;  %v4352_v15 = vpop.permute.xlu1 %540  ;;  %vm4391_vm0 = vmor %vm119_vm5, %vm231_vm14 }
 0x120   :  { %v6983_v27 = vsel %vm4391_vm0, 4294967295, %v6982_v27  ;;  %vm297_vm7 = vmor %vm121_vm2, %vm233_vm4  ;;  %vm122_vm4 = vcmp.eq.s32.totalorder %v4041_v47, %v4009_v10  ;;  %v6991_v10 = vmov 0 }
 0x121   :  { %v4357_v53 = vpop.permute.xlu0 %203  ;;  %vm4405_vm5 = vmor %vm120_vm10, %vm232_vm8  ;;  %vm411_vm8 = vcmp.eq.s32.totalorder %v4049_v48, %v4028_v40  ;;  %vm585_vm10 = vcmp.eq.s32.totalorder %v4034_v43, %v4036_v44 }
 0x122   :  { %vm299_vm6 = vmor %vm123_vm13, %vm235_vm11  ;;  %vm404_vm11 = vcmp.eq.s32.totalorder %v4030_v42, %v4021_v37 }
 0x123   :  { %1086 = vperm.xlu1 %3431, %v3742_v19   ;;  %v4374_v54 = vpop.permute.xlu1 %716  ;;  %vm473_vm14 = vmor %vm297_vm7, %vm409_vm3  ;;  %vm405_vm7 = vcmp.eq.s32.totalorder %v4034_v43, %v4021_v37 }
 0x124   :  { %vm4419_vm2 = vmor %vm122_vm4, %vm234_vm1  ;;  %vm408_vm1 = vcmp.eq.s32.totalorder %v4030_v42, %v4028_v40 }
 0x125   :  { %v4398_v29 = vpop.permute.xlu0 %218  ;;  %v6988_v31 = vsel %vm4419_vm2, 4294967295, %v6987_v31  ;;  %vm4425_vm0 = vmor %vm299_vm6, %vm411_vm8  ;;  %vm406_vm6 = vcmp.eq.s32.totalorder %v4041_v47, %v4021_v37 }
 0x126   :  { %6984 = vst [vmem:[#allocation3_spill] sm:$0xff] %v4398_v29  ;;  %vm4431_vm13 = vmor %vm473_vm14, %vm585_vm10  ;;  %vm237_vm14 = vcmp.eq.s32.totalorder %v4034_v43, %v4342_v33  ;;  %vm407_vm10 = vcmp.eq.s32.totalorder %v4049_v48, %v4021_v37  ;;  %v7035_v29 = vmov 0 }
 0x127   :  { %3433 = vset.pattern.permute.xlu1 %v6974_v62  ;;  %v4412_v6 = vpop.permute.xlu1 %889  ;;  %v6992_v10 = vsel %vm4431_vm13, 4294967295, %v6991_v10  ;;  %vm4442_vm3 = vmor %vm4370_vm12, %vm404_vm11 }
 0x128   :  { %1262 = vperm.xlu1 %3433, %v3742_v19   ;;  %vm4451_vm4 = vmor %vm4405_vm5, %vm408_vm1  ;;  %vm125_vm1 = vcmp.eq.s32.totalorder %v4034_v43, %v4295_v14  ;;  %v7002_v19 = vmov 0 }
 0x129   :  { %vm469_vm12 = vmor %vm4378_vm15, %vm405_vm7  ;;  %vm587_vm7 = vcmp.eq.s32.totalorder %v4049_v48, %v4036_v44 }
 0x12a   :  { %vm4466_vm11 = vmor %vm4386_vm9, %vm406_vm6 }
 0x12b   :  { %v4457_v51 = vpop.permute.xlu1 %1065  ;;  %vm4478_vm2 = vmor %vm125_vm1, %vm237_vm14  ;;  %vm757_vm14 = vcmp.eq.s32.totalorder %v4034_v43, %v4068_v50  ;;  %vm129_vm1 = vcmp.eq.s32.totalorder %v4034_v43, %v4321_v25 }
 0x12c   :  { %3434 = vset.pattern.permute.xlu1 %v6975_v39  ;;  %vm4485_vm6 = vmor %vm4425_vm0, %vm587_vm7  ;;  %vm241_vm0 = vcmp.eq.s32.totalorder %v4034_v43, %v4333_v59  ;;  %vm7006_vm7 = vnez %v6988_v31 }
 0x12d   :  { %97 = vperm.xlu1 %3434, %v3749_v20   ;;  %v7003_v19 = vsel %vm4485_vm6, 4294967295, %v7002_v19  ;;  %vm933_vm6 = vcmp.eq.s32.totalorder %v4034_v43, %v4155_v41 }
 0x12f   :  { %v4512_v16 = vpop.permute.xlu1 %1068 }
 0x131   :  { %3435 = vset.pattern.permute.xlu1 %v6925_v1  ;;  %v532_v1 = vpop.permute.xlu0 %531 }
 0x132   :  { %209 = vperm.xlu1 %3435, %v3749_v20   ;;  %vm581_vm8 = vcmp.eq.s32.totalorder %v4034_v43, %v532_v1  ;;  %vm583_vm5 = vcmp.eq.s32.totalorder %v4049_v48, %v532_v1  ;;  %vm580_vm15 = vcmp.eq.s32.totalorder %v4030_v42, %v532_v1 }
 0x133   :  { %vm645_vm9 = vmor %vm469_vm12, %vm581_vm8  ;;  %vm582_vm12 = vcmp.eq.s32.totalorder %v4041_v47, %v532_v1  ;;  %vm410_vm8 = vcmp.eq.s32.totalorder %v4041_v47, %v4028_v40  ;;  %v7007_v1 = vmov 0  ;;  %v7011_v40 = vmov 0 }
 0x136   :  { %212 = vperm.xlu1 %3435, %v3855_v45  }
 0x13a   :  { %3437 = vset.pattern.permute.xlu1 %v6924_v7  ;;  %v7029_v7 = vmov 0.0  }
 0x13b   :  { %388 = vperm.xlu1 %3437, %v3855_v45  }
 0x13f   :  { %3438 = vset.pattern.permute.xlu1 %v6928_v0  ;;  %v6995_v0 = vmov 0 }
 0x140   :  { %561 = vperm.xlu1 %3438, %v3749_v20   ;;  %v6996_v0 = vsel %vm4451_vm4, 4294967295, %v6995_v0  ;;  %v6997_v20 = vmov 0  ;;  %vm6999_vm4 = vnez %v6983_v27  ;;  %v7014_v27 = vmov 0 }
 0x141   :  { %v6998_v20 = vsel %vm4466_vm11, 4294967295, %v6997_v20  ;;  %vm471_vm13 = vmor %vm6999_vm4, %vm407_vm10  ;;  %vm759_vm10 = vcmp.eq.s32.totalorder %v4049_v48, %v4068_v50 }
 0x142   :  { %vm647_vm11 = vmor %vm471_vm13, %vm583_vm5 }
 0x143   :  { %vm4504_vm13 = vmor %vm4442_vm3, %vm580_vm15 }
 0x144   :  { %3439 = vset.pattern.permute.xlu1 %v6932_v5  ;;  %vm821_vm5 = vmor %vm645_vm9, %vm757_vm14  ;;  %vm239_vm14 = vcmp.eq.s32.totalorder %v4049_v48, %v4342_v33  ;;  %v7031_v5 = vmov 0 }
 0x145   :  { %737 = vperm.xlu1 %3439, %v4492_v22   ;;  %vm4518_vm4 = vmor %vm7006_vm7, %vm410_vm8  ;;  %vm7013_vm8 = vnez %v6998_v20  ;;  %v7026_v20 = vmov 0 }
 0x146   :  { %v7008_v1 = vsel %vm4518_vm4, 4294967295, %v7007_v1  ;;  %vm4522_vm3 = vmor %vm647_vm11, %vm759_vm10  ;;  %vm7016_vm11 = vcmp.eq.s32.totalorder %v4034_v43, %v3910_v57  ;;  %vm7017_vm10 = vnez %v6992_v10  ;;  %vm756_vm4 = vcmp.eq.s32.totalorder %v4030_v42, %v4068_v50  ;;  %v4581_v10 = vpop.permute.xlu1 %1244 }
 0x147   :  { %vm4530_vm9 = vmor %vm129_vm1, %vm241_vm0  ;;  %vm937_vm0 = vcmp.eq.s32.totalorder %v4034_v43, %v4175_v46 }
 0x148   :  { %v7012_v40 = vsel %vm4530_vm9, 4294967295, %v7011_v40  ;;  %vm4538_vm7 = vmor %vm7013_vm8, %vm582_vm12  ;;  %vm584_vm9 = vcmp.eq.s32.totalorder %v4030_v42, %v4036_v44  ;;  %vm127_vm12 = vcmp.eq.s32.totalorder %v4049_v48, %v4295_v14 }
 0x149   :  { %v7015_v27 = vsel %vm4538_vm7, 4294967295, %v7014_v27  ;;  %vm825_vm15 = vmor %vm7017_vm10, %vm7016_vm11  ;;  %740 = vperm.xlu1 %3439, %v3855_v45   ;;  %vm7018_vm11 = vnez %v6996_v0  ;;  %vm763_vm7 = vcmp.eq.s32.totalorder %v4049_v48, %v3910_v57  ;;  %v7055_v0 = vmov 0 }
 0x14a   :  { %vm997_vm1 = vmor %vm821_vm5, %vm933_vm6  ;;  %vm1113_vm5 = vcmp.eq.s32.totalorder %v4034_v43, %v4236_v23 }
 0x14b   :  { %vm1001_vm8 = vmor %vm825_vm15, %vm937_vm0  ;;  %vm7023_vm15 = vcmp.eq.s32.totalorder %v4034_v43, %v3924_v60 }
 0x14c   :  { %vm4560_vm10 = vmor %vm7018_vm11, %vm584_vm9  ;;  %vm413_vm11 = vcmp.eq.s32.totalorder %v4034_v43, %v4339_v11 }
 0x14d   :  { %vm4564_vm6 = vmor %vm127_vm12, %vm239_vm14  ;;  %vm1285_vm12 = vcmp.eq.s32.totalorder %v4034_v43, %v4262_v55  ;;  %3441 = vset.pattern.permute.xlu1 %v6931_v12 }
 0x14e   :  { %vm1173_vm0 = vmor %vm997_vm1, %vm7023_vm15  ;;  %vm243_vm1 = vcmp.eq.s32.totalorder %v4049_v48, %v4333_v59  ;;  %916 = vperm.xlu1 %3441, %v3855_v45  }
 0x14f   :  { %vm4577_vm9 = vmor %vm4504_vm13, %vm756_vm4  ;;  %vm7028_vm13 = vcmp.eq.s32.totalorder %v4034_v43, %v3942_v3 }
 0x150   :  { %vm1177_vm14 = vmor %vm1001_vm8, %vm1113_vm5 }
 0x151   :  { %vm1349_vm15 = vmor %vm1173_vm0, %vm1285_vm12  ;;  %vm935_vm0 = vcmp.eq.s32.totalorder %v4049_v48, %v4155_v41  ;;  %vm131_vm12 = vcmp.eq.s32.totalorder %v4049_v48, %v4321_v25 }
 0x152   :  { %vm4593_vm4 = vmor %vm4478_vm2, %vm413_vm11  ;;  %v2834_v12 = vsel %vm1349_vm15, 1.0, %v7029_v7  ;;  %vm7030_vm2 = vnez %v7003_v19  ;;  %vm939_vm15 = vcmp.eq.s32.totalorder %v4049_v48, %v4175_v46  ;;  %v7033_v19 = vmov 6  }
 0x153   :  { %v7027_v20 = vsel %vm4593_vm4, 4294967295, %v7026_v20  ;;  %vm1353_vm8 = vmor %vm1177_vm14, %vm7028_vm13  ;;  %3442 = vset.pattern.permute.xlu1 %v7033_v19 }
 0x154   :  { %v2838_v37 = vsel %vm1353_vm8, 1.0, %v7029_v7  ;;  %vm827_vm11 = vmor %vm7030_vm2, %vm763_vm7  ;;  %vm586_vm7 = vcmp.eq.s32.totalorder %v4041_v47, %v4036_v44  ;;  %v7040_v44 = vmov 0  ;;  %1089 = vperm.xlu1 %3442, %v4492_v22  }
 0x155   :  { %vm4617_vm13 = vmor %vm131_vm12, %vm243_vm1  ;;  %v1537_v32 = vpack.c.bf16 %v2838_v37, %v2834_v12  ;;  %vm758_vm1 = vcmp.eq.s32.totalorder %v4041_v47, %v4068_v50  ;;  %vm7034_vm12 = vnez %v7008_v1  ;;  %v4640_v12 = vpop.permute.xlu1 %79  ;;  %v7092_v37 = vmov 0 }
 0x156   :  { %v7032_v5 = vsel %vm4617_vm13, 4294967295, %v7031_v5  ;;  %vm999_vm8 = vmor %vm4522_vm3, %vm935_vm0  ;;  %vm124_vm3 = vcmp.eq.s32.totalorder %v4030_v42, %v4295_v14  ;;  %vm1115_vm0 = vcmp.eq.s32.totalorder %v4049_v48, %v4236_v23  ;;  %v7096_v50 = vmov 0 }
 0x157   :  { %vm1003_vm2 = vmor %vm827_vm11, %vm939_vm15  ;;  %1867 = vmatprep.mubr.bf16.mxu0 %v1537_v32  ;;  %vm7037_vm11 = vcmp.eq.s32.totalorder %v4049_v48, %v3924_v60  ;;  %v7098_v32 = vmov 0 }
 0x158   :  { %vm4634_vm13 = vmor %vm7034_vm12, %vm586_vm7  ;;  %vm7038_vm7 = vcmp.eq.s32.totalorder %v4034_v43, %v3973_v24  ;;  %vm7039_vm12 = vnez %v7012_v40  ;;  %3443 = vset.pattern.permute.xlu1 %v6974_v62 }
 0x159   :  { %v7036_v29 = vsel %vm4634_vm13, 4294967295, %v7035_v29  ;;  %vm1175_vm15 = vmor %vm999_vm8, %vm7037_vm11  ;;  %vm7042_vm13 = vcmp.eq.s32.totalorder %v4030_v42, %v4342_v33  ;;  %vm7045_vm8 = vnez %v7015_v27  ;;  %v4718_v31 = vpop.permute.xlu1 %191  ;;  %1265 = vperm.xlu1 %3443, %v4492_v22  }
 0x15a   :  { %vm4654_vm5 = vmor %vm7039_vm12, %vm7038_vm7  ;;  %vm1287_vm7 = vcmp.eq.s32.totalorder %v4049_v48, %v4262_v55 }
 0x15b   :  { %v7041_v44 = vsel %vm4654_vm5, 4294967295, %v7040_v44  ;;  %vm4661_vm4 = vmor %vm124_vm3, %vm7042_vm13  ;;  %vm240_vm5 = vcmp.eq.s32.totalorder %v4030_v42, %v4333_v59  ;;  %vm415_vm13 = vcmp.eq.s32.totalorder %v4049_v48, %v4339_v11  ;;  %vm7048_vm3 = vcmp.eq.s32.totalorder %v4049_v48, %v3942_v3 }
 0x15c   :  { %vm4667_vm11 = vmor %vm7045_vm8, %vm758_vm1  ;;  %vm7051_vm8 = vcmp.eq.s32.totalorder %v4030_v42, %v3910_v57 }
 0x15d   :  { %vm1179_vm14 = vmor %vm1003_vm2, %vm1115_vm0  ;;  %vm1108_vm2 = vcmp.eq.s32.totalorder %v4030_v42, %v3924_v60  ;;  %vm932_vm0 = vcmp.eq.s32.totalorder %v4030_v42, %v4155_v41  ;;  %1268 = vperm.xlu1 %3443, %v3855_v45   ;;  %v7070_v45 = vmov 0 }
 0x15e   :  { %vm1351_vm12 = vmor %vm1175_vm15, %vm1287_vm7  ;;  %vm936_vm7 = vcmp.eq.s32.totalorder %v4030_v42, %v4175_v46 }
 0x15f   :  { %vm1355_vm1 = vmor %vm1179_vm14, %vm7048_vm3  ;;  %v2836_v1 = vsel %vm1351_vm12, 1.0, %v7029_v7  ;;  %vm128_vm12 = vcmp.eq.s32.totalorder %v4030_v42, %v4321_v25 }
 0x160   :  { %vm4688_vm15 = vmor %vm4564_vm6, %vm415_vm13  ;;  %v2840_v40 = vsel %vm1355_vm1, 1.0, %v7029_v7  ;;  %vm126_vm1 = vcmp.eq.s32.totalorder %v4041_v47, %v4295_v14 }
 0x161   :  { %v7050_v8 = vsel %vm4688_vm15, 4294967295, %v7049_v8  ;;  %vm824_vm14 = vmor %vm4560_vm10, %vm7051_vm8  ;;  %v1539_v27 = vpack.c.bf16 %v2840_v40, %v2836_v1  ;;  %vm589_vm10 = vcmp.eq.s32.totalorder %v4034_v43, %v4346_v17  ;;  %3445 = vset.pattern.permute.xlu1 %v6975_v39  ;;  %v7087_v39 = vmov 1  }
 0x162   :  { %vm996_vm6 = vmor %vm4577_vm9, %vm932_vm0  ;;  %vm7054_vm0 = vnez %v7027_v20  ;;  %v7062_v20 = vmov 0  ;;  %vm7064_vm9 = vnez %v7041_v44  ;;  %106 = vperm.xlu1 %3445, %v3908_v56   ;;  %v7094_v44 = vmov 2  }
 0x163   :  { %vm4710_vm3 = vmor %vm128_vm12, %vm240_vm5  ;;  %vm593_vm5 = vcmp.eq.s32.totalorder %v4034_v43, %v4352_v15  ;;  %1964 = vmatprep.mubr.bf16.mxu1 %v1539_v27  ;;  %v4941_v27 = vld [vmem:[%s6908_s0 + $0x78] sm:$0xff] }
 0x164   :  { %v7053_v35 = vsel %vm4710_vm3, 4294967295, %v7052_v35  ;;  %vm1000_vm8 = vmor %vm824_vm14, %vm936_vm7  ;;  %vm1112_vm14 = vcmp.eq.s32.totalorder %v4030_v42, %v4236_v23 }
 0x165   :  { %vm4727_vm12 = vmor %vm7054_vm0, %vm589_vm10  ;;  %vm1284_vm10 = vcmp.eq.s32.totalorder %v4030_v42, %v4262_v55  ;;  %vm7057_vm0 = vcmp.eq.s32.totalorder %v4049_v48, %v3973_v24 }
 0x166   :  { %v7056_v0 = vsel %vm4727_vm12, 4294967295, %v7055_v0  ;;  %vm1172_vm7 = vmor %vm996_vm6, %vm1108_vm2  ;;  %vm7058_vm12 = vnez %v7032_v5  ;;  %vm7061_vm2 = vcmp.eq.s32.totalorder %v4041_v47, %v4342_v33  ;;  %3446 = vset.pattern.permute.xlu1 %v7087_v39  ;;  %v7139_v39 = vmov 0 }
 0x167   :  { %vm1176_vm13 = vmor %vm1000_vm8, %vm1112_vm14 }
 0x168   :  { %vm4747_vm3 = vmor %vm7058_vm12, %vm7057_vm0  ;;  %vm7067_vm12 = vcmp.eq.s32.totalorder %v4030_v42, %v3942_v3 }
 0x169   :  { %vm4754_vm6 = vmor %vm126_vm1, %vm7061_vm2  ;;  %vm934_vm1 = vcmp.eq.s32.totalorder %v4041_v47, %v4155_v41  ;;  %vm938_vm2 = vcmp.eq.s32.totalorder %v4041_v47, %v4175_v46  ;;  %v7076_v46 = vmov 0 }
 0x16a   :  { %v7063_v20 = vsel %vm4754_vm6, 4294967295, %v7062_v20  ;;  %vm1348_vm8 = vmor %vm1172_vm7, %vm1284_vm10  ;;  %vm242_vm7 = vcmp.eq.s32.totalorder %v4041_v47, %v4333_v59  ;;  %v4793_v59 = vpop.permute.xlu1 %194 }
 0x16b   :  { %vm4762_vm15 = vmor %vm7064_vm9, %vm593_vm5  ;;  %v2833_v5 = vsel %vm1348_vm8, 1.0, %v7029_v7  ;;  %vm412_vm9 = vcmp.eq.s32.totalorder %v4030_v42, %v4339_v11  ;;  %vm7068_vm5 = vcmp.eq.s32.totalorder %v4041_v47, %v3910_v57  ;;  %v7072_v57 = vmov 0 }
 0x16c   :  { %vm1352_vm0 = vmor %vm1176_vm13, %vm7067_vm12  ;;  %vm7069_vm13 = vnez %v7036_v29  ;;  %v7089_v29 = vmov 0 }
 0x16d   :  { %v2837_v33 = vsel %vm1352_vm0, 1.0, %v7029_v7  ;;  %vm826_vm10 = vmor %vm7069_vm13, %vm7068_vm5  ;;  %vm130_vm5 = vcmp.eq.s32.totalorder %v4041_v47, %v4321_v25 }
 0x16e   :  { %vm4787_vm8 = vmor %vm4661_vm4, %vm412_vm9  ;;  %v1536_v41 = vpack.c.bf16 %v2837_v33, %v2833_v5  ;;  %vm591_vm9 = vcmp.eq.s32.totalorder %v4049_v48, %v4346_v17  ;;  %v7112_v33 = vmov 4  }
 0x16f   :  { %v7071_v45 = vsel %vm4787_vm8, 4294967295, %v7070_v45  ;;  %vm998_vm12 = vmor %vm4667_vm11, %vm934_vm1  ;;  %vm1114_vm11 = vcmp.eq.s32.totalorder %v4041_v47, %v4236_v23  ;;  %vm7074_vm1 = vcmp.eq.s32.totalorder %v4041_v47, %v3924_v60  ;;  %vm7079_vm8 = vnez %v7053_v35 }
 0x170   :  { %vm1002_vm13 = vmor %vm826_vm10, %vm938_vm2  ;;  %1868 = vmatmul.mubr.bf16.gmra.mrb[4].mxu0 %v1536_v41  ;;  %vm7075_vm2 = vnez %v7050_v8  ;;  %vm7078_vm10 = vcmp.eq.s32.totalorder %v4030_v42, %v3973_v24  ;;  %v7083_v23 = vmov 0  ;;  %v7188_v60 = vmov 0 }
 0x171   :  { %vm4801_vm4 = vmor %vm130_vm5, %vm242_vm7  ;;  %vm595_vm7 = vcmp.eq.s32.totalorder %v4049_v48, %v4352_v15 }
 0x172   :  { %v7073_v57 = vsel %vm4801_vm4, 4294967295, %v7072_v57  ;;  %vm1174_vm0 = vmor %vm998_vm12, %vm7074_vm1  ;;  %vm1286_vm4 = vcmp.eq.s32.totalorder %v4041_v47, %v4262_v55  ;;  %vm769_vm12 = vcmp.eq.s32.totalorder %v4034_v43, %v4374_v54 }
 0x173   :  { %vm4819_vm5 = vmor %vm7075_vm2, %vm591_vm9  ;;  %vm7082_vm9 = vcmp.eq.s32.totalorder %v4041_v47, %v3942_v3  ;;  %v4857_v3 = vpop.permute.xlu1 %370 }
 0x174   :  { %v7077_v46 = vsel %vm4819_vm5, 4294967295, %v7076_v46  ;;  %vm1178_vm14 = vmor %vm1002_vm13, %vm1114_vm11  ;;  %vm941_vm13 = vcmp.eq.s32.totalorder %v4034_v43, %v4412_v6 }
 0x175   :  { %vm1350_vm1 = vmor %vm1174_vm0, %vm1286_vm4  ;;  %vm945_vm0 = vcmp.eq.s32.totalorder %v4034_v43, %v4005_v18 }
 0x176   :  { %vm4833_vm6 = vmor %vm7079_vm8, %vm7078_vm10  ;;  %v2835_v56 = vsel %vm1350_vm1, 1.0, %v7029_v7  ;;  %vm7085_vm8 = vcmp.eq.s32.totalorder %v4034_v43, %v3914_v58  ;;  %vm7086_vm10 = vnez %v7056_v0  ;;  %vm7088_vm1 = vnez %v7063_v20 }
 0x177   :  { %vm1354_vm11 = vmor %vm1178_vm14, %vm7082_vm9  ;;  %vm414_vm14 = vcmp.eq.s32.totalorder %v4041_v47, %v4339_v11  ;;  %v4877_v11 = vld [vmem:[%s6908_s0 + $0x70] sm:$0xff]  ;;  %v7168_v0 = vmov 0 }
 0x178   :  { %vm4847_vm4 = vmor %vm4747_vm3, %vm595_vm7  ;;  %v2839_v55 = vsel %vm1354_vm11, 1.0, %v7029_v7  ;;  %vm1117_vm7 = vcmp.eq.s32.totalorder %v4034_v43, %v4457_v51  ;;  %215 = vperm.xlu1 %3446, %v4877_v11  }
 0x179   :  { %v7084_v23 = vsel %vm4847_vm4, 4294967295, %v7083_v23  ;;  %vm829_vm2 = vmor %vm7086_vm10, %vm7085_vm8  ;;  %v1538_v25 = vpack.c.bf16 %v2839_v55, %v2835_v56  ;;  %vm1121_vm8 = vcmp.eq.s32.totalorder %v4034_v43, %v4512_v16  ;;  %vm588_vm10 = vcmp.eq.s32.totalorder %v4030_v42, %v4346_v17  ;;  %v547_v56 = vpop.permute.xlu0 %546 }
 0x17a   :  { %vm833_vm3 = vmor %vm4762_vm15, %vm769_vm12  ;;  %vm1293_vm15 = vcmp.eq.s32.totalorder %v4034_v43, %v3948_v4  ;;  %vm7091_vm4 = vnez %v7071_v45  ;;  %v7126_v55 = vmov 0 }
 0x17b   :  { %vm4868_vm9 = vmor %vm7088_vm1, %vm414_vm14  ;;  %1965 = vmatmul.mubr.bf16.gmra.mrb[4].mxu1 %v1538_v25  ;;  %vm1297_vm14 = vcmp.eq.s32.totalorder %v4034_v43, %v4581_v10  ;;  %v7136_v25 = vmov 0 }
 0x17c   :  { %v7090_v29 = vsel %vm4868_vm9, 4294967295, %v7089_v29  ;;  %vm1005_vm11 = vmor %vm829_vm2, %vm941_vm13  ;;  %vm418_vm13 = vcmp.eq.s32.totalorder %v4041_v47, %v3973_v24  ;;  %vm592_vm9 = vcmp.eq.s32.totalorder %v4030_v42, %v4352_v15  ;;  %v4903_v24 = vpop.permute.xlu1 %543  ;;  %3448 = vset.pattern.permute.xlu1 %v7094_v44  ;;  %v7149_v44 = vmov 0 }
 0x17d   :  { %vm1009_vm12 = vmor %vm833_vm3, %vm945_vm0  ;;  %vm771_vm3 = vcmp.eq.s32.totalorder %v4049_v48, %v4374_v54  ;;  %391 = vperm.xlu1 %3448, %v4877_v11  }
 0x17e   :  { %vm1181_vm2 = vmor %vm1005_vm11, %vm1117_vm7  ;;  %vm7095_vm11 = vnez %v7073_v57 }
 0x17f   :  { %vm4897_vm5 = vmor %vm7091_vm4, %vm588_vm10  ;;  %vm943_vm4 = vcmp.eq.s32.totalorder %v4049_v48, %v4412_v6 }
 0x180   :  { %v7093_v37 = vsel %vm4897_vm5, 4294967295, %v7092_v37  ;;  %vm1185_vm0 = vmor %vm1009_vm12, %vm1121_vm8  ;;  %vm947_vm8 = vcmp.eq.s32.totalorder %v4049_v48, %v4005_v18  ;;  %vm7100_vm12 = vcmp.eq.s32.totalorder %v4049_v48, %v3914_v58  ;;  %v4948_v35 = vpop.permute.xlu1 %719 }
 0x181   :  { %vm1357_vm7 = vmor %vm1181_vm2, %vm1293_vm15  ;;  %394 = vperm.xlu1 %3448, %v4941_v27  }
 0x182   :  { %vm4908_vm1 = vmor %vm7095_vm11, %vm418_vm13  ;;  %v2842_v1 = vsel %vm1357_vm7, 1.0, %v7029_v7  ;;  %vm7101_vm13 = vnez %v7077_v46  ;;  %vm1123_vm11 = vcmp.eq.s32.totalorder %v4049_v48, %v4512_v16  ;;  %vm1295_vm7 = vcmp.eq.s32.totalorder %v4049_v48, %v3948_v4 }
 0x183   :  { %v7097_v50 = vsel %vm4908_vm1, 4294967295, %v7096_v50  ;;  %vm1361_vm10 = vmor %vm1185_vm0, %vm1297_vm14  ;;  %vm7102_vm14 = vnez %v7084_v23  ;;  %vm944_vm1 = vcmp.eq.s32.totalorder %v4030_v42, %v4005_v18  ;;  %v7124_v23 = vmov 0 }
 0x184   :  { %vm4919_vm15 = vmor %vm4833_vm6, %vm592_vm9  ;;  %v2846_v8 = vsel %vm1361_vm10, 1.0, %v7029_v7  ;;  %vm1119_vm6 = vcmp.eq.s32.totalorder %v4049_v48, %v4457_v51  ;;  %v4984_v5 = vpop.permute.xlu1 %722 }
 0x185   :  { %v7099_v32 = vsel %vm4919_vm15, 4294967295, %v7098_v32  ;;  %vm831_vm2 = vmor %vm7101_vm13, %vm7100_vm12  ;;  %v1541_v40 = vpack.c.bf16 %v2846_v8, %v2842_v1  ;;  %vm764_vm13 = vcmp.eq.s32.totalorder %v4030_v42, %v3914_v58  ;;  %vm940_vm15 = vcmp.eq.s32.totalorder %v4030_v42, %v4412_v6 }
 0x186   :  { %vm835_vm0 = vmor %vm7102_vm14, %vm771_vm3  ;;  %vm590_vm3 = vcmp.eq.s32.totalorder %v4041_v47, %v4346_v17  ;;  %v7106_v17 = vmov 3   ;;  %v7158_v1 = vmov 0 }
 0x187   :  { %vm1007_vm9 = vmor %vm831_vm2, %vm943_vm4  ;;  %1875 = vmatprep.mubr.bf16.mxu0 %v1541_v40  ;;  %vm1299_vm4 = vcmp.eq.s32.totalorder %v4049_v48, %v4581_v10  ;;  %vm7103_vm2 = vnez %v7090_v29  ;;  %3450 = vset.pattern.permute.xlu1 %v7106_v17  ;;  %v7142_v29 = vmov 0  ;;  %v7162_v40 = vmov 0 }
 0x188   :  { %vm1011_vm10 = vmor %vm835_vm0, %vm947_vm8  ;;  %vm594_vm8 = vcmp.eq.s32.totalorder %v4041_v47, %v4352_v15  ;;  %570 = vperm.xlu1 %3450, %v4941_v27   ;;  %v7266_v17 = vmov 0 }
 0x189   :  { %vm1183_vm12 = vmor %vm1007_vm9, %vm1119_vm6  ;;  %vm768_vm6 = vcmp.eq.s32.totalorder %v4030_v42, %v4374_v54 }
 0x18a   :  { %vm4956_vm14 = vmor %vm7103_vm2, %vm590_vm3  ;;  %vm7107_vm2 = vnez %v7097_v50  ;;  %v7151_v50 = vmov 0 }
 0x18b   :  { %vm1187_vm0 = vmor %vm1011_vm10, %vm1123_vm11  ;;  %vm7110_vm11 = vnez %v7093_v37  ;;  %vm7111_vm10 = vnez %v7099_v32  ;;  %v7214_v37 = vmov 0 }
 0x18c   :  { %vm1359_vm9 = vmor %vm1183_vm12, %vm1295_vm7  ;;  %3451 = vset.pattern.permute.xlu1 %v7112_v33 }
 0x18d   :  { %vm1363_vm5 = vmor %vm1187_vm0, %vm1299_vm4  ;;  %v2844_v22 = vsel %vm1359_vm9, 1.0, %v7029_v7  ;;  %vm1116_vm4 = vcmp.eq.s32.totalorder %v4030_v42, %v4457_v51  ;;  %vm1120_vm0 = vcmp.eq.s32.totalorder %v4030_v42, %v4512_v16  ;;  %743 = vperm.xlu1 %3451, %v4877_v11  }
 0x18e   :  { %vm4969_vm3 = vmor %vm7107_vm2, %vm594_vm8  ;;  %v2848_v20 = vsel %vm1363_vm5, 1.0, %v7029_v7  ;;  %vm1292_vm5 = vcmp.eq.s32.totalorder %v4030_v42, %v3948_v4  ;;  %vm1296_vm2 = vcmp.eq.s32.totalorder %v4030_v42, %v4581_v10 }
 0x18f   :  { %vm828_vm7 = vmor %vm7110_vm11, %vm764_vm13  ;;  %v1543_v14 = vpack.c.bf16 %v2848_v20, %v2844_v22  ;;  %vm770_vm11 = vcmp.eq.s32.totalorder %v4041_v47, %v4374_v54  ;;  %v7113_v54 = vmov 5  }
 0x190   :  { %vm832_vm12 = vmor %vm7111_vm10, %vm768_vm6  ;;  %vm766_vm6 = vcmp.eq.s32.totalorder %v4041_v47, %v3914_v58  ;;  %vm942_vm10 = vcmp.eq.s32.totalorder %v4041_v47, %v4412_v6  ;;  %v5004_v58 = vpop.permute.xlu1 %898 }
 0x191   :  { %vm1004_vm8 = vmor %vm828_vm7, %vm940_vm15  ;;  %1972 = vmatprep.mubr.bf16.mxu1 %v1543_v14  ;;  %3453 = vset.pattern.permute.xlu1 %v7113_v54 }
 0x192   :  { %vm1008_vm13 = vmor %vm832_vm12, %vm944_vm1  ;;  %vm946_vm12 = vcmp.eq.s32.totalorder %v4041_v47, %v4005_v18  ;;  %919 = vperm.xlu1 %3453, %v4877_v11  }
 0x193   :  { %vm1180_vm9 = vmor %vm1004_vm8, %vm1116_vm4 }
 0x194   :  { %vm1184_vm15 = vmor %vm1008_vm13, %vm1120_vm0  ;;  %vm1118_vm0 = vcmp.eq.s32.totalorder %v4041_v47, %v4457_v51  ;;  %vm1122_vm13 = vcmp.eq.s32.totalorder %v4041_v47, %v4512_v16  ;;  %v5018_v18 = vpop.permute.xlu1 %1071 }
 0x195   :  { %vm1356_vm7 = vmor %vm1180_vm9, %vm1292_vm5 }
 0x196   :  { %vm1360_vm1 = vmor %vm1184_vm15, %vm1296_vm2  ;;  %v2841_v45 = vsel %vm1356_vm7, 1.0, %v7029_v7  ;;  %922 = vperm.xlu1 %3453, %v4941_v27   ;;  %vm136_vm7 = vcmp.eq.s32.totalorder %v4030_v42, %v4248_v13 }
 0x197   :  { %v2845_v41 = vsel %vm1360_vm1, 1.0, %v7029_v7  ;;  %vm830_vm4 = vmor %vm4956_vm14, %vm766_vm6  ;;  %vm1294_vm14 = vcmp.eq.s32.totalorder %v4041_v47, %v3948_v4  ;;  %vm137_vm1 = vcmp.eq.s32.totalorder %v4034_v43, %v4248_v13 }
 0x198   :  { %v1540_v57 = vpack.c.bf16 %v2845_v41, %v2841_v45  ;;  %vm834_vm8 = vmor %vm4969_vm3, %vm770_vm11  ;;  %vm1298_vm3 = vcmp.eq.s32.totalorder %v4041_v47, %v4581_v10  ;;  %v5025_v4 = vpop.permute.xlu1 %1247 }
 0x199   :  { %vm1006_vm5 = vmor %vm830_vm4, %vm942_vm10  ;;  %vm248_vm10 = vcmp.eq.s32.totalorder %v4030_v42, %v4793_v59  ;;  %vm138_vm4 = vcmp.eq.s32.totalorder %v4041_v47, %v4248_v13 }
 0x19a   :  { %1876 = vmatmul.mubr.bf16.gmra.mrb[8].mxu0 %v1540_v57  ;;  %vm1010_vm9 = vmor %vm834_vm8, %vm946_vm12  ;;  %3454 = vset.pattern.permute.xlu1 %v7033_v19  ;;  %vm249_vm12 = vcmp.eq.s32.totalorder %v4034_v43, %v4793_v59  ;;  %vm250_vm8 = vcmp.eq.s32.totalorder %v4041_v47, %v4793_v59  ;;  %v7179_v19 = vmov 0 }
 0x19b   :  { %vm1182_vm2 = vmor %vm1006_vm5, %vm1118_vm0  ;;  %1098 = vperm.xlu1 %3454, %v4941_v27   ;;  %vm139_vm0 = vcmp.eq.s32.totalorder %v4049_v48, %v4248_v13  ;;  %vm251_vm5 = vcmp.eq.s32.totalorder %v4049_v48, %v4793_v59  ;;  %v7120_v59 = vmov 0  ;;  %v7164_v27 = vmov 0 }
 0x19c   :  { %vm1186_vm6 = vmor %vm1010_vm9, %vm1122_vm13  ;;  %v5029_v10 = vpop.permute.xlu1 %1250 }
 0x19d   :  { %vm1358_vm15 = vmor %vm1182_vm2, %vm1294_vm14  ;;  %vm424_vm14 = vcmp.eq.s32.totalorder %v4030_v42, %v4857_v3  ;;  %vm244_vm2 = vcmp.eq.s32.totalorder %v4030_v42, %v4718_v31 }
 0x19e   :  { %vm1362_vm11 = vmor %vm1186_vm6, %vm1298_vm3  ;;  %v2843_v51 = vsel %vm1358_vm15, 1.0, %v7029_v7  ;;  %vm245_vm6 = vcmp.eq.s32.totalorder %v4034_v43, %v4718_v31  ;;  %vm425_vm15 = vcmp.eq.s32.totalorder %v4034_v43, %v4857_v3 }
 0x19f   :  { %v2847_v6 = vsel %vm1362_vm11, 1.0, %v7029_v7  ;;  %3455 = vset.pattern.permute.xlu1 %v6974_v62  ;;  %vm312_vm13 = vmor %vm136_vm7, %vm248_vm10  ;;  %vm132_vm7 = vcmp.eq.s32.totalorder %v4030_v42, %v4640_v12  ;;  %vm135_vm10 = vcmp.eq.s32.totalorder %v4049_v48, %v4640_v12 }
 0x1a0   :  { %v1542_v16 = vpack.c.bf16 %v2847_v6, %v2843_v51  ;;  %1271 = vperm.xlu1 %3455, %v4877_v11   ;;  %vm5049_vm9 = vmor %vm137_vm1, %vm249_vm12  ;;  %v5059_v46 = vpop.permute.xlu1 %88  ;;  %vm426_vm1 = vcmp.eq.s32.totalorder %v4041_v47, %v4857_v3  ;;  %v5326_v6 = vpop.permute.xlu0 %549 }
 0x1a1   :  { %vm5055_vm3 = vmor %vm138_vm4, %vm250_vm8  ;;  %vm133_vm4 = vcmp.eq.s32.totalorder %v4034_v43, %v4640_v12  ;;  %vm247_vm8 = vcmp.eq.s32.totalorder %v4049_v48, %v4718_v31 }
 0x1a2   :  { %1973 = vmatmul.mubr.bf16.gmra.mrb[8].mxu1 %v1542_v16  ;;  %vm5065_vm11 = vmor %vm139_vm0, %vm251_vm5  ;;  %vm427_vm0 = vcmp.eq.s32.totalorder %v4049_v48, %v4857_v3  ;;  %v7129_v3 = vmov 0 }
 0x1a3   :  { %vm5075_vm12 = vmor %vm312_vm13, %vm424_vm14  ;;  %vm134_vm13 = vcmp.eq.s32.totalorder %v4041_v47, %v4640_v12 }
 0x1a4   :  { %v7121_v59 = vsel %vm5075_vm12, 4294967295, %v7120_v59  ;;  %vm5085_vm5 = vmor %vm132_vm7, %vm244_vm2  ;;  %vm421_vm7 = vcmp.eq.s32.totalorder %v4034_v43, %v3979_v26  ;;  %v5123_v12 = vpop.permute.xlu1 %197 }
 0x1a5   :  { %vm5095_vm14 = vmor %vm5049_vm9, %vm425_vm15  ;;  %vm7128_vm9 = vcmp.eq.s32.totalorder %v4041_v47, %v4718_v31  ;;  %v7133_v31 = vmov 0 }
 0x1a6   :  { %v7125_v23 = vsel %vm5095_vm14, 4294967295, %v7124_v23  ;;  %vm309_vm2 = vmor %vm133_vm4, %vm245_vm6  ;;  %vm422_vm14 = vcmp.eq.s32.totalorder %v4041_v47, %v3979_v26 }
 0x1a7   :  { %vm5108_vm12 = vmor %vm5055_vm3, %vm426_vm1  ;;  %vm423_vm3 = vcmp.eq.s32.totalorder %v4049_v48, %v3979_v26  ;;  %vm600_vm1 = vcmp.eq.s32.totalorder %v4030_v42, %v547_v56 }
 0x1a8   :  { %v7127_v55 = vsel %vm5108_vm12, 4294967295, %v7126_v55  ;;  %vm310_vm15 = vmor %vm134_vm13, %vm7128_vm9  ;;  %vm7131_vm13 = vcmp.eq.s32.totalorder %v4030_v42, %v3979_v26  ;;  %v5150_v26 = vpop.permute.xlu1 %373 }
 0x1a9   :  { %vm5119_vm6 = vmor %vm5065_vm11, %vm427_vm0  ;;  %vm596_vm11 = vcmp.eq.s32.totalorder %v4030_v42, %v4903_v24 }
 0x1aa   :  { %v7130_v3 = vsel %vm5119_vm6, 4294967295, %v7129_v3  ;;  %vm311_vm4 = vmor %vm135_vm10, %vm247_vm8  ;;  %vm597_vm10 = vcmp.eq.s32.totalorder %v4034_v43, %v4903_v24  ;;  %vm7132_vm8 = vnez %v7121_v59 }
 0x1ab   :  { %vm484_vm9 = vmor %vm5085_vm5, %vm7131_vm13  ;;  %vm598_vm13 = vcmp.eq.s32.totalorder %v4041_v47, %v4903_v24 }
 0x1ac   :  { %vm485_vm12 = vmor %vm309_vm2, %vm421_vm7  ;;  %vm599_vm2 = vcmp.eq.s32.totalorder %v4049_v48, %v4903_v24  ;;  %v5184_v11 = vpop.permute.xlu1 %376  ;;  %v6021_v24 = vld [vmem:[%s6912_s6] sm:$0xff]  }
 0x1ad   :  { %vm486_vm0 = vmor %vm310_vm15, %vm422_vm14  ;;  %vm601_vm14 = vcmp.eq.s32.totalorder %v4034_v43, %v547_v56 }
 0x1ae   :  { %vm5139_vm6 = vmor %vm7132_vm8, %vm600_vm1  ;;  %vm772_vm1 = vcmp.eq.s32.totalorder %v4030_v42, %v4948_v35  ;;  %vm602_vm8 = vcmp.eq.s32.totalorder %v4041_v47, %v547_v56 }
 0x1af   :  { %v7134_v31 = vsel %vm5139_vm6, 4294967295, %v7133_v31  ;;  %vm487_vm5 = vmor %vm311_vm4, %vm423_vm3  ;;  %vm773_vm4 = vcmp.eq.s32.totalorder %v4034_v43, %v4948_v35  ;;  %vm603_vm3 = vcmp.eq.s32.totalorder %v4049_v48, %v547_v56  ;;  %v7190_v56 = vmov 0 }
 0x1b0   :  { %vm660_vm7 = vmor %vm484_vm9, %vm596_vm11  ;;  %vm774_vm11 = vcmp.eq.s32.totalorder %v4041_v47, %v4948_v35  ;;  %v5222_v32 = vpop.permute.xlu1 %552 }
 0x1b1   :  { %vm661_vm15 = vmor %vm485_vm12, %vm597_vm10  ;;  %vm7135_vm10 = vnez %v7125_v23  ;;  %v7192_v23 = vmov 0 }
 0x1b2   :  { %vm662_vm6 = vmor %vm486_vm0, %vm598_vm13  ;;  %vm775_vm0 = vcmp.eq.s32.totalorder %v4049_v48, %v4948_v35 }
 0x1b3   :  { %vm663_vm9 = vmor %vm487_vm5, %vm599_vm2  ;;  %vm7138_vm2 = vnez %v7127_v55 }
 0x1b4   :  { %vm5160_vm12 = vmor %vm7135_vm10, %vm601_vm14  ;;  %vm776_vm14 = vcmp.eq.s32.totalorder %v4030_v42, %v4984_v5  ;;  %v5268_v35 = vpop.permute.xlu1 %725 }
 0x1b5   :  { %v7137_v25 = vsel %vm5160_vm12, 4294967295, %v7136_v25  ;;  %vm836_vm13 = vmor %vm660_vm7, %vm772_vm1  ;;  %vm948_vm12 = vcmp.eq.s32.totalorder %v4030_v42, %v4011_v34  ;;  %vm7141_vm1 = vnez %v7130_v3 }
 0x1b6   :  { %vm5168_vm5 = vmor %vm7138_vm2, %vm602_vm8  ;;  %vm949_vm8 = vcmp.eq.s32.totalorder %v4034_v43, %v4011_v34 }
 0x1b7   :  { %v7140_v39 = vsel %vm5168_vm5, 4294967295, %v7139_v39  ;;  %vm837_vm10 = vmor %vm661_vm15, %vm773_vm4  ;;  %vm950_vm15 = vcmp.eq.s32.totalorder %v4041_v47, %v4011_v34  ;;  %vm7144_vm4 = vnez %v7134_v31  ;;  %v7199_v31 = vmov 0 }
 0x1b8   :  { %vm5178_vm7 = vmor %vm7141_vm1, %vm603_vm3  ;;  %vm951_vm3 = vcmp.eq.s32.totalorder %v4049_v48, %v4011_v34  ;;  %v7153_v34 = vmov 0  ;;  %v5300_v14 = vpop.permute.xlu1 %901 }
 0x1b9   :  { %v7143_v29 = vsel %vm5178_vm7, 4294967295, %v7142_v29  ;;  %vm838_vm2 = vmor %vm662_vm6, %vm774_vm11  ;;  %vm777_vm6 = vcmp.eq.s32.totalorder %v4034_v43, %v4984_v5  ;;  %vm778_vm11 = vcmp.eq.s32.totalorder %v4041_v47, %v4984_v5 }
 0x1ba   :  { %vm839_vm5 = vmor %vm663_vm9, %vm775_vm0 }
 0x1bb   :  { %vm5190_vm1 = vmor %vm7144_vm4, %vm776_vm14  ;;  %vm7155_vm14 = vnez %v7137_v25  ;;  %vm953_vm4 = vcmp.eq.s32.totalorder %v4034_v43, %v5004_v58  ;;  %v7203_v25 = vmov 0 }
 0x1bc   :  { %vm5196_vm7 = vmor %vm836_vm13, %vm948_vm12  ;;  %vm779_vm12 = vcmp.eq.s32.totalorder %v4049_v48, %v4984_v5  ;;  %v5322_v57 = vpop.permute.xlu1 %904 }
 0x1bd   :  { %vm5202_vm9 = vmor %vm837_vm10, %vm949_vm8  ;;  %vm952_vm8 = vcmp.eq.s32.totalorder %v4030_v42, %v5004_v58 }
 0x1be   :  { %v7150_v44 = vsel %vm5202_vm9, 4294967295, %v7149_v44  ;;  %vm5208_vm0 = vmor %vm838_vm2, %vm950_vm15  ;;  %vm7156_vm2 = vnez %v7140_v39 }
 0x1bf   :  { %v7152_v50 = vsel %vm5208_vm0, 4294967295, %v7151_v50  ;;  %vm5214_vm13 = vmor %vm839_vm5, %vm951_vm3  ;;  %vm7157_vm0 = vnez %v7143_v29  ;;  %vm955_vm3 = vcmp.eq.s32.totalorder %v4049_v48, %v5004_v58  ;;  %v7206_v29 = vmov 0 }
 0x1c0   :  { %v7154_v34 = vsel %vm5214_vm13, 4294967295, %v7153_v34  ;;  %vm841_vm10 = vmor %vm7155_vm14, %vm777_vm6  ;;  %vm954_vm6 = vcmp.eq.s32.totalorder %v4041_v47, %v5004_v58  ;;  %v5328_v16 = vpop.permute.xlu1 %1080 }
 0x1c1   :  { %vm842_vm15 = vmor %vm7156_vm2, %vm778_vm11  ;;  %vm1124_vm11 = vcmp.eq.s32.totalorder %v4030_v42, %v5018_v18  ;;  %vm1125_vm2 = vcmp.eq.s32.totalorder %v4034_v43, %v5018_v18 }
 0x1c2   :  { %vm843_vm5 = vmor %vm7157_vm0, %vm779_vm12  ;;  %vm1127_vm0 = vcmp.eq.s32.totalorder %v4049_v48, %v5018_v18  ;;  %vm1129_vm12 = vcmp.eq.s32.totalorder %v4034_v43, %v3929_v61 }
 0x1c3   :  { %vm5236_vm14 = vmor %vm5190_vm1, %vm952_vm8  ;;  %vm1126_vm8 = vcmp.eq.s32.totalorder %v4041_v47, %v5018_v18 }
 0x1c4   :  { %v7159_v1 = vsel %vm5236_vm14, 4294967295, %v7158_v1  ;;  %vm1017_vm13 = vmor %vm841_vm10, %vm953_vm4  ;;  %vm7166_vm4 = vnez %v7150_v44  ;;  %v5360_v62 = vpop.permute.xlu1 %1253 }
 0x1c5   :  { %vm5248_vm9 = vmor %vm843_vm5, %vm955_vm3  ;;  %vm1301_vm5 = vcmp.eq.s32.totalorder %v4034_v43, %v5025_v4 }
 0x1c6   :  { %vm5252_vm1 = vmor %vm842_vm15, %vm954_vm6  ;;  %vm7167_vm15 = vnez %v7154_v34  ;;  %vm1131_vm6 = vcmp.eq.s32.totalorder %v4049_v48, %v3929_v61  ;;  %v7220_v34 = vmov 0 }
 0x1c7   :  { %v7163_v40 = vsel %vm5252_vm1, 4294967295, %v7162_v40  ;;  %vm5260_vm10 = vmor %vm5196_vm7, %vm1124_vm11  ;;  %vm1305_vm7 = vcmp.eq.s32.totalorder %v4034_v43, %v5029_v10  ;;  %vm1303_vm1 = vcmp.eq.s32.totalorder %v4049_v48, %v5025_v4 }
 0x1c8   :  { %v7165_v27 = vsel %vm5260_vm10, 4294967295, %v7164_v27  ;;  %vm1189_vm14 = vmor %vm7166_vm4, %vm1125_vm2  ;;  %vm7170_vm2 = vnez %v7152_v50  ;;  %v5404_v59 = vpop.permute.xlu1 %91 }
 0x1c9   :  { %vm5272_vm3 = vmor %vm7167_vm15, %vm1127_vm0  ;;  %vm1307_vm15 = vcmp.eq.s32.totalorder %v4049_v48, %v5029_v10 }
 0x1ca   :  { %v7169_v0 = vsel %vm5272_vm3, 4294967295, %v7168_v0  ;;  %vm1193_vm11 = vmor %vm1017_vm13, %vm1129_vm12  ;;  %vm1128_vm3 = vcmp.eq.s32.totalorder %v4030_v42, %v3929_v61  ;;  %vm1300_vm12 = vcmp.eq.s32.totalorder %v4030_v42, %v5025_v4 }
 0x1cb   :  { %vm5282_vm4 = vmor %vm7170_vm2, %vm1126_vm8 }
 0x1cc   :  { %vm1365_vm0 = vmor %vm1189_vm14, %vm1301_vm5  ;;  %vm7173_vm14 = vnez %v7169_v0  ;;  %vm1304_vm5 = vcmp.eq.s32.totalorder %v4030_v42, %v5029_v10  ;;  %v5438_v3 = vpop.permute.xlu1 %94 }
 0x1cd   :  { %vm1369_vm10 = vmor %vm1193_vm11, %vm1305_vm7  ;;  %v2850_v15 = vsel %vm1365_vm0, 1.0, %v7029_v7  ;;  %vm1130_vm11 = vcmp.eq.s32.totalorder %v4041_v47, %v3929_v61  ;;  %vm1306_vm0 = vcmp.eq.s32.totalorder %v4041_v47, %v5029_v10  ;;  %v5358_v10 = vpop.permute.xlu0 %564 }
 0x1ce   :  { %v2854_v22 = vsel %vm1369_vm10, 1.0, %v7029_v7  ;;  %vm1195_vm13 = vmor %vm5248_vm9, %vm1131_vm6  ;;  %vm7174_vm9 = vnez %v7159_v1  ;;  %vm7175_vm6 = vnez %v7165_v27  ;;  %v7324_v27 = vmov 0 }
 0x1cf   :  { %v1545_v20 = vpack.c.bf16 %v2854_v22, %v2850_v15  ;;  %vm1367_vm8 = vmor %vm7173_vm14, %vm1303_vm1  ;;  %vm1302_vm1 = vcmp.eq.s32.totalorder %v4041_v47, %v5025_v4  ;;  %v7177_v4 = vmov 0 }
 0x1d0   :  { %vm1371_vm7 = vmor %vm1195_vm13, %vm1307_vm15  ;;  %v2852_v5 = vsel %vm1367_vm8, 1.0, %v7029_v7  ;;  %vm7176_vm13 = vnez %v7163_v40  ;;  %v5476_v39 = vpop.permute.xlu1 %206  ;;  %v7255_v40 = vmov 0 }
 0x1d1   :  { %1883 = vmatprep.mubr.bf16.mxu0 %v1545_v20  ;;  %v2856_v33 = vsel %vm1371_vm7, 1.0, %v7029_v7  ;;  %vm1192_vm10 = vmor %vm7174_vm9, %vm1128_vm3  ;;  %vm145_vm7 = vcmp.eq.s32.totalorder %v4034_v43, %v5059_v46  ;;  %vm258_vm9 = vcmp.eq.s32.totalorder %v4041_v47, %v4348_v2 }
 0x1d2   :  { %v1547_v45 = vpack.c.bf16 %v2856_v33, %v2852_v5  ;;  %vm1364_vm2 = vmor %vm7175_vm6, %vm1300_vm12  ;;  %vm256_vm12 = vcmp.eq.s32.totalorder %v4030_v42, %v4348_v2  ;;  %vm255_vm6 = vcmp.eq.s32.totalorder %v4049_v48, %v5123_v12 }
 0x1d3   :  { %vm1368_vm15 = vmor %vm1192_vm10, %vm1304_vm5  ;;  %v2849_v61 = vsel %vm1364_vm2, 1.0, %v7029_v7  ;;  %vm257_vm5 = vcmp.eq.s32.totalorder %v4034_v43, %v4348_v2  ;;  %vm146_vm10 = vcmp.eq.s32.totalorder %v4041_v47, %v5059_v46  ;;  %vm259_vm2 = vcmp.eq.s32.totalorder %v4049_v48, %v4348_v2 }
 0x1d4   :  { %1980 = vmatprep.mubr.bf16.mxu1 %v1547_v45  ;;  %v2853_v41 = vsel %vm1368_vm15, 1.0, %v7029_v7  ;;  %vm1194_vm14 = vmor %vm7176_vm13, %vm1130_vm11  ;;  %vm140_vm11 = vcmp.eq.s32.totalorder %v4030_v42, %v4284_v49  ;;  %vm253_vm13 = vcmp.eq.s32.totalorder %v4034_v43, %v5123_v12  ;;  %v7181_v2 = vmov 0  ;;  %v5520_v50 = vpop.permute.xlu1 %379 }
 0x1d5   :  { %v1544_v58 = vpack.c.bf16 %v2853_v41, %v2849_v61  ;;  %vm1366_vm3 = vmor %vm5282_vm4, %vm1302_vm1  ;;  %vm144_vm4 = vcmp.eq.s32.totalorder %v4030_v42, %v5059_v46  ;;  %vm252_vm1 = vcmp.eq.s32.totalorder %v4030_v42, %v5123_v12 }
 0x1d6   :  { %vm1370_vm8 = vmor %vm1194_vm14, %vm1306_vm0  ;;  %v2851_v54 = vsel %vm1366_vm3, 1.0, %v7029_v7  ;;  %vm147_vm0 = vcmp.eq.s32.totalorder %v4049_v48, %v5059_v46  ;;  %vm142_vm14 = vcmp.eq.s32.totalorder %v4041_v47, %v4284_v49 }
 0x1d7   :  { %1884 = vmatmul.mubr.bf16.gmra.mrb[12].mxu0 %v1544_v58  ;;  %v2855_v18 = vsel %vm1370_vm8, 1.0, %v7029_v7  ;;  %vm5352_vm15 = vmor %vm144_vm4, %vm256_vm12  ;;  %vm254_vm8 = vcmp.eq.s32.totalorder %v4041_v47, %v5123_v12  ;;  %vm143_vm12 = vcmp.eq.s32.totalorder %v4049_v48, %v4284_v49  ;;  %v5609_v58 = vld [vmem:[%s6910_s2] ss:$0 sm:$0xff] }
 0x1d8   :  { %v1546_v51 = vpack.c.bf16 %v2855_v18, %v2851_v54  ;;  %v7178_v4 = vsel %vm5352_vm15, 4294967295, %v7177_v4  ;;  %vm5364_vm3 = vmor %vm145_vm7, %vm257_vm5  ;;  %v5560_v8 = vpop.permute.xlu1 %555 }
 0x1d9   :  { %v7180_v19 = vsel %vm5364_vm3, 4294967295, %v7179_v19  ;;  %vm5372_vm4 = vmor %vm146_vm10, %vm258_vm9  ;;  %vm7185_vm3 = vcmp.eq.s32.totalorder %v4034_v43, %v4284_v49  ;;  %vm428_vm9 = vcmp.eq.s32.totalorder %v4030_v42, %v5150_v26  ;;  %v5402_v49 = vpop.permute.xlu0 %567 }
 0x1da   :  { %1981 = vmatmul.mubr.bf16.gmra.mrb[12].mxu1 %v1546_v51  ;;  %v7182_v2 = vsel %vm5372_vm4, 4294967295, %v7181_v2  ;;  %vm316_vm5 = vmor %vm140_vm11, %vm252_vm1  ;;  %vm429_vm4 = vcmp.eq.s32.totalorder %v4034_v43, %v5150_v26  ;;  %vm430_vm11 = vcmp.eq.s32.totalorder %v4041_v47, %v5150_v26 }
 0x1db   :  { %vm5381_vm7 = vmor %vm147_vm0, %vm259_vm2  ;;  %vm431_vm2 = vcmp.eq.s32.totalorder %v4049_v48, %v5150_v26  ;;  %v7201_v26 = vmov 0 }
 0x1dc   :  { %vm317_vm15 = vmor %vm7185_vm3, %vm253_vm13  ;;  %vm432_vm13 = vcmp.eq.s32.totalorder %v4030_v42, %v5184_v11  ;;  %v5601_v45 = vpop.permute.xlu1 %558 }
 0x1dd   :  { %vm318_vm10 = vmor %vm142_vm14, %vm254_vm8  ;;  %vm434_vm8 = vcmp.eq.s32.totalorder %v4041_v47, %v5184_v11  ;;  %v729_v55 = vpop.permute.xlu0 %728 }
 0x1de   :  { %vm319_vm1 = vmor %vm143_vm12, %vm255_vm6  ;;  %vm433_vm6 = vcmp.eq.s32.totalorder %v4034_v43, %v5184_v11 }
 0x1df   :  { %vm5396_vm0 = vmor %vm316_vm5, %vm428_vm9  ;;  %vm7195_vm9 = vnez %v7180_v19 }
 0x1e0   :  { %vm5406_vm14 = vmor %vm317_vm15, %vm429_vm4  ;;  %vm435_vm15 = vcmp.eq.s32.totalorder %v4049_v48, %v5184_v11  ;;  %vm7194_vm4 = vnez %v7178_v4 }
 0x1e1   :  { %v7189_v60 = vsel %vm5406_vm14, 4294967295, %v7188_v60  ;;  %vm5412_vm3 = vmor %vm318_vm10, %vm430_vm11  ;;  %vm608_vm10 = vcmp.eq.s32.totalorder %v4030_v42, %v5222_v32  ;;  %vm7196_vm11 = vnez %v7182_v2  ;;  %v5633_v2 = vpop.permute.xlu1 %734 }
 0x1e2   :  { %v7191_v56 = vsel %vm5412_vm3, 4294967295, %v7190_v56  ;;  %vm5418_vm12 = vmor %vm319_vm1, %vm431_vm2  ;;  %vm609_vm1 = vcmp.eq.s32.totalorder %v4034_v43, %v5222_v32 }
 0x1e3   :  { %v7193_v23 = vsel %vm5418_vm12, 4294967295, %v7192_v23  ;;  %vm496_vm5 = vmor %vm7194_vm4, %vm432_vm13  ;;  %vm610_vm12 = vcmp.eq.s32.totalorder %v4041_v47, %v5222_v32  ;;  %vm611_vm13 = vcmp.eq.s32.totalorder %v4049_v48, %v5222_v32  ;;  %vm604_vm4 = vcmp.eq.s32.totalorder %v4030_v42, %v5326_v6 }
 0x1e4   :  { %vm497_vm14 = vmor %vm7195_vm9, %vm433_vm6  ;;  %vm784_vm9 = vcmp.eq.s32.totalorder %v4030_v42, %v729_v55  ;;  %v7222_v32 = vmov 0 }
 0x1e5   :  { %vm498_vm3 = vmor %vm7196_vm11, %vm434_vm8  ;;  %vm606_vm11 = vcmp.eq.s32.totalorder %v4041_v47, %v5326_v6 }
 0x1e6   :  { %vm499_vm2 = vmor %vm5381_vm7, %vm435_vm15  ;;  %vm605_vm7 = vcmp.eq.s32.totalorder %v4034_v43, %v5326_v6 }
 0x1e7   :  { %vm672_vm6 = vmor %vm496_vm5, %vm608_vm10  ;;  %vm607_vm10 = vcmp.eq.s32.totalorder %v4049_v48, %v5326_v6 }
 0x1e8   :  { %vm5444_vm8 = vmor %vm497_vm14, %vm609_vm1  ;;  %vm785_vm14 = vcmp.eq.s32.totalorder %v4034_v43, %v729_v55  ;;  %vm786_vm1 = vcmp.eq.s32.totalorder %v4041_v47, %v729_v55 }
 0x1e9   :  { %vm5450_vm15 = vmor %vm498_vm3, %vm610_vm12  ;;  %vm787_vm12 = vcmp.eq.s32.totalorder %v4049_v48, %v729_v55 }
 0x1ea   :  { %v7200_v31 = vsel %vm5450_vm15, 4294967295, %v7199_v31  ;;  %vm5457_vm5 = vmor %vm499_vm2, %vm611_vm13  ;;  %vm7205_vm2 = vnez %v7189_v60  ;;  %v2977_v0 = vpop.f32.mrb[0].mxu0 }
 0x1eb   :  { %v7202_v26 = vsel %vm5457_vm5, 4294967295, %v7201_v26  ;;  %vm668_vm3 = vmor %vm5396_vm0, %vm604_vm4  ;;  %vm780_vm5 = vcmp.eq.s32.totalorder %v4030_v42, %v5268_v35  ;;  %vm7208_vm4 = vnez %v7191_v56  ;;  %v2978_v15 = vpop.f32.mrb[1].mxu0 }
 0x1ec   :  { %vm5468_vm15 = vmor %vm672_vm6, %vm784_vm9  ;;  %vm781_vm9 = vcmp.eq.s32.totalorder %v4034_v43, %v5268_v35  ;;  %v2979_v20 = vadd.f32 %v2978_v15, %v2977_v0  ;;  %v7261_v0 = vmov 0  ;;  %v7269_v15 = vmov 0 }
 0x1ed   :  { %v7204_v25 = vsel %vm5468_vm15, 4294967295, %v7203_v25  ;;  %vm669_vm13 = vmor %vm7205_vm2, %vm605_vm7  ;;  %vm7209_vm15 = vnez %v7200_v31  ;;  %vm7212_vm2 = vnez %v7193_v23 }
 0x1ee   :  { %vm5480_vm0 = vmor %vm5444_vm8, %vm785_vm14  ;;  %vm782_vm14 = vcmp.eq.s32.totalorder %v4041_v47, %v5268_v35  ;;  %v1862_v6 = vadd.f32 %v2979_v20, %v5609_v58  ;;  %v7271_v20 = vmov 0 }
 0x1ef   :  { %v7207_v29 = vsel %vm5480_vm0, 4294967295, %v7206_v29  ;;  %vm670_vm6 = vmor %vm7208_vm4, %vm606_vm11  ;;  %vm7213_vm0 = vnez %v7202_v26  ;;  %vm783_vm11 = vcmp.eq.s32.totalorder %v4049_v48, %v5268_v35  ;;  %v732_v35 = vpop.permute.xlu0 %731 }
 0x1f0   :  { %vm5490_vm7 = vmor %vm7209_vm15, %vm786_vm1 }
 0x1f1   :  { %vm671_vm8 = vmor %vm7212_vm2, %vm607_vm10  ;;  %vm957_vm10 = vcmp.eq.s32.totalorder %v4034_v43, %v5300_v14 }
 0x1f2   :  { %vm5500_vm4 = vmor %vm7213_vm0, %vm787_vm12  ;;  %vm959_vm12 = vcmp.eq.s32.totalorder %v4049_v48, %v5300_v14  ;;  %v3041_v51 = vpop.f32.mrb[0].mxu1 }
 0x1f3   :  { %v7215_v37 = vsel %vm5500_vm4, 4294967295, %v7214_v37  ;;  %vm5506_vm1 = vmor %vm668_vm3, %vm780_vm5  ;;  %vm960_vm4 = vcmp.eq.s32.totalorder %v4030_v42, %v5322_v57  ;;  %vm961_vm3 = vcmp.eq.s32.totalorder %v4034_v43, %v5322_v57  ;;  %v3042_v4 = vpop.f32.mrb[1].mxu1 }
 0x1f4   :  { %vm845_vm15 = vmor %vm669_vm13, %vm781_vm9  ;;  %vm956_vm13 = vcmp.eq.s32.totalorder %v4030_v42, %v5300_v14  ;;  %vm962_vm9 = vcmp.eq.s32.totalorder %v4041_v47, %v5322_v57  ;;  %v3043_v46 = vadd.f32 %v3042_v4, %v3041_v51  ;;  %v3044_v13 = vpop.f32.mrb[2].mxu1 }
 0x1f5   :  { %vm5512_vm2 = vmor %vm670_vm6, %vm782_vm14  ;;  %vm7224_vm14 = vnez %v7204_v25  ;;  %v3045_v23 = vpop.f32.mrb[3].mxu1  ;;  %v5660_v25 = vpop.permute.xlu1 %907 }
 0x1f6   :  { %vm847_vm0 = vmor %vm671_vm8, %vm783_vm11  ;;  %vm963_vm8 = vcmp.eq.s32.totalorder %v4049_v48, %v5322_v57  ;;  %v1959_v55 = vadd.f32 %v3043_v46, %v1862_v6  ;;  %v3046_v12 = vadd.f32 %v3045_v23, %v3044_v13  ;;  %v3489_v46 = vld [vmem:[%s6911_s3] sm:$0xff]  }
 0x1f7   :  { %vm5522_vm5 = vmor %vm845_vm15, %vm957_vm10  ;;  %vm7225_vm15 = vnez %v7207_v29  ;;  %3163 = vmatprep.subr.bf16.mxu0 %v3489_v46  ;;  %3365 = vmatprep.subr.bf16.mxu1 %v3489_v46 }
 0x1f8   :  { %v7221_v34 = vsel %vm5522_vm5, 4294967295, %v7220_v34  ;;  %vm5530_vm6 = vmor %vm847_vm0, %vm959_vm12  ;;  %vm1136_vm5 = vcmp.eq.s32.totalorder %v4030_v42, %v5328_v16  ;;  %vm958_vm12 = vcmp.eq.s32.totalorder %v4041_v47, %v5300_v14  ;;  %v2980_v14 = vpop.f32.mrb[2].mxu0  ;;  %v2021_v29 = vmax.f32 %v1959_v55, 0.0  ;;  %3164 = vmatpush3.bf16.msra.mxu0 %v3489_v46  ;;  %3368 = vmatpush3.bf16.msra.mxu1 %v3489_v46  ;;  %v3491_v55 = vld [vmem:[%s6911_s3 + $0x10] sm:$0xff]  }
 0x1f9   :  { %v7223_v32 = vsel %vm5530_vm6, 4294967295, %v7222_v32  ;;  %vm1024_vm11 = vmor %vm7224_vm14, %vm960_vm4  ;;  %vm1137_vm4 = vcmp.eq.s32.totalorder %v4034_v43, %v5328_v16  ;;  %v2981_v5 = vpop.f32.mrb[3].mxu0  ;;  %v5713_v1 = vpop.permute.xlu1 %1083 }
 0x1fa   :  { %vm1025_vm10 = vmor %vm7225_vm15, %vm961_vm3  ;;  %vm7228_vm3 = vnez %v7215_v37  ;;  %vm1139_vm15 = vcmp.eq.s32.totalorder %v4049_v48, %v5328_v16  ;;  %v2982_v61 = vadd.f32 %v2981_v5, %v2980_v14  ;;  %v7278_v14 = vmov 0 }
 0x1fb   :  { %vm5548_vm0 = vmor %vm5506_vm1, %vm956_vm13  ;;  %vm1138_vm1 = vcmp.eq.s32.totalorder %v4041_v47, %v5328_v16 }
 0x1fc   :  { %vm1026_vm6 = vmor %vm5490_vm7, %vm962_vm9  ;;  %v1865_v60 = vadd.f32 %v2982_v61, %v5609_v58 }
 0x1fd   :  { %vm1027_vm14 = vmor %vm7228_vm3, %vm963_vm8  ;;  %vm1309_vm8 = vcmp.eq.s32.totalorder %v4034_v43, %v5360_v62  ;;  %vm1311_vm3 = vcmp.eq.s32.totalorder %v4049_v48, %v5360_v62 }
 0x1fe   :  { %vm5564_vm13 = vmor %vm1024_vm11, %vm1136_vm5  ;;  %vm1133_vm5 = vcmp.eq.s32.totalorder %v4034_v43, %v3936_v63  ;;  %v1962_v26 = vadd.f32 %v3046_v12, %v1865_v60 }
 0x1ff   :  { %vm5570_vm7 = vmor %vm5512_vm2, %vm958_vm12 }
 0x200   :  { %vm5574_vm9 = vmor %vm1025_vm10, %vm1137_vm4  ;;  %vm7239_vm10 = vnez %v7221_v34  ;;  %vm1313_vm4 = vcmp.eq.s32.totalorder %v4034_v43, %v3955_v9  ;;  %v2022_v11 = vmax.f32 %v1962_v26, 0.0 }
 0x201   :  { %vm5582_vm11 = vmor %vm1027_vm14, %vm1139_vm15  ;;  %vm1135_vm15 = vcmp.eq.s32.totalorder %v4049_v48, %v3936_v63 }
 0x202   :  { %vm5586_vm2 = vmor %vm1026_vm6, %vm1138_vm1  ;;  %vm7240_vm1 = vnez %v7223_v32  ;;  %v5679_v44 = vpack.c.bf16 %v2022_v11, %v2021_v29  ;;  %v7251_v32 = vmov 0 }
 0x203   :  { %vm1197_vm12 = vmor %vm7239_vm10, %vm1133_vm5 }
 0x204   :  { %vm1373_vm14 = vmor %vm1197_vm12, %vm1309_vm8  ;;  %vm1315_vm8 = vcmp.eq.s32.totalorder %v4049_v48, %v3955_v9  ;;  %vm1132_vm12 = vcmp.eq.s32.totalorder %v4030_v42, %v3936_v63 }
 0x205   :  { %vm1377_vm6 = vmor %vm5574_vm9, %vm1313_vm4  ;;  %v2858_v33 = vsel %vm1373_vm14, 1.0, %v7029_v7  ;;  %vm1308_vm9 = vcmp.eq.s32.totalorder %v4030_v42, %v5360_v62 }
 0x206   :  { %v2862_v41 = vsel %vm1377_vm6, 1.0, %v7029_v7  ;;  %vm1199_vm5 = vmor %vm7240_vm1, %vm1135_vm15  ;;  %vm1310_vm15 = vcmp.eq.s32.totalorder %v4041_v47, %v5360_v62 }
 0x207   :  { %v1549_v57 = vpack.c.bf16 %v2862_v41, %v2858_v33  ;;  %vm1375_vm10 = vmor %vm1199_vm5, %vm1311_vm3  ;;  %vm1312_vm3 = vcmp.eq.s32.totalorder %v4030_v42, %v3955_v9  ;;  %vm1314_vm5 = vcmp.eq.s32.totalorder %v4041_v47, %v3955_v9 }
 0x208   :  { %vm1379_vm4 = vmor %vm5582_vm11, %vm1315_vm8  ;;  %v2860_v54 = vsel %vm1375_vm10, 1.0, %v7029_v7  ;;  %vm1134_vm11 = vcmp.eq.s32.totalorder %v4041_v47, %v3936_v63  ;;  %vm261_vm10 = vcmp.eq.s32.totalorder %v4034_v43, %v4357_v53 }
 0x209   :  { %1891 = vmatprep.mubr.bf16.mxu0 %v1549_v57  ;;  %v2864_v18 = vsel %vm1379_vm4, 1.0, %v7029_v7  ;;  %vm1196_vm14 = vmor %vm5548_vm0, %vm1132_vm12  ;;  %vm149_vm12 = vcmp.eq.s32.totalorder %v4034_v43, %v5404_v59  ;;  %vm150_vm4 = vcmp.eq.s32.totalorder %v4041_v47, %v5404_v59  ;;  %v7290_v57 = vmov 0 }
 0x20a   :  { %v1551_v16 = vpack.c.bf16 %v2864_v18, %v2860_v54  ;;  %vm1372_vm6 = vmor %vm1196_vm14, %vm1308_vm9  ;;  %vm260_vm9 = vcmp.eq.s32.totalorder %v4030_v42, %v4357_v53  ;;  %vm263_vm14 = vcmp.eq.s32.totalorder %v4049_v48, %v4357_v53 }
 0x20b   :  { %vm1376_vm1 = vmor %vm5564_vm13, %vm1312_vm3  ;;  %v2857_v19 = vsel %vm1372_vm6, 1.0, %v7029_v7  ;;  %vm151_vm3 = vcmp.eq.s32.totalorder %v4049_v48, %v5404_v59 }
 0x20c   :  { %1988 = vmatprep.mubr.bf16.mxu1 %v1551_v16  ;;  %v2861_v56 = vsel %vm1376_vm1, 1.0, %v7029_v7  ;;  %vm1198_vm0 = vmor %vm5570_vm7, %vm1134_vm11  ;;  %vm148_vm7 = vcmp.eq.s32.totalorder %v4030_v42, %v5404_v59  ;;  %vm264_vm11 = vcmp.eq.s32.totalorder %v4030_v42, %v5476_v39  ;;  %v7249_v59 = vmov 0 }
 0x20d   :  { %v1548_v63 = vpack.c.bf16 %v2861_v56, %v2857_v19  ;;  %vm1374_vm13 = vmor %vm1198_vm0, %vm1310_vm15  ;;  %vm265_vm0 = vcmp.eq.s32.totalorder %v4034_v43, %v5476_v39  ;;  %v7340_v19 = vmov 0 }
 0x20e   :  { %vm1378_vm8 = vmor %vm5586_vm2, %vm1314_vm5  ;;  %v2859_v31 = vsel %vm1374_vm13, 1.0, %v7029_v7  ;;  %vm262_vm2 = vcmp.eq.s32.totalorder %v4041_v47, %v4357_v53  ;;  %vm152_vm13 = vcmp.eq.s32.totalorder %v4030_v42, %v5438_v3 }
 0x20f   :  { %1892 = vmatmul.mubr.bf16.gmra.mrb[16].mxu0 %v1548_v63  ;;  %v2863_v9 = vsel %vm1378_vm8, 1.0, %v7029_v7  ;;  %vm5669_vm15 = vmor %vm148_vm7, %vm260_vm9  ;;  %vm266_vm8 = vcmp.eq.s32.totalorder %v4041_v47, %v5476_v39  ;;  %vm153_vm9 = vcmp.eq.s32.totalorder %v4034_v43, %v5438_v3  ;;  %vm267_vm7 = vcmp.eq.s32.totalorder %v4049_v48, %v5476_v39  ;;  %v3490_v63 = vld [vmem:[%s6911_s3 + $0x8] sm:$0xff]  }
 0x210   :  { %v1550_v62 = vpack.c.bf16 %v2863_v9, %v2859_v31  ;;  %vm5673_vm6 = vmor %vm149_vm12, %vm261_vm10  ;;  %vm436_vm12 = vcmp.eq.s32.totalorder %v4030_v42, %v5520_v50  ;;  %3165 = vmatprep.subr.bf16.mxu0 %v3490_v63  ;;  %3366 = vmatprep.subr.bf16.mxu1 %v3490_v63 }
 0x211   :  { %vm5681_vm1 = vmor %vm150_vm4, %vm262_vm2  ;;  %vm154_vm2 = vcmp.eq.s32.totalorder %v4041_v47, %v5438_v3  ;;  %3166 = vmatpush3.bf16.msra.mxu0 %v3490_v63  ;;  %3369 = vmatpush3.bf16.msra.mxu1 %v3490_v63 }
 0x212   :  { %1989 = vmatmul.mubr.bf16.gmra.mrb[16].mxu1 %v1550_v62  ;;  %vm5687_vm5 = vmor %vm151_vm3, %vm263_vm14  ;;  %vm437_vm14 = vcmp.eq.s32.totalorder %v4034_v43, %v5520_v50  ;;  %vm155_vm3 = vcmp.eq.s32.totalorder %v4049_v48, %v5438_v3  ;;  %3167 = vmatprep.subr.bf16.mxu0 %v3491_v55 }
 0x213   :  { %vm5699_vm10 = vmor %vm152_vm13, %vm264_vm11  ;;  %vm438_vm13 = vcmp.eq.s32.totalorder %v4041_v47, %v5520_v50  ;;  %3367 = vmatprep.subr.bf16.mxu1 %v3491_v55 }
 0x214   :  { %v7250_v59 = vsel %vm5699_vm10, 4294967295, %v7249_v59  ;;  %vm5707_vm4 = vmor %vm153_vm9, %vm265_vm0  ;;  %vm439_vm0 = vcmp.eq.s32.totalorder %v4049_v48, %v5520_v50  ;;  %v5749_v50 = vpop.permute.xlu1 %1086 }
 0x215   :  { %v7252_v32 = vsel %vm5707_vm4, 4294967295, %v7251_v32  ;;  %vm5717_vm11 = vmor %vm154_vm2, %vm266_vm8  ;;  %vm612_vm8 = vcmp.eq.s32.totalorder %v4030_v42, %v5560_v8  ;;  %3168 = vmatpush3.bf16.msra.mxu0 %v3491_v55  ;;  %3370 = vmatpush3.bf16.msra.mxu1 %v3491_v55  ;;  %v7351_v55 = vmov 0 }
 0x216   :  { %vm5723_vm10 = vmor %vm155_vm3, %vm267_vm7  ;;  %vm613_vm7 = vcmp.eq.s32.totalorder %v4034_v43, %v5560_v8  ;;  %3213 = vmatprep.subr.bf16.mxu0 %v6021_v24 }
 0x217   :  { %v7256_v40 = vsel %vm5723_vm10, 4294967295, %v7255_v40  ;;  %vm500_vm9 = vmor %vm5669_vm15, %vm436_vm12  ;;  %vm614_vm10 = vcmp.eq.s32.totalorder %v4041_v47, %v5560_v8  ;;  %vm615_vm15 = vcmp.eq.s32.totalorder %v4049_v48, %v5560_v8  ;;  %v7263_v8 = vmov 0 }
 0x218   :  { %vm501_vm4 = vmor %vm5673_vm6, %vm437_vm14  ;;  %v5792_v22 = vpop.permute.xlu1 %1262 }
 0x219   :  { %vm502_vm2 = vmor %vm5681_vm1, %vm438_vm13  ;;  %vm441_vm13 = vcmp.eq.s32.totalorder %v4034_v43, %v3986_v28 }
 0x21a   :  { %vm503_vm3 = vmor %vm5687_vm5, %vm439_vm0  ;;  %vm440_vm5 = vcmp.eq.s32.totalorder %v4030_v42, %v3986_v28  ;;  %vm7265_vm0 = vnez %v7250_v59 }
 0x21b   :  { %vm5745_vm12 = vmor %vm500_vm9, %vm612_vm8  ;;  %vm789_vm8 = vcmp.eq.s32.totalorder %v4034_v43, %v732_v35 }
 0x21c   :  { %vm5751_vm6 = vmor %vm501_vm4, %vm613_vm7  ;;  %vm788_vm4 = vcmp.eq.s32.totalorder %v4030_v42, %v732_v35 }
 0x21d   :  { %vm5755_vm1 = vmor %vm502_vm2, %vm614_vm10  ;;  %vm442_vm10 = vcmp.eq.s32.totalorder %v4041_v47, %v3986_v28  ;;  %vm7268_vm2 = vnez %v7252_v32 }
 0x21e   :  { %v7262_v0 = vsel %vm5755_vm1, 4294967295, %v7261_v0  ;;  %vm5761_vm14 = vmor %vm503_vm3, %vm615_vm15  ;;  %vm616_vm3 = vcmp.eq.s32.totalorder %v4030_v42, %v5601_v45  ;;  %vm443_vm15 = vcmp.eq.s32.totalorder %v4049_v48, %v3986_v28  ;;  %v7274_v28 = vmov 0 }
 0x21f   :  { %v7264_v8 = vsel %vm5761_vm14, 4294967295, %v7263_v8  ;;  %vm5770_vm9 = vmor %vm7265_vm0, %vm440_vm5  ;;  %vm790_vm5 = vcmp.eq.s32.totalorder %v4041_v47, %v732_v35  ;;  %vm617_vm14 = vcmp.eq.s32.totalorder %v4034_v43, %v5601_v45 }
 0x220   :  { %v7267_v17 = vsel %vm5770_vm9, 4294967295, %v7266_v17  ;;  %vm5779_vm7 = vmor %vm7268_vm2, %vm441_vm13  ;;  %vm791_vm13 = vcmp.eq.s32.totalorder %v4049_v48, %v732_v35  ;;  %vm618_vm9 = vcmp.eq.s32.totalorder %v4041_v47, %v5601_v45 }
 0x221   :  { %v7270_v15 = vsel %vm5779_vm7, 4294967295, %v7269_v15  ;;  %vm506_vm0 = vmor %vm5717_vm11, %vm442_vm10  ;;  %vm7273_vm7 = vnez %v7256_v40  ;;  %vm619_vm10 = vcmp.eq.s32.totalorder %v4049_v48, %v5601_v45  ;;  %v5841_v45 = vpop.permute.xlu1 %97 }
 0x222   :  { %vm5797_vm2 = vmor %vm5745_vm12, %vm788_vm4  ;;  %vm7276_vm12 = vnez %v7267_v17 }
 0x223   :  { %v7272_v20 = vsel %vm5797_vm2, 4294967295, %v7271_v20  ;;  %vm507_vm1 = vmor %vm7273_vm7, %vm443_vm15  ;;  %vm7277_vm2 = vnez %v7262_v0  ;;  %vm7280_vm15 = vnez %v7270_v15  ;;  %v7326_v0 = vmov 0 }
 0x224   :  { %vm5807_vm11 = vmor %vm5751_vm6, %vm789_vm8  ;;  %vm792_vm8 = vcmp.eq.s32.totalorder %v4030_v42, %v5633_v2  ;;  %v7328_v15 = vmov 0 }
 0x225   :  { %v7275_v28 = vsel %vm5807_vm11, 4294967295, %v7274_v28  ;;  %vm680_vm4 = vmor %vm7276_vm12, %vm616_vm3  ;;  %vm7281_vm11 = vnez %v7264_v8  ;;  %v5881_v51 = vpop.permute.xlu1 %209 }
 0x226   :  { %vm5817_vm7 = vmor %vm7277_vm2, %vm790_vm5  ;;  %vm793_vm2 = vcmp.eq.s32.totalorder %v4034_v43, %v5633_v2 }
 0x227   :  { %v7279_v14 = vsel %vm5817_vm7, 4294967295, %v7278_v14  ;;  %vm681_vm6 = vmor %vm7280_vm15, %vm617_vm14  ;;  %vm794_vm7 = vcmp.eq.s32.totalorder %v4041_v47, %v5633_v2  ;;  %vm795_vm14 = vcmp.eq.s32.totalorder %v4049_v48, %v5633_v2 }
 0x228   :  { %vm5827_vm3 = vmor %vm7281_vm11, %vm791_vm13 }
 0x229   :  { %vm682_vm12 = vmor %vm506_vm0, %vm618_vm9  ;;  %vm964_vm9 = vcmp.eq.s32.totalorder %v4030_v42, %v5660_v25  ;;  %vm965_vm0 = vcmp.eq.s32.totalorder %v4034_v43, %v5660_v25  ;;  %v5936_v60 = vpop.permute.xlu1 %212 }
 0x22a   :  { %vm683_vm5 = vmor %vm507_vm1, %vm619_vm10  ;;  %vm966_vm10 = vcmp.eq.s32.totalorder %v4041_v47, %v5660_v25 }
 0x22b   :  { %vm5837_vm15 = vmor %vm680_vm4, %vm792_vm8  ;;  %vm967_vm4 = vcmp.eq.s32.totalorder %v4049_v48, %v5660_v25 }
 0x22c   :  { %vm5843_vm13 = vmor %vm681_vm6, %vm793_vm2  ;;  %vm7292_vm6 = vnez %v7272_v20  ;;  %vm1141_vm2 = vcmp.eq.s32.totalorder %v4034_v43, %v5713_v1 }
 0x22d   :  { %vm5849_vm1 = vmor %vm682_vm12, %vm794_vm7  ;;  %vm7295_vm7 = vnez %v7275_v28  ;;  %v5988_v9 = vpop.permute.xlu1 %388 }
 0x22e   :  { %vm5855_vm11 = vmor %vm683_vm5, %vm795_vm14  ;;  %vm7296_vm5 = vnez %v7279_v14  ;;  %v7447_v14 = vmov 0 }
 0x22f   :  { %v7291_v57 = vsel %vm5855_vm11, 4294967295, %v7290_v57  ;;  %vm5865_vm8 = vmor %vm7292_vm6, %vm964_vm9  ;;  %vm1143_vm11 = vcmp.eq.s32.totalorder %v4049_v48, %v5713_v1 }
 0x230   :  { %vm1029_vm12 = vmor %vm7295_vm7, %vm965_vm0  ;;  %vm1140_vm0 = vcmp.eq.s32.totalorder %v4030_v42, %v5713_v1 }
 0x231   :  { %vm5875_vm14 = vmor %vm7296_vm5, %vm966_vm10  ;;  %vm968_vm10 = vcmp.eq.s32.totalorder %v4030_v42, %v4016_v36  ;;  %vm969_vm5 = vcmp.eq.s32.totalorder %v4034_v43, %v4016_v36 }
 0x232   :  { %vm1031_vm9 = vmor %vm5827_vm3, %vm967_vm4  ;;  %vm1142_vm3 = vcmp.eq.s32.totalorder %v4041_v47, %v5713_v1 }
 0x233   :  { %vm5887_vm6 = vmor %vm1029_vm12, %vm1141_vm2  ;;  %vm970_vm12 = vcmp.eq.s32.totalorder %v4041_v47, %v4016_v36 }
 0x234   :  { %vm5893_vm7 = vmor %vm1031_vm9, %vm1143_vm11  ;;  %vm971_vm9 = vcmp.eq.s32.totalorder %v4049_v48, %v4016_v36 }
 0x235   :  { %vm5903_vm4 = vmor %vm5837_vm15, %vm968_vm10  ;;  %vm1144_vm15 = vcmp.eq.s32.totalorder %v4030_v42, %v5749_v50  ;;  %vm7313_vm10 = vnez %v7291_v57 }
 0x236   :  { %vm5911_vm11 = vmor %vm5865_vm8, %vm1140_vm0 }
 0x237   :  { %vm5917_vm2 = vmor %vm5843_vm13, %vm969_vm5  ;;  %vm1145_vm13 = vcmp.eq.s32.totalorder %v4034_v43, %v5749_v50 }
 0x238   :  { %vm5930_vm8 = vmor %vm5849_vm1, %vm970_vm12  ;;  %vm1146_vm1 = vcmp.eq.s32.totalorder %v4041_v47, %v5749_v50  ;;  %vm1147_vm12 = vcmp.eq.s32.totalorder %v4049_v48, %v5749_v50 }
 0x239   :  { %vm5940_vm0 = vmor %vm5875_vm14, %vm1142_vm3 }
 0x23a   :  { %vm5946_vm5 = vmor %vm7313_vm10, %vm971_vm9  ;;  %vm1319_vm10 = vcmp.eq.s32.totalorder %v4049_v48, %v3961_v21 }
 0x23b   :  { %vm5956_vm14 = vmor %vm5903_vm4, %vm1144_vm15  ;;  %vm1321_vm4 = vcmp.eq.s32.totalorder %v4034_v43, %v5792_v22  ;;  %vm1317_vm15 = vcmp.eq.s32.totalorder %v4034_v43, %v3961_v21 }
 0x23c   :  { %vm1209_vm3 = vmor %vm5917_vm2, %vm1145_vm13 }
 0x23d   :  { %vm5970_vm9 = vmor %vm5930_vm8, %vm1146_vm1  ;;  %vm1323_vm8 = vcmp.eq.s32.totalorder %v4049_v48, %v5792_v22 }
 0x23e   :  { %vm5980_vm2 = vmor %vm5946_vm5, %vm1147_vm12  ;;  %vm1320_vm5 = vcmp.eq.s32.totalorder %v4030_v42, %v5792_v22  ;;  %vm1316_vm12 = vcmp.eq.s32.totalorder %v4030_v42, %v3961_v21 }
 0x23f   :  { %vm1381_vm13 = vmor %vm5887_vm6, %vm1317_vm15  ;;  %vm1318_vm15 = vcmp.eq.s32.totalorder %v4041_v47, %v3961_v21  ;;  %v6027_v21 = vpop.permute.xlu1 %561 }
 0x240   :  { %vm1385_vm1 = vmor %vm1209_vm3, %vm1321_vm4  ;;  %v2866_v26 = vsel %vm1381_vm13, 1.0, %v7029_v7  ;;  %vm1322_vm4 = vcmp.eq.s32.totalorder %v4041_v47, %v5792_v22  ;;  %vm270_vm13 = vcmp.eq.s32.totalorder %v4041_v47, %v5881_v51 }
 0x241   :  { %v2870_v62 = vsel %vm1385_vm1, 1.0, %v7029_v7  ;;  %vm1383_vm6 = vmor %vm5893_vm7, %vm1319_vm10  ;;  %vm157_vm10 = vcmp.eq.s32.totalorder %v4034_v43, %v5841_v45  ;;  %vm271_vm1 = vcmp.eq.s32.totalorder %v4049_v48, %v5881_v51 }
 0x242   :  { %v1553_v25 = vpack.c.bf16 %v2870_v62, %v2866_v26  ;;  %vm1387_vm3 = vmor %vm5980_vm2, %vm1323_vm8  ;;  %v2868_v29 = vsel %vm1383_vm6, 1.0, %v7029_v7  ;;  %vm269_vm8 = vcmp.eq.s32.totalorder %v4034_v43, %v5881_v51  ;;  %vm272_vm6 = vcmp.eq.s32.totalorder %v4030_v42, %v5936_v60  ;;  %v7402_v62 = vld [vmem:[#allocation3_spill] sm:$0xff] }
 0x243   :  { %v2872_v11 = vsel %vm1387_vm3, 1.0, %v7029_v7  ;;  %vm1380_vm7 = vmor %vm5911_vm11, %vm1316_vm12  ;;  %v6039_v40 = vpop.permute.xlu1 %737  ;;  %v2983_v50 = vpop.f32.mrb[4].mxu0  ;;  %vm158_vm12 = vcmp.eq.s32.totalorder %v4041_v47, %v5841_v45 }
 0x244   :  { %1899 = vmatprep.mubr.bf16.mxu0 %v1553_v25  ;;  %v1555_v37 = vpack.c.bf16 %v2872_v11, %v2868_v29  ;;  %vm1384_vm2 = vmor %vm5956_vm14, %vm1320_vm5  ;;  %v2865_v34 = vsel %vm1380_vm7, 1.0, %v7029_v7  ;;  %v2984_v35 = vpop.f32.mrb[5].mxu0  ;;  %vm160_vm7 = vcmp.eq.s32.totalorder %v4030_v42, %v4305_v52  ;;  %v7364_v25 = vmov 0  ;;  %v6242_v29 = vpop.permute.xlu0 %746 }
 0x245   :  { %v2869_v53 = vsel %vm1384_vm2, 1.0, %v7029_v7  ;;  %vm1382_vm11 = vmor %vm5940_vm0, %vm1318_vm15  ;;  %vm268_vm0 = vcmp.eq.s32.totalorder %v4030_v42, %v5881_v51  ;;  %vm159_vm15 = vcmp.eq.s32.totalorder %v4049_v48, %v5841_v45  ;;  %v2985_v8 = vadd.f32 %v2984_v35, %v2983_v50  ;;  %v2986_v17 = vpop.f32.mrb[6].mxu0 }
 0x246   :  { %1996 = vmatprep.mubr.bf16.mxu1 %v1555_v37  ;;  %v1552_v59 = vpack.c.bf16 %v2869_v53, %v2865_v34  ;;  %vm1386_vm14 = vmor %vm5970_vm9, %vm1322_vm4  ;;  %v2867_v32 = vsel %vm1382_vm11, 1.0, %v7029_v7  ;;  %vm156_vm9 = vcmp.eq.s32.totalorder %v4030_v42, %v5841_v45  ;;  %vm273_vm4 = vcmp.eq.s32.totalorder %v4034_v43, %v5936_v60  ;;  %v2987_v20 = vpop.f32.mrb[7].mxu0 }
 0x247   :  { %v2871_v1 = vsel %vm1386_vm14, 1.0, %v7029_v7  ;;  %vm6051_vm5 = vmor %vm156_vm9, %vm268_vm0  ;;  %vm274_vm11 = vcmp.eq.s32.totalorder %v4041_v47, %v5936_v60  ;;  %vm161_vm14 = vcmp.eq.s32.totalorder %v4034_v43, %v4305_v52  ;;  %v6089_v22 = vpop.permute.xlu1 %740  ;;  %v2988_v28 = vadd.f32 %v2987_v20, %v2986_v17 }
 0x248   :  { %1900 = vmatmul.mubr.bf16.gmra.mrb[20].mxu0 %v1552_v59  ;;  %v1554_v39 = vpack.c.bf16 %v2871_v1, %v2867_v32  ;;  %vm6059_vm3 = vmor %vm157_vm10, %vm269_vm8  ;;  %vm275_vm8 = vcmp.eq.s32.totalorder %v4049_v48, %v5936_v60  ;;  %v1870_v33 = vadd.f32 %v2985_v8, %v5609_v58  ;;  %v1093_v32 = vpop.permute.xlu0 %1092  ;;  %v7404_v37 = vmov 0 }
 0x249   :  { %v7325_v27 = vsel %vm6059_vm3, 4294967295, %v7324_v27  ;;  %vm6069_vm2 = vmor %vm158_vm12, %vm270_vm13  ;;  %vm162_vm13 = vcmp.eq.s32.totalorder %v4041_v47, %v4305_v52  ;;  %vm163_vm12 = vcmp.eq.s32.totalorder %v4049_v48, %v4305_v52  ;;  %v1873_v18 = vadd.f32 %v2988_v28, %v5609_v58 }
 0x24a   :  { %1997 = vmatmul.mubr.bf16.gmra.mrb[20].mxu1 %v1554_v39  ;;  %v7327_v0 = vsel %vm6069_vm2, 4294967295, %v7326_v0  ;;  %vm6080_vm0 = vmor %vm159_vm15, %vm271_vm1  ;;  %vm448_vm1 = vcmp.eq.s32.totalorder %v4030_v42, %v5988_v9  ;;  %vm451_vm2 = vcmp.eq.s32.totalorder %v4049_v48, %v5988_v9  ;;  %v7406_v34 = vmov 0 }
 0x24b   :  { %v7329_v15 = vsel %vm6080_vm0, 4294967295, %v7328_v15  ;;  %vm336_vm9 = vmor %vm160_vm7, %vm272_vm6  ;;  %vm449_vm6 = vcmp.eq.s32.totalorder %v4034_v43, %v5988_v9  ;;  %vm450_vm0 = vcmp.eq.s32.totalorder %v4041_v47, %v5988_v9  ;;  %v6119_v41 = vpop.permute.xlu1 %916  ;;  %v7410_v59 = vmov 0 }
 0x24c   :  { %vm337_vm10 = vmor %vm161_vm14, %vm273_vm4  ;;  %vm444_vm14 = vcmp.eq.s32.totalorder %v4030_v42, %v3992_v30  ;;  %v7418_v39 = vmov 0  ;;  %v1096_v17 = vpop.permute.xlu0 %1095 }
 0x24d   :  { %vm338_vm15 = vmor %vm162_vm13, %vm274_vm11  ;;  %vm446_vm13 = vcmp.eq.s32.totalorder %v4041_v47, %v3992_v30 }
 0x24e   :  { %vm339_vm7 = vmor %vm163_vm12, %vm275_vm8  ;;  %v3047_v5 = vpop.f32.mrb[4].mxu1  ;;  %vm447_vm12 = vcmp.eq.s32.totalorder %v4049_v48, %v3992_v30 }
 0x24f   :  { %vm6106_vm3 = vmor %vm336_vm9, %vm448_vm1  ;;  %v3048_v45 = vpop.f32.mrb[5].mxu1  ;;  %v6162_v13 = vpop.permute.xlu1 %1089 }
 0x250   :  { %vm6111_vm4 = vmor %vm337_vm10, %vm449_vm6  ;;  %v3049_v57 = vadd.f32 %v3048_v45, %v3047_v5  ;;  %v3050_v54 = vpop.f32.mrb[6].mxu1  ;;  %vm7338_vm10 = vnez %v7325_v27  ;;  %v7377_v27 = vmov 0 }
 0x251   :  { %vm6115_vm11 = vmor %vm338_vm15, %vm450_vm0  ;;  %v3051_v6 = vpop.f32.mrb[7].mxu1  ;;  %vm445_vm0 = vcmp.eq.s32.totalorder %v4034_v43, %v3992_v30  ;;  %vm7339_vm15 = vnez %v7327_v0  ;;  %v7379_v0 = vmov 0 }
 0x252   :  { %vm6124_vm8 = vmor %vm339_vm7, %vm451_vm2  ;;  %v1967_v16 = vadd.f32 %v3049_v57, %v1870_v33  ;;  %v3052_v4 = vadd.f32 %v3051_v6, %v3050_v54  ;;  %vm620_vm2 = vcmp.eq.s32.totalorder %v4030_v42, %v6027_v21  ;;  %vm624_vm7 = vcmp.eq.s32.totalorder %v4030_v42, %v5358_v10 }
 0x253   :  { %vm508_vm9 = vmor %vm6051_vm5, %vm444_vm14  ;;  %vm621_vm5 = vcmp.eq.s32.totalorder %v4034_v43, %v6027_v21  ;;  %vm7342_vm14 = vnez %v7329_v15  ;;  %v6208_v31 = vpop.permute.xlu1 %1265  ;;  %v7390_v33 = vmov 0  ;;  %v7395_v54 = vmov 0 }
 0x254   :  { %vm509_vm1 = vmor %vm7338_vm10, %vm445_vm0  ;;  %v1970_v2 = vadd.f32 %v3052_v4, %v1873_v18  ;;  %vm625_vm10 = vcmp.eq.s32.totalorder %v4034_v43, %v5358_v10  ;;  %v2023_v60 = vmax.f32 %v1967_v16, 0.0  ;;  %v7439_v15 = vmov 0 }
 0x255   :  { %vm6142_vm6 = vmor %vm7339_vm15, %vm446_vm13  ;;  %vm626_vm15 = vcmp.eq.s32.totalorder %v4041_v47, %v5358_v10 }
 0x256   :  { %v7341_v19 = vsel %vm6142_vm6, 4294967295, %v7340_v19  ;;  %vm6152_vm0 = vmor %vm7342_vm14, %vm447_vm12  ;;  %v2024_v56 = vmax.f32 %v1970_v2, 0.0  ;;  %vm627_vm12 = vcmp.eq.s32.totalorder %v4049_v48, %v5358_v10 }
 0x257   :  { %vm6158_vm13 = vmor %vm508_vm9, %vm620_vm2  ;;  %vm622_vm2 = vcmp.eq.s32.totalorder %v4041_v47, %v6027_v21  ;;  %v6248_v11 = vpop.permute.xlu1 %1268 }
 0x258   :  { %vm6166_vm6 = vmor %vm509_vm1, %vm621_vm5  ;;  %v6178_v63 = vpack.c.bf16 %v2024_v56, %v2023_v60  ;;  %vm623_vm5 = vcmp.eq.s32.totalorder %v4049_v48, %v6027_v21 }
 0x259   :  { %vm6174_vm9 = vmor %vm6106_vm3, %vm624_vm7  ;;  %vm796_vm7 = vcmp.eq.s32.totalorder %v4030_v42, %v6039_v40 }
 0x25a   :  { %vm6184_vm1 = vmor %vm6111_vm4, %vm625_vm10  ;;  %vm7357_vm4 = vnez %v7341_v19 }
 0x25b   :  { %v7352_v55 = vsel %vm6184_vm1, 4294967295, %v7351_v55  ;;  %vm6192_vm3 = vmor %vm6115_vm11, %vm626_vm15  ;;  %vm797_vm1 = vcmp.eq.s32.totalorder %v4034_v43, %v6039_v40  ;;  %vm798_vm15 = vcmp.eq.s32.totalorder %v4041_v47, %v6039_v40 }
 0x25c   :  { %vm6200_vm14 = vmor %vm6124_vm8, %vm627_vm12  ;;  %vm799_vm8 = vcmp.eq.s32.totalorder %v4049_v48, %v6039_v40  ;;  %v6286_v40 = vpop.permute.xlu1 %106 }
 0x25d   :  { %vm686_vm10 = vmor %vm7357_vm4, %vm622_vm2  ;;  %vm801_vm4 = vcmp.eq.s32.totalorder %v4034_v43, %v6089_v22 }
 0x25e   :  { %vm687_vm11 = vmor %vm6152_vm0, %vm623_vm5  ;;  %vm800_vm0 = vcmp.eq.s32.totalorder %v4030_v42, %v6089_v22 }
 0x25f   :  { %vm6218_vm12 = vmor %vm6158_vm13, %vm796_vm7 }
 0x260   :  { %vm6224_vm2 = vmor %vm6166_vm6, %vm797_vm1  ;;  %vm802_vm6 = vcmp.eq.s32.totalorder %v4041_v47, %v6089_v22  ;;  %vm803_vm1 = vcmp.eq.s32.totalorder %v4049_v48, %v6089_v22  ;;  %v6335_v22 = vpop.permute.xlu1 %215 }
 0x261   :  { %vm6230_vm5 = vmor %vm686_vm10, %vm798_vm15  ;;  %vm7366_vm10 = vnez %v7352_v55 }
 0x262   :  { %vm6236_vm13 = vmor %vm687_vm11, %vm799_vm8  ;;  %vm976_vm11 = vcmp.eq.s32.totalorder %v4030_v42, %v6119_v41 }
 0x263   :  { %v7365_v25 = vsel %vm6236_vm13, 4294967295, %v7364_v25  ;;  %vm864_vm7 = vmor %vm6174_vm9, %vm800_vm0  ;;  %vm977_vm13 = vcmp.eq.s32.totalorder %v4034_v43, %v6119_v41 }
 0x264   :  { %vm865_vm15 = vmor %vm7366_vm10, %vm801_vm4  ;;  %vm978_vm10 = vcmp.eq.s32.totalorder %v4041_v47, %v6119_v41  ;;  %v6384_v6 = vpop.permute.xlu1 %391 }
 0x265   :  { %vm6256_vm8 = vmor %vm6192_vm3, %vm802_vm6  ;;  %vm972_vm3 = vcmp.eq.s32.totalorder %v4030_v42, %v4023_v38 }
 0x266   :  { %vm6264_vm9 = vmor %vm6200_vm14, %vm803_vm1  ;;  %vm973_vm14 = vcmp.eq.s32.totalorder %v4034_v43, %v4023_v38  ;;  %vm979_vm1 = vcmp.eq.s32.totalorder %v4049_v48, %v6119_v41 }
 0x267   :  { %vm6268_vm0 = vmor %vm864_vm7, %vm976_vm11  ;;  %vm1153_vm11 = vcmp.eq.s32.totalorder %v4034_v43, %v1093_v32 }
 0x268   :  { %vm6274_vm4 = vmor %vm865_vm15, %vm977_vm13  ;;  %vm974_vm13 = vcmp.eq.s32.totalorder %v4041_v47, %v4023_v38  ;;  %v395_v10 = vpop.permute.xlu1 %394 }
 0x269   :  { %vm6282_vm6 = vmor %vm6218_vm12, %vm972_vm3  ;;  %vm975_vm12 = vcmp.eq.s32.totalorder %v4049_v48, %v4023_v38 }
 0x26a   :  { %vm6294_vm7 = vmor %vm6224_vm2, %vm973_vm14  ;;  %vm7381_vm2 = vnez %v7365_v25 }
 0x26b   :  { %v7378_v27 = vsel %vm6294_vm7, 4294967295, %v7377_v27  ;;  %vm6304_vm15 = vmor %vm6230_vm5, %vm974_vm13  ;;  %vm1155_vm7 = vcmp.eq.s32.totalorder %v4049_v48, %v1093_v32  ;;  %vm1152_vm13 = vcmp.eq.s32.totalorder %v4030_v42, %v1093_v32 }
 0x26c   :  { %v7380_v0 = vsel %vm6304_vm15, 4294967295, %v7379_v0  ;;  %vm6311_vm3 = vmor %vm7381_vm2, %vm975_vm12  ;;  %vm1148_vm15 = vcmp.eq.s32.totalorder %v4030_v42, %v6162_v13  ;;  %v571_v25 = vpop.permute.xlu1 %570 }
 0x26d   :  { %v2989_v21 = vpop.f32.mrb[8].mxu0  ;;  %vm1043_vm14 = vmor %vm6264_vm9, %vm979_vm1  ;;  %vm1149_vm9 = vcmp.eq.s32.totalorder %v4034_v43, %v6162_v13 }
 0x26e   :  { %v2990_v1 = vpop.f32.mrb[9].mxu0  ;;  %vm6320_vm5 = vmor %vm6256_vm8, %vm978_vm10  ;;  %vm1154_vm8 = vcmp.eq.s32.totalorder %v4041_v47, %v1093_v32  ;;  %v3493_v32 = vld [vmem:[%s6912_s6 + $0x8] sm:$0xff]  }
 0x26f   :  { %v2991_v3 = vadd.f32 %v2990_v1, %v2989_v21  ;;  %v2992_v50 = vpop.f32.mrb[10].mxu0  ;;  %vm6329_vm12 = vmor %vm6274_vm4, %vm1153_vm11  ;;  %vm1150_vm4 = vcmp.eq.s32.totalorder %v4041_v47, %v6162_v13  ;;  %vm1151_vm11 = vcmp.eq.s32.totalorder %v4049_v48, %v6162_v13  ;;  %v3494_v1 = vld [vmem:[%s6912_s6 + $0x10] sm:$0xff]  }
 0x270   :  { %v2993_v35 = vpop.f32.mrb[11].mxu0  ;;  %vm6339_vm1 = vmor %vm1043_vm14, %vm1155_vm7  ;;  %vm7394_vm7 = vnez %v7378_v27  ;;  %v744_v21 = vpop.permute.xlu1 %743  ;;  %v7424_v27 = vmov 0 }
 0x271   :  { %v2994_v8 = vadd.f32 %v2993_v35, %v2992_v50  ;;  %v1878_v28 = vadd.f32 %v2991_v3, %v5609_v58  ;;  %vm6347_vm10 = vmor %vm6268_vm0, %vm1152_vm13  ;;  %vm1325_vm0 = vcmp.eq.s32.totalorder %v4034_v43, %v6208_v31  ;;  %v7422_v50 = vmov 0 }
 0x272   :  { %v7391_v33 = vsel %vm6347_vm10, 4294967295, %v7390_v33  ;;  %vm6355_vm2 = vmor %vm6282_vm6, %vm1148_vm15  ;;  %vm7397_vm6 = vnez %v7380_v0  ;;  %vm1329_vm10 = vcmp.eq.s32.totalorder %v4034_v43, %v6248_v11  ;;  %v7426_v35 = vmov 0 }
 0x273   :  { %v1881_v41 = vadd.f32 %v2994_v8, %v5609_v58  ;;  %vm1213_vm14 = vmor %vm7394_vm7, %vm1149_vm9  ;;  %v7432_v8 = vmov 0 }
 0x274   :  { %vm6366_vm13 = vmor %vm6320_vm5, %vm1154_vm8  ;;  %vm1327_vm5 = vcmp.eq.s32.totalorder %v4049_v48, %v6208_v31  ;;  %vm1331_vm8 = vcmp.eq.s32.totalorder %v4049_v48, %v6248_v11  ;;  %v6503_v3 = vpop.permute.xlu1 %919 }
 0x275   :  { %v3053_v20 = vpop.f32.mrb[8].mxu1  ;;  %v7396_v54 = vsel %vm6366_vm13, 4294967295, %v7395_v54  ;;  %vm6372_vm15 = vmor %vm7397_vm6, %vm1150_vm4  ;;  %vm1324_vm4 = vcmp.eq.s32.totalorder %v4030_v42, %v6208_v31  ;;  %vm1328_vm6 = vcmp.eq.s32.totalorder %v4030_v42, %v6248_v11 }
 0x276   :  { %v3054_v5 = vpop.f32.mrb[9].mxu1  ;;  %vm1215_vm9 = vmor %vm6311_vm3, %vm1151_vm11  ;;  %vm1326_vm11 = vcmp.eq.s32.totalorder %v4041_v47, %v6208_v31 }
 0x277   :  { %v3055_v45 = vadd.f32 %v3054_v5, %v3053_v20  ;;  %v3056_v61 = vpop.f32.mrb[10].mxu1  ;;  %vm1389_vm7 = vmor %vm1213_vm14, %vm1325_vm0  ;;  %vm1330_vm0 = vcmp.eq.s32.totalorder %v4041_v47, %v6248_v11  ;;  %v7403_v11 = vld [vmem:[#allocation2_spill] sm:$0xff]  ;;  %v7442_v20 = vmov 0  ;;  %v7449_v5 = vmov 0 }
 0x278   :  { %v3057_v57 = vpop.f32.mrb[11].mxu1  ;;  %vm1393_vm13 = vmor %vm6329_vm12, %vm1329_vm10  ;;  %v2874_v4 = vsel %vm1389_vm7, 1.0, %v7029_v7  ;;  %vm7400_vm10 = vnez %v7391_v33  ;;  %vm280_vm7 = vcmp.eq.s32.totalorder %v4030_v42, %v7402_v62  ;;  %v7451_v33 = vmov 0 }
 0x279   :  { %v1975_v58 = vadd.f32 %v3055_v45, %v1878_v28  ;;  %v3058_v51 = vadd.f32 %v3057_v57, %v3056_v61  ;;  %v2878_v19 = vsel %vm1393_vm13, 1.0, %v7029_v7  ;;  %vm1391_vm3 = vmor %vm1215_vm9, %vm1327_vm5  ;;  %vm168_vm5 = vcmp.eq.s32.totalorder %v4030_v42, %v6286_v40 }
 0x27a   :  { %v1557_v30 = vpack.c.bf16 %v2878_v19, %v2874_v4  ;;  %vm1395_vm14 = vmor %vm6339_vm1, %vm1331_vm8  ;;  %v2876_v13 = vsel %vm1391_vm3, 1.0, %v7029_v7  ;;  %vm169_vm8 = vcmp.eq.s32.totalorder %v4034_v43, %v6286_v40  ;;  %vm281_vm3 = vcmp.eq.s32.totalorder %v4034_v43, %v7402_v62 }
 0x27b   :  { %v1978_v16 = vadd.f32 %v3058_v51, %v1881_v41  ;;  %v2025_v2 = vmax.f32 %v1975_v58, 0.0  ;;  %v2880_v60 = vsel %vm1395_vm14, 1.0, %v7029_v7  ;;  %vm1388_vm12 = vmor %vm6355_vm2, %vm1324_vm4  ;;  %vm7401_vm2 = vnez %v7396_v54 }
 0x27c   :  { %1907 = vmatprep.mubr.bf16.mxu0 %v1557_v30  ;;  %v1559_v36 = vpack.c.bf16 %v2880_v60, %v2876_v13  ;;  %vm1392_vm1 = vmor %vm7400_vm10, %vm1328_vm6  ;;  %v2873_v23 = vsel %vm1388_vm12, 1.0, %v7029_v7  ;;  %vm277_vm4 = vcmp.eq.s32.totalorder %v4034_v43, %v6335_v22  ;;  %vm164_vm6 = vcmp.eq.s32.totalorder %v4030_v42, %v7403_v11 }
 0x27d   :  { %v2026_v46 = vmax.f32 %v1978_v16, 0.0  ;;  %v2877_v55 = vsel %vm1392_vm1, 1.0, %v7029_v7  ;;  %vm1390_vm13 = vmor %vm6372_vm15, %vm1326_vm11  ;;  %vm276_vm15 = vcmp.eq.s32.totalorder %v4030_v42, %v6335_v22  ;;  %vm278_vm14 = vcmp.eq.s32.totalorder %v4041_v47, %v6335_v22 }
 0x27e   :  { %2004 = vmatprep.mubr.bf16.mxu1 %v1559_v36  ;;  %v1556_v12 = vpack.c.bf16 %v2877_v55, %v2873_v23  ;;  %vm1394_vm9 = vmor %vm7401_vm2, %vm1330_vm0  ;;  %v2875_v31 = vsel %vm1390_vm13, 1.0, %v7029_v7  ;;  %vm165_vm0 = vcmp.eq.s32.totalorder %v4034_v43, %v7403_v11  ;;  %vm279_vm10 = vcmp.eq.s32.totalorder %v4049_v48, %v6335_v22  ;;  %v1275_v22 = vpop.permute.xlu0 %1274 }
 0x27f   :  { %v6404_v56 = vpack.c.bf16 %v2026_v46, %v2025_v2  ;;  %v2879_v9 = vsel %vm1394_vm9, 1.0, %v7029_v7  ;;  %vm6433_vm11 = vmor %vm168_vm5, %vm280_vm7  ;;  %vm166_vm13 = vcmp.eq.s32.totalorder %v4041_v47, %v7403_v11  ;;  %vm452_vm9 = vcmp.eq.s32.totalorder %v4030_v42, %v6384_v6 }
 0x280   :  { %1908 = vmatmul.mubr.bf16.gmra.mrb[24].mxu0 %v1556_v12  ;;  %v1558_v26 = vpack.c.bf16 %v2879_v9, %v2875_v31  ;;  %v7405_v37 = vsel %vm6433_vm11, 4294967295, %v7404_v37  ;;  %vm6441_vm12 = vmor %vm169_vm8, %vm281_vm3  ;;  %vm167_vm5 = vcmp.eq.s32.totalorder %v4049_v48, %v7403_v11  ;;  %vm170_vm8 = vcmp.eq.s32.totalorder %v4041_v47, %v6286_v40 }
 0x281   :  { %v7407_v34 = vsel %vm6441_vm12, 4294967295, %v7406_v34  ;;  %vm340_vm1 = vmor %vm164_vm6, %vm276_vm15  ;;  %vm453_vm15 = vcmp.eq.s32.totalorder %v4034_v43, %v6384_v6  ;;  %vm171_vm6 = vcmp.eq.s32.totalorder %v4049_v48, %v6286_v40  ;;  %vm454_vm3 = vcmp.eq.s32.totalorder %v4041_v47, %v6384_v6 }
 0x282   :  { %2005 = vmatmul.mubr.bf16.gmra.mrb[24].mxu1 %v1558_v26  ;;  %vm6449_vm2 = vmor %vm165_vm0, %vm277_vm4  ;;  %vm282_vm0 = vcmp.eq.s32.totalorder %v4041_v47, %v7402_v62  ;;  %vm455_vm12 = vcmp.eq.s32.totalorder %v4049_v48, %v6384_v6  ;;  %v7420_v40 = vmov 0  ;;  %v7445_v28 = vmov 0 }
 0x283   :  { %vm342_vm7 = vmor %vm166_vm13, %vm278_vm14  ;;  %vm283_vm14 = vcmp.eq.s32.totalorder %v4049_v48, %v7402_v62 }
 0x284   :  { %vm343_vm4 = vmor %vm167_vm5, %vm279_vm10  ;;  %vm456_vm5 = vcmp.eq.s32.totalorder %v4030_v42, %v395_v10 }
 0x285   :  { %vm516_vm11 = vmor %vm340_vm1, %vm452_vm9 }
 0x286   :  { %vm6471_vm13 = vmor %vm170_vm8, %vm282_vm0  ;;  %vm457_vm0 = vcmp.eq.s32.totalorder %v4034_v43, %v395_v10 }
 0x287   :  { %v7411_v59 = vsel %vm6471_vm13, 4294967295, %v7410_v59  ;;  %vm517_vm10 = vmor %vm6449_vm2, %vm453_vm15  ;;  %vm7414_vm13 = vnez %v7405_v37  ;;  %vm628_vm15 = vcmp.eq.s32.totalorder %v4030_v42, %v5402_v49 }
 0x288   :  { %vm6478_vm1 = vmor %vm171_vm6, %vm283_vm14  ;;  %vm7417_vm6 = vnez %v7407_v34 }
 0x289   :  { %vm518_vm9 = vmor %vm342_vm7, %vm454_vm3  ;;  %vm629_vm7 = vcmp.eq.s32.totalorder %v4034_v43, %v5402_v49 }
 0x28a   :  { %vm519_vm8 = vmor %vm343_vm4, %vm455_vm12  ;;  %vm630_vm12 = vcmp.eq.s32.totalorder %v4041_v47, %v5402_v49  ;;  %vm458_vm4 = vcmp.eq.s32.totalorder %v4041_v47, %v395_v10 }
 0x28b   :  { %vm6485_vm2 = vmor %vm7414_vm13, %vm456_vm5  ;;  %vm631_vm5 = vcmp.eq.s32.totalorder %v4049_v48, %v5402_v49  ;;  %v923_v49 = vpop.permute.xlu1 %922 }
 0x28c   :  { %vm6493_vm14 = vmor %vm7417_vm6, %vm457_vm0  ;;  %vm459_vm0 = vcmp.eq.s32.totalorder %v4049_v48, %v395_v10 }
 0x28d   :  { %v7419_v39 = vsel %vm6493_vm14, 4294967295, %v7418_v39  ;;  %vm6499_vm3 = vmor %vm516_vm11, %vm628_vm15  ;;  %vm632_vm15 = vcmp.eq.s32.totalorder %v4030_v42, %v571_v25  ;;  %vm634_vm14 = vcmp.eq.s32.totalorder %v4041_v47, %v571_v25 }
 0x28e   :  { %v7421_v40 = vsel %vm6499_vm3, 4294967295, %v7420_v40  ;;  %vm6508_vm13 = vmor %vm517_vm10, %vm629_vm7  ;;  %vm7428_vm10 = vnez %v7411_v59 }
 0x28f   :  { %v7423_v50 = vsel %vm6508_vm13, 4294967295, %v7422_v50  ;;  %vm6515_vm11 = vmor %vm518_vm9, %vm630_vm12  ;;  %vm633_vm13 = vcmp.eq.s32.totalorder %v4034_v43, %v571_v25  ;;  %vm635_vm9 = vcmp.eq.s32.totalorder %v4049_v48, %v571_v25  ;;  %v1099_v38 = vpop.permute.xlu1 %1098 }
 0x290   :  { %v7425_v27 = vsel %vm6515_vm11, 4294967295, %v7424_v27  ;;  %vm6520_vm6 = vmor %vm519_vm8, %vm631_vm5  ;;  %vm7429_vm8 = vnez %v7419_v39  ;;  %vm809_vm11 = vcmp.eq.s32.totalorder %v4034_v43, %v6242_v29 }
 0x291   :  { %v7427_v35 = vsel %vm6520_vm6, 4294967295, %v7426_v35  ;;  %vm522_vm7 = vmor %vm7428_vm10, %vm458_vm4  ;;  %vm808_vm4 = vcmp.eq.s32.totalorder %v4030_v42, %v6242_v29 }
 0x292   :  { %vm523_vm3 = vmor %vm6478_vm1, %vm459_vm0  ;;  %vm810_vm0 = vcmp.eq.s32.totalorder %v4041_v47, %v6242_v29 }
 0x293   :  { %vm696_vm12 = vmor %vm6485_vm2, %vm632_vm15  ;;  %vm984_vm2 = vcmp.eq.s32.totalorder %v4030_v42, %v923_v49  ;;  %v1272_v45 = vpop.permute.xlu1 %1271 }
 0x294   :  { %vm697_vm5 = vmor %vm7429_vm8, %vm633_vm13  ;;  %vm985_vm13 = vcmp.eq.s32.totalorder %v4034_v43, %v923_v49 }
 0x295   :  { %vm698_vm6 = vmor %vm522_vm7, %vm634_vm14  ;;  %vm811_vm14 = vcmp.eq.s32.totalorder %v4049_v48, %v6242_v29  ;;  %v7435_v29 = vmov 0 }
 0x296   :  { %vm699_vm10 = vmor %vm523_vm3, %vm635_vm9  ;;  %vm804_vm3 = vcmp.eq.s32.totalorder %v4030_v42, %v744_v21  ;;  %vm805_vm9 = vcmp.eq.s32.totalorder %v4034_v43, %v744_v21 }
 0x297   :  { %vm6539_vm1 = vmor %vm696_vm12, %vm808_vm4  ;;  %vm986_vm12 = vcmp.eq.s32.totalorder %v4041_v47, %v923_v49 }
 0x298   :  { %vm6546_vm15 = vmor %vm697_vm5, %vm809_vm11  ;;  %vm806_vm11 = vcmp.eq.s32.totalorder %v4041_v47, %v744_v21  ;;  %vm987_vm5 = vcmp.eq.s32.totalorder %v4049_v48, %v923_v49 }
 0x299   :  { %v7433_v8 = vsel %vm6546_vm15, 4294967295, %v7432_v8  ;;  %vm874_vm7 = vmor %vm698_vm6, %vm810_vm0  ;;  %vm807_vm15 = vcmp.eq.s32.totalorder %v4049_v48, %v744_v21  ;;  %vm7434_vm0 = vnez %v7421_v40 }
 0x29a   :  { %vm875_vm8 = vmor %vm699_vm10, %vm811_vm14  ;;  %vm1160_vm10 = vcmp.eq.s32.totalorder %v4030_v42, %v1099_v38  ;;  %vm7437_vm14 = vnez %v7433_v8 }
 0x29b   :  { %vm1048_vm4 = vmor %vm6539_vm1, %vm984_vm2  ;;  %vm7438_vm2 = vnez %v7423_v50 }
 0x29c   :  { %vm6563_vm6 = vmor %vm7434_vm0, %vm804_vm3  ;;  %vm1161_vm3 = vcmp.eq.s32.totalorder %v4034_v43, %v1099_v38 }
 0x29d   :  { %v7436_v29 = vsel %vm6563_vm6, 4294967295, %v7435_v29  ;;  %vm1049_vm1 = vmor %vm7437_vm14, %vm985_vm13  ;;  %vm7441_vm13 = vnez %v7425_v27 }
 0x29e   :  { %vm6572_vm0 = vmor %vm7438_vm2, %vm805_vm9  ;;  %vm1162_vm2 = vcmp.eq.s32.totalorder %v4041_v47, %v1099_v38 }
 0x29f   :  { %v7440_v15 = vsel %vm6572_vm0, 4294967295, %v7439_v15  ;;  %vm1050_vm6 = vmor %vm874_vm7, %vm986_vm12  ;;  %vm7444_vm0 = vnez %v7427_v35  ;;  %vm1163_vm12 = vcmp.eq.s32.totalorder %v4049_v48, %v1099_v38 }
 0x2a0   :  { %vm6579_vm14 = vmor %vm7441_vm13, %vm806_vm11 }
 0x2a1   :  { %v7443_v20 = vsel %vm6579_vm14, 4294967295, %v7442_v20  ;;  %vm1051_vm9 = vmor %vm875_vm8, %vm987_vm5  ;;  %vm1336_vm14 = vcmp.eq.s32.totalorder %v4030_v42, %v1275_v22  ;;  %vm1337_vm8 = vcmp.eq.s32.totalorder %v4034_v43, %v1275_v22 }
 0x2a2   :  { %vm6586_vm7 = vmor %vm7444_vm0, %vm807_vm15  ;;  %vm980_vm0 = vcmp.eq.s32.totalorder %v4030_v42, %v6503_v3 }
 0x2a3   :  { %v7446_v28 = vsel %vm6586_vm7, 4294967295, %v7445_v28  ;;  %vm1224_vm11 = vmor %vm1048_vm4, %vm1160_vm10  ;;  %vm1338_vm7 = vcmp.eq.s32.totalorder %v4041_v47, %v1275_v22  ;;  %vm981_vm4 = vcmp.eq.s32.totalorder %v4034_v43, %v6503_v3  ;;  %vm1339_vm10 = vcmp.eq.s32.totalorder %v4049_v48, %v1275_v22 }
 0x2a4   :  { %vm1225_vm13 = vmor %vm1049_vm1, %vm1161_vm3 }
 0x2a5   :  { %vm1226_vm5 = vmor %vm1050_vm6, %vm1162_vm2  ;;  %vm982_vm6 = vcmp.eq.s32.totalorder %v4041_v47, %v6503_v3  ;;  %vm983_vm2 = vcmp.eq.s32.totalorder %v4049_v48, %v6503_v3 }
 0x2a6   :  { %vm1227_vm15 = vmor %vm1051_vm9, %vm1163_vm12  ;;  %vm7453_vm12 = vnez %v7436_v29 }
 0x2a7   :  { %vm6599_vm1 = vmor %vm1224_vm11, %vm1336_vm14  ;;  %vm1156_vm11 = vcmp.eq.s32.totalorder %v4030_v42, %v1096_v17 }
 0x2a8   :  { %v7448_v14 = vsel %vm6599_vm1, 4294967295, %v7447_v14  ;;  %vm6605_vm3 = vmor %vm1225_vm13, %vm1337_vm8  ;;  %vm7456_vm13 = vnez %v7440_v15 }
 0x2a9   :  { %v7450_v5 = vsel %vm6605_vm3, 4294967295, %v7449_v5  ;;  %vm6611_vm9 = vmor %vm1226_vm5, %vm1338_vm7  ;;  %vm1157_vm3 = vcmp.eq.s32.totalorder %v4034_v43, %v1096_v17  ;;  %vm7457_vm5 = vnez %v7443_v20 }
 0x2aa   :  { %v7452_v33 = vsel %vm6611_vm9, 4294967295, %v7451_v33  ;;  %vm1044_vm14 = vmor %vm7453_vm12, %vm980_vm0  ;;  %vm1158_vm9 = vcmp.eq.s32.totalorder %v4041_v47, %v1096_v17  ;;  %vm7458_vm0 = vnez %v7446_v28  ;;  %v2995_v61 = vpop.f32.mrb[12].mxu0  ;;  %v3495_v28 = vld [vmem:[%s6913_s5] sm:$0xff]  }
 0x2ab   :  { %vm6618_vm1 = vmor %vm1227_vm15, %vm1339_vm10  ;;  %vm1159_vm15 = vcmp.eq.s32.totalorder %v4049_v48, %v1096_v17  ;;  %v2996_v57 = vpop.f32.mrb[13].mxu0  ;;  %3185 = vmatprep.subr.bf16.mxu1 %v3495_v28 }
 0x2ac   :  { %vm1045_vm8 = vmor %vm7456_vm13, %vm981_vm4  ;;  %v2997_v18 = vadd.f32 %v2996_v57, %v2995_v61  ;;  %v2998_v58 = vpop.f32.mrb[14].mxu0  ;;  %v2888_v11 = vsel %vm6618_vm1, 1.0, %v7029_v7  ;;  %vm2270_vm1 = vcmask 785408  }
 0x2ad   :  { %vm1046_vm7 = vmor %vm7457_vm5, %vm982_vm6  ;;  %vm1332_vm6 = vcmp.eq.s32.totalorder %v4030_v42, %v1272_v45  ;;  %v3059_v6 = vpop.f32.mrb[12].mxu1  ;;  %v2999_v16 = vpop.f32.mrb[15].mxu0  ;;  %v6653_v42 = vld [vmem:[%s6910_s2] ss:$0 sm:$0xff]  ;;  %vm7467_vm5 = vnez %v7450_v5 }
 0x2ae   :  { %vm1047_vm12 = vmor %vm7458_vm0, %vm983_vm2  ;;  %vm1333_vm2 = vcmp.eq.s32.totalorder %v4034_v43, %v1272_v45  ;;  %v1886_v19 = vadd.f32 %v6653_v42, %v2997_v18  ;;  %v3060_v2 = vpop.f32.mrb[13].mxu1  ;;  %v3000_v46 = vadd.f32 %v2999_v16, %v2998_v58  ;;  %v2886_v13 = vsel %vm7467_vm5, 1.0, %v7029_v7 }
 0x2af   :  { %vm6631_vm10 = vmor %vm1044_vm14, %vm1156_vm11  ;;  %v3061_v43 = vadd.f32 %v3060_v2, %v3059_v6  ;;  %v3062_v30 = vpop.f32.mrb[14].mxu1 }
 0x2b0   :  { %vm6635_vm4 = vmor %vm1045_vm8, %vm1157_vm3  ;;  %vm1334_vm3 = vcmp.eq.s32.totalorder %v4041_v47, %v1272_v45  ;;  %v1889_v23 = vadd.f32 %v6653_v42, %v3000_v46  ;;  %v3063_v55 = vpop.f32.mrb[15].mxu1 }
 0x2b1   :  { %vm6640_vm13 = vmor %vm1046_vm7, %vm1158_vm9  ;;  %vm1335_vm9 = vcmp.eq.s32.totalorder %v4049_v48, %v1272_v45  ;;  %vm7468_vm7 = vnez %v7448_v14  ;;  %v1983_v31 = vadd.f32 %v3061_v43, %v1886_v19  ;;  %v3064_v9 = vadd.f32 %v3063_v55, %v3062_v30  ;;  %v3496_v30 = vld [vmem:[%s6913_s5 + $0x8] sm:$0xff]  }
 0x2b2   :  { %vm6645_vm14 = vmor %vm1047_vm12, %vm1159_vm15  ;;  %v2885_v36 = vsel %vm7468_vm7, 1.0, %v7029_v7  ;;  %vm7469_vm15 = vnez %v7452_v33 }
 0x2b3   :  { %vm1396_vm11 = vmor %vm6631_vm10, %vm1332_vm6  ;;  %v2887_v47 = vsel %vm7469_vm15, 1.0, %v7029_v7  ;;  %vm2076_vm10 = vcmask 392192   ;;  %v1986_v34 = vadd.f32 %v3064_v9, %v1889_v23  ;;  %v2027_v53 = vmax.f32 %v1983_v31, 0.0  ;;  %v3500_v23 = vld [vmem:[%s6913_s5 + $0x28] sm:$0xff]  }
 0x2b4   :  { %vm1397_vm8 = vmor %vm6635_vm4, %vm1333_vm2  ;;  %v2881_v60 = vsel %vm1396_vm11, 1.0, %v7029_v7  ;;  %vm3581_vm4 = vmmov 0   ;;  %vm2746_vm6 = vcmask 195584  }
 0x2b5   :  { %vm1398_vm0 = vmor %vm6640_vm13, %vm1334_vm3  ;;  %v2882_v10 = vsel %vm1397_vm8, 1.0, %v7029_v7  ;;  %v1560_v12 = vpack.c.bf16 %v2885_v36, %v2881_v60  ;;  %v2028_v21 = vmax.f32 %v1986_v34, 0.0  ;;  %v3498_v60 = vld [vmem:[%s6913_s5 + $0x18] sm:$0xff]   ;;  %v3499_v36 = vld [vmem:[%s6913_s5 + $0x20] sm:$0xff]  }
 0x2b6   :  { %vm1399_vm12 = vmor %vm6645_vm14, %vm1335_vm9  ;;  %v1561_v26 = vpack.c.bf16 %v2886_v13, %v2882_v10  ;;  %v2883_v62 = vsel %vm1398_vm0, 1.0, %v7029_v7  ;;  %v3497_v13 = vld [vmem:[%s6913_s5 + $0x10] sm:$0xff]  }
 0x2b7   :  { %v2884_v25 = vsel %vm1399_vm12, 1.0, %v7029_v7  ;;  %v1562_v37 = vpack.c.bf16 %v2887_v47, %v2883_v62  ;;  %v2040_v59 = vpack.c.bf16 %v2028_v21, %v2027_v53 }
 0x2b8   :  { %1915 = vmatprep.mubr.bf16.mxu0 %v1561_v26  ;;  %v1563_v48 = vpack.c.bf16 %v2888_v11, %v2884_v25 }
 0x2b9   :  { %1916 = vmatmul.mubr.bf16.gmra.mrb[28].mxu0 %v1560_v12 }
 0x2ba   :  { %2012 = vmatprep.mubr.bf16.mxu1 %v1563_v48  ;;  %3169 = vmatprep.mubr.msk.bf16.mxu0 %vm2076_vm10, %v5679_v44 }
 0x2bb   :  { %2013 = vmatmul.mubr.bf16.gmra.mrb[28].mxu1 %v1562_v37 }
 0x2c1   :  { %3170 = vmatmul.mubr.msk.bf16.vlgmr.msra.gmra.mrb[32].mxu0 %vm2076_vm10, %v6178_v63 }
 0x2c2   :  { %3173 = vmatprep.mubr.msk.bf16.mxu0 %vm2076_vm10, %v6404_v56  ;;  %3214 = vmatpush3.bf16.msra.mxu0 %v6021_v24 }
 0x2c3   :  { %3215 = vmatprep.subr.bf16.mxu0 %v3493_v32 }
 0x2c6   :  { %3216 = vmatpush3.bf16.msra.mxu0 %v3493_v32 }
 0x2c7   :  { %3217 = vmatprep.subr.bf16.mxu0 %v3494_v1 }
 0x2c9   :  { %3174 = vmatmul.mubr.msk.bf16.gmra.mrb[36].mxu0 %vm2076_vm10, %v2040_v59 }
 0x2ca   :  { %3219 = vmatprep.mubr.msk.bf16.mxu0 %vm2076_vm10, %v5679_v44  ;;  %3218 = vmatpush3.bf16.msra.mxu0 %v3494_v1 }
 0x2d1   :  { %3220 = vmatmul.mubr.msk.bf16.vlgmr.msra.gmra.mrb[40].mxu0 %vm2076_vm10, %v6178_v63 }
 0x2d2   :  { %3223 = vmatprep.mubr.msk.bf16.mxu0 %vm2076_vm10, %v6404_v56 }
 0x2d9   :  { %3224 = vmatmul.mubr.msk.bf16.gmra.mrb[44].mxu0 %vm2076_vm10, %v2040_v59 }
 0x2e2   :  { %v3001_v24 = vpop.f32.mrb[16].mxu0 }
 0x2e3   :  { %v3002_v39 = vpop.f32.mrb[17].mxu0 }
 0x2e4   :  { %v3003_v40 = vadd.f32 %v3002_v39, %v3001_v24  ;;  %v3004_v3 = vpop.f32.mrb[18].mxu0 }
 0x2e5   :  { %v3065_v50 = vpop.f32.mrb[16].mxu1  ;;  %v3005_v27 = vpop.f32.mrb[19].mxu0 }
 0x2e6   :  { %v1894_v35 = vadd.f32 %v6653_v42, %v3003_v40  ;;  %v3066_v49 = vpop.f32.mrb[17].mxu1  ;;  %v3006_v0 = vadd.f32 %v3005_v27, %v3004_v3 }
 0x2e7   :  { %v3067_v44 = vadd.f32 %v3066_v49, %v3065_v50  ;;  %v3068_v8 = vpop.f32.mrb[18].mxu1 }
 0x2e8   :  { %v1897_v17 = vadd.f32 %v6653_v42, %v3006_v0  ;;  %v3069_v63 = vpop.f32.mrb[19].mxu1 }
 0x2e9   :  { %v1991_v38 = vadd.f32 %v3067_v44, %v1894_v35  ;;  %v3070_v29 = vadd.f32 %v3069_v63, %v3068_v8 }
 0x2eb   :  { %v1994_v56 = vadd.f32 %v3070_v29, %v1897_v17  ;;  %v2029_v15 = vmax.f32 %v1991_v38, 0.0 }
 0x2ed   :  { %v2030_v22 = vmax.f32 %v1994_v56, 0.0 }
 0x2ef   :  { %v2041_v20 = vpack.c.bf16 %v2030_v22, %v2029_v15  ;;  %v6742_v15 = vld [vmem:[%s6914_s4] ss:$0 sm:$0xff] }
 0x2f1   :  { %3177 = vmatprep.mubr.msk.bf16.mxu1 %vm2076_vm10, %v2041_v20  ;;  %3227 = vmatprep.mubr.msk.bf16.mxu0 %vm2076_vm10, %v2041_v20 }
 0x31b   :  { %v3007_v14 = vpop.f32.mrb[20].mxu0 }
 0x31c   :  { %v3008_v5 = vpop.f32.mrb[21].mxu0 }
 0x31d   :  { %v3071_v33 = vpop.f32.mrb[20].mxu1  ;;  %v3009_v52 = vadd.f32 %v3008_v5, %v3007_v14  ;;  %v3010_v45 = vpop.f32.mrb[22].mxu0 }
 0x31e   :  { %v3072_v61 = vpop.f32.mrb[21].mxu1  ;;  %v3011_v41 = vpop.f32.mrb[23].mxu0 }
 0x31f   :  { %v1902_v57 = vadd.f32 %v6653_v42, %v3009_v52  ;;  %v3073_v54 = vadd.f32 %v3072_v61, %v3071_v33  ;;  %v3074_v18 = vpop.f32.mrb[22].mxu1  ;;  %v3012_v58 = vadd.f32 %v3011_v41, %v3010_v45 }
 0x320   :  { %v3075_v51 = vpop.f32.mrb[23].mxu1 }
 0x321   :  { %v1999_v6 = vadd.f32 %v3073_v54, %v1902_v57  ;;  %v1905_v16 = vadd.f32 %v6653_v42, %v3012_v58  ;;  %v3076_v4 = vadd.f32 %v3075_v51, %v3074_v18 }
 0x323   :  { %v2002_v19 = vadd.f32 %v3076_v4, %v1905_v16  ;;  %v2031_v2 = vmax.f32 %v1999_v6, 0.0 }
 0x325   :  { %v2032_v46 = vmax.f32 %v2002_v19, 0.0 }
 0x327   :  { %v2042_v43 = vpack.c.bf16 %v2032_v46, %v2031_v2 }
 0x329   :  { %3178 = vmatmul.mubr.msk.bf16.vlgmr.msra.gmra.mrb[32].mxu1 %vm2076_vm10, %v2042_v43  ;;  %3228 = vmatmul.mubr.msk.bf16.gmra.mrb[48].mxu0 %vm2076_vm10, %v2042_v43 }
 0x32a   :  { %3186 = vmatpush3.bf16.msra.mxu1 %v3495_v28 }
 0x32b   :  { %3187 = vmatprep.subr.bf16.mxu1 %v3496_v30 }
 0x32e   :  { %3188 = vmatpush3.bf16.msra.mxu1 %v3496_v30 }
 0x32f   :  { %3189 = vmatprep.subr.bf16.mxu1 %v3497_v13 }
 0x332   :  { %3190 = vmatpush3.bf16.msra.mxu1 %v3497_v13 }
 0x333   :  { %3191 = vmatprep.subr.bf16.mxu1 %v3498_v60 }
 0x336   :  { %3192 = vmatpush3.bf16.msra.mxu1 %v3498_v60 }
 0x337   :  { %3193 = vmatprep.subr.bf16.mxu1 %v3499_v36 }
 0x33a   :  { %3194 = vmatpush3.bf16.msra.mxu1 %v3499_v36 }
 0x33b   :  { %3195 = vmatprep.subr.bf16.mxu1 %v3500_v23 }
 0x33e   :  { %3196 = vmatpush3.bf16.msra.mxu1 %v3500_v23 }
 0x353   :  { %v3013_v55 = vpop.f32.mrb[24].mxu0 }
 0x354   :  { %v3014_v10 = vpop.f32.mrb[25].mxu0 }
 0x355   :  { %v3077_v12 = vpop.f32.mrb[24].mxu1  ;;  %v3015_v31 = vadd.f32 %v3014_v10, %v3013_v55  ;;  %v3016_v9 = vpop.f32.mrb[26].mxu0 }
 0x356   :  { %v3078_v26 = vpop.f32.mrb[25].mxu1  ;;  %v3017_v62 = vpop.f32.mrb[27].mxu0 }
 0x357   :  { %v1910_v47 = vadd.f32 %v6653_v42, %v3015_v31  ;;  %v3079_v25 = vadd.f32 %v3078_v26, %v3077_v12  ;;  %v3080_v11 = vpop.f32.mrb[26].mxu1  ;;  %v3018_v37 = vadd.f32 %v3017_v62, %v3016_v9 }
 0x358   :  { %v3081_v34 = vpop.f32.mrb[27].mxu1 }
 0x359   :  { %v2007_v48 = vadd.f32 %v3079_v25, %v1910_v47  ;;  %v1913_v53 = vadd.f32 %v6653_v42, %v3018_v37  ;;  %v3082_v21 = vadd.f32 %v3081_v34, %v3080_v11 }
 0x35b   :  { %v2010_v59 = vadd.f32 %v3082_v21, %v1913_v53  ;;  %v2033_v32 = vmax.f32 %v2007_v48, 0.0 }
 0x35d   :  { %v2034_v1 = vmax.f32 %v2010_v59, 0.0 }
 0x35f   :  { %v2043_v24 = vpack.c.bf16 %v2034_v1, %v2033_v32 }
 0x361   :  { %3181 = vmatprep.mubr.msk.bf16.mxu1 %vm2076_vm10, %v2043_v24  ;;  %3231 = vmatprep.mubr.msk.bf16.mxu0 %vm2076_vm10, %v2043_v24 }
 0x38c   :  { %v3019_v39 = vpop.f32.mrb[28].mxu0 }
 0x38d   :  { %v3020_v40 = vpop.f32.mrb[29].mxu0 }
 0x38e   :  { %v3083_v3 = vpop.f32.mrb[28].mxu1  ;;  %v3021_v50 = vadd.f32 %v3020_v40, %v3019_v39  ;;  %v3022_v27 = vpop.f32.mrb[30].mxu0 }
 0x38f   :  { %v3084_v35 = vpop.f32.mrb[29].mxu1  ;;  %v3023_v49 = vpop.f32.mrb[31].mxu0 }
 0x390   :  { %v1918_v0 = vadd.f32 %v6653_v42, %v3021_v50  ;;  %v3085_v44 = vadd.f32 %v3084_v35, %v3083_v3  ;;  %v3086_v8 = vpop.f32.mrb[30].mxu1  ;;  %v3024_v17 = vadd.f32 %v3023_v49, %v3022_v27 }
 0x391   :  { %v3087_v63 = vpop.f32.mrb[31].mxu1 }
 0x392   :  { %v2015_v38 = vadd.f32 %v3085_v44, %v1918_v0  ;;  %v1921_v29 = vadd.f32 %v6653_v42, %v3024_v17  ;;  %v3088_v56 = vadd.f32 %v3087_v63, %v3086_v8  ;;  %v3580_v0 = vmov 0.0|0.0  }
 0x393   :  { %3314 = vmatprep.subr.bf16.mxu1 %v3580_v0  ;;  %3338 = vmatprep.subr.bf16.mxu0 %v3580_v0 }
 0x394   :  { %v2018_v22 = vadd.f32 %v3088_v56, %v1921_v29  ;;  %v3171_v20 = vpop.f32.mrb[32].mxu0  ;;  %v2035_v5 = vmax.f32 %v2015_v38, 0.0 }
 0x395   :  { %v2144_v28 = vadd.f32 %v3171_v20, %v6742_v15  ;;  %v2135_v14 = vpop.f32.mrb[33].mxu0 }
 0x396   :  { %v2036_v33 = vmax.f32 %v2018_v22, 0.0  ;;  %v2136_v52 = vadd.f32 %v6742_v15, %v2135_v14  ;;  %v3172_v45 = vpop.f32.mrb[34].mxu0 }
 0x397   :  { %3501 = vtanh.f32 %v2144_v28  ;;  %v2147_v61 = vadd.f32 %v3172_v45, %v6742_v15  ;;  %v2138_v42 = vpop.f32.mrb[35].mxu0 }
 0x398   :  { %v2044_v41 = vpack.c.bf16 %v2036_v33, %v2035_v5  ;;  %3503 = vtanh.f32 %v2136_v52  ;;  %v2139_v57 = vadd.f32 %v6742_v15, %v2138_v42 }
 0x399   :  { %3505 = vtanh.f32 %v2147_v61 }
 0x39a   :  { %3507 = vtanh.f32 %v2139_v57  ;;  %3182 = vmatmul.mubr.msk.bf16.gmra.mrb[36].mxu1 %vm2076_vm10, %v2044_v41  ;;  %3232 = vmatmul.mubr.msk.bf16.gmra.mrb[52].mxu0 %vm2076_vm10, %v2044_v41 }
 0x39b   :  { %3302 = vmatprep.mubr.msk.f32.mxu0 %vm3581_vm4, %v7029_v7 }
 0x39c   :  { %v3175_v54 = vpop.f32.mrb[36].mxu0 }
 0x39d   :  { %v2160_v18 = vadd.f32 %v3175_v54, %v6742_v15  ;;  %v2151_v58 = vpop.f32.mrb[37].mxu0 }
 0x39e   :  { %v2152_v51 = vadd.f32 %v6742_v15, %v2151_v58  ;;  %v3176_v6 = vpop.f32.mrb[38].mxu0 }
 0x39f   :  { %3509 = vtanh.f32 %v2160_v18  ;;  %v2163_v16 = vadd.f32 %v3176_v6, %v6742_v15  ;;  %v2154_v4 = vpop.f32.mrb[39].mxu0 }
 0x3a0   :  { %3511 = vtanh.f32 %v2152_v51  ;;  %v2155_v19 = vadd.f32 %v6742_v15, %v2154_v4 }
 0x3a1   :  { %v3502_v2 = vpop.eup %3501  ;;  %3513 = vtanh.f32 %v2163_v16 }
 0x3a2   :  { %v3504_v46 = vpop.eup %3503  ;;  %3515 = vtanh.f32 %v2155_v19 }
 0x3a3   :  { %v3506_v43 = vpop.eup %3505 }
 0x3a4   :  { %v3508_v30 = vpop.eup %3507  ;;  %v2215_v13 = vpack.c.bf16 %v3506_v43, %v3502_v2  ;;  %v6754_v60 = vpop.f32.mrb[40].mxu0 }
 0x3a5   :  { %v2214_v36 = vpack.c.bf16 %v3508_v30, %v3504_v46  ;;  %v6756_v23 = vpop.f32.mrb[41].mxu0 }
 0x3a6   :  { %v6758_v55 = vpop.f32.mrb[42].mxu0 }
 0x3a7   :  { %3197 = vmatprep.mubr.msk.bf16.mxu1 %vm2270_vm1, %v2214_v36  ;;  %v6761_v10 = vpop.f32.mrb[43].mxu0 }
 0x3a8   :  { %3198 = vmatmul.mubr.msk.bf16.vlgmr.msra.gmra.mrb[40].mxu1 %vm2270_vm1, %v2215_v13 }
 0x3a9   :  { %v3510_v12 = vpop.eup %3509 }
 0x3aa   :  { %v3512_v31 = vpop.eup %3511 }
 0x3ab   :  { %v3514_v9 = vpop.eup %3513 }
 0x3ac   :  { %v3516_v26 = vpop.eup %3515  ;;  %v6764_v62 = vpop.f32.mrb[44].mxu0  ;;  %v2217_v47 = vpack.c.bf16 %v3514_v9, %v3510_v12 }
 0x3ad   :  { %v6766_v25 = vpop.f32.mrb[45].mxu0  ;;  %v2216_v11 = vpack.c.bf16 %v3516_v26, %v3512_v31  ;;  %v2547_v26 = vld [vmem:[%s6915_s7 + $0x10] sm:$0xff] }
 0x3ae   :  { %v6768_v37 = vpop.f32.mrb[46].mxu0 }
 0x3af   :  { %3201 = vmatprep.mubr.msk.bf16.mxu1 %vm2270_vm1, %v2216_v11  ;;  %v6771_v34 = vpop.f32.mrb[47].mxu0  ;;  %v2545_v11 = vld [vmem:[%s6915_s7] sm:$0xff] }
 0x3b0   :  { %3202 = vmatmul.mubr.msk.bf16.gmra.mrb[44].mxu1 %vm2270_vm1, %v2217_v47 }
 0x3fc   :  { %v3179_v48 = vpop.f32.mrb[32].mxu1  ;;  %v6774_v53 = vpop.f32.mrb[48].mxu0 }
 0x3fd   :  { %v2176_v21 = vadd.f32 %v3179_v48, %v6742_v15  ;;  %v2167_v59 = vpop.f32.mrb[33].mxu1  ;;  %v6777_v32 = vpop.f32.mrb[49].mxu0 }
 0x3fe   :  { %v2168_v1 = vadd.f32 %v6742_v15, %v2167_v59  ;;  %v3180_v24 = vpop.f32.mrb[34].mxu1  ;;  %v6780_v39 = vpop.f32.mrb[50].mxu0 }
 0x3ff   :  { %3517 = vtanh.f32 %v2176_v21  ;;  %v2179_v40 = vadd.f32 %v3180_v24, %v6742_v15  ;;  %v2170_v3 = vpop.f32.mrb[35].mxu1  ;;  %v6783_v50 = vpop.f32.mrb[51].mxu0  ;;  %v2548_v21 = vld [vmem:[%s6915_s7 + $0x18] sm:$0xff] }
 0x400   :  { %3519 = vtanh.f32 %v2168_v1  ;;  %v2171_v27 = vadd.f32 %v6742_v15, %v2170_v3  ;;  %v2546_v1 = vld [vmem:[%s6915_s7 + $0x8] sm:$0xff] }
 0x401   :  { %3521 = vtanh.f32 %v2179_v40 }
 0x402   :  { %3523 = vtanh.f32 %v2171_v27 }
 0x409   :  { %v3518_v35 = vpop.eup %3517 }
 0x40a   :  { %v3520_v49 = vpop.eup %3519 }
 0x40b   :  { %v3522_v44 = vpop.eup %3521 }
 0x40c   :  { %v3524_v8 = vpop.eup %3523  ;;  %v2219_v17 = vpack.c.bf16 %v3522_v44, %v3518_v35 }
 0x40d   :  { %v2218_v63 = vpack.c.bf16 %v3524_v8, %v3520_v49 }
 0x40f   :  { %3205 = vmatprep.mubr.msk.bf16.mxu1 %vm2270_vm1, %v2218_v63 }
 0x410   :  { %3206 = vmatmul.mubr.msk.bf16.gmra.mrb[48].mxu1 %vm2270_vm1, %v2219_v17 }
 0x46d   :  { %v3183_v38 = vpop.f32.mrb[36].mxu1  ;;  %v6790_v29 = vpop.f32.mrb[52].mxu0 }
 0x46e   :  { %v2192_v56 = vadd.f32 %v3183_v38, %v6742_v15  ;;  %v2183_v22 = vpop.f32.mrb[37].mxu1  ;;  %v6793_v20 = vpop.f32.mrb[53].mxu0 }
 0x46f   :  { %v2184_v28 = vadd.f32 %v6742_v15, %v2183_v22  ;;  %v3184_v14 = vpop.f32.mrb[38].mxu1  ;;  %v6796_v5 = vpop.f32.mrb[54].mxu0  ;;  %v2551_v22 = vld [vmem:[%s6915_s7 + $0x30] sm:$0xff] }
 0x470   :  { %3525 = vtanh.f32 %v2192_v56  ;;  %v2195_v33 = vadd.f32 %v3184_v14, %v6742_v15  ;;  %v2186_v52 = vpop.f32.mrb[39].mxu1  ;;  %v6799_v45 = vpop.f32.mrb[55].mxu0  ;;  %v2549_v14 = vld [vmem:[%s6915_s7 + $0x20] sm:$0xff] }
 0x471   :  { %3527 = vtanh.f32 %v2184_v28  ;;  %v2187_v61 = vadd.f32 %v6742_v15, %v2186_v52 }
 0x472   :  { %3529 = vtanh.f32 %v2195_v33 }
 0x473   :  { %3531 = vtanh.f32 %v2187_v61 }
 0x47a   :  { %v3526_v42 = vpop.eup %3525 }
 0x47b   :  { %v3528_v41 = vpop.eup %3527  ;;  %v3199_v57 = vpop.f32.mrb[40].mxu1 }
 0x47c   :  { %v3530_v54 = vpop.eup %3529  ;;  %v2517_v18 = vmul.f32 1.442695, %v3199_v57  ;;  %v2329_v58 = vpop.f32.mrb[41].mxu1 }
 0x47d   :  { %v3532_v51 = vpop.eup %3531  ;;  %v2513_v6 = vmul.f32 1.442695, %v2329_v58  ;;  %v3200_v16 = vpop.f32.mrb[42].mxu1  ;;  %v2221_v4 = vpack.c.bf16 %v3530_v54, %v3526_v42 }
 0x47e   :  { %3533 = vpow2.f32 %v2517_v18  ;;  %v2519_v19 = vmul.f32 1.442695, %v3200_v16  ;;  %v2332_v2 = vpop.f32.mrb[43].mxu1  ;;  %v2220_v46 = vpack.c.bf16 %v3532_v51, %v3528_v41 }
 0x47f   :  { %3535 = vpow2.f32 %v2513_v6  ;;  %v2515_v43 = vmul.f32 1.442695, %v2332_v2 }
 0x480   :  { %3537 = vpow2.f32 %v2519_v19  ;;  %3209 = vmatprep.mubr.msk.bf16.mxu1 %vm2270_vm1, %v2220_v46 }
 0x481   :  { %3539 = vpow2.f32 %v2515_v43  ;;  %3210 = vmatmul.mubr.msk.bf16.gmra.mrb[52].mxu1 %vm2270_vm1, %v2221_v4 }
 0x482   :  { %3267 = vmatprep.mubr.msk.f32.mxu1 %vm3581_vm4, %v7029_v7 }
 0x483   :  { %v3203_v15 = vpop.f32.mrb[44].mxu1 }
 0x484   :  { %v2525_v30 = vmul.f32 1.442695, %v3203_v15  ;;  %v2345_v13 = vpop.f32.mrb[45].mxu1 }
 0x485   :  { %v2521_v36 = vmul.f32 1.442695, %v2345_v13  ;;  %v3204_v12 = vpop.f32.mrb[46].mxu1  ;;  %v2555_v13 = vld [vmem:[%s6915_s7 + $0x50] sm:$0xff] }
 0x486   :  { %3541 = vpow2.f32 %v2525_v30  ;;  %v2527_v31 = vmul.f32 1.442695, %v3204_v12  ;;  %v2348_v9 = vpop.f32.mrb[47].mxu1 }
 0x487   :  { %3543 = vpow2.f32 %v2521_v36  ;;  %v2523_v47 = vmul.f32 1.442695, %v2348_v9  ;;  %v2553_v36 = vld [vmem:[%s6915_s7 + $0x40] sm:$0xff] }
 0x488   :  { %v3534_v48 = vpop.eup %3533  ;;  %3545 = vpow2.f32 %v2527_v31  ;;  %v2556_v31 = vld [vmem:[%s6915_s7 + $0x58] sm:$0xff] }
 0x489   :  { %v3536_v59 = vpop.eup %3535  ;;  %3547 = vpow2.f32 %v2523_v47  ;;  %v2563_v24 = vmul.f32 %v3534_v48, %v2547_v26  ;;  %v2554_v26 = vld [vmem:[%s6915_s7 + $0x48] sm:$0xff] }
 0x48a   :  { %v3538_v40 = vpop.eup %3537  ;;  %v2561_v3 = vmul.f32 %v3536_v59, %v2545_v11 }
 0x48b   :  { %v3540_v27 = vpop.eup %3539  ;;  %v2564_v35 = vmul.f32 %v3538_v40, %v2548_v21  ;;  %v2650_v49 = vmul.f32 %v6754_v60, %v2563_v24 }
 0x48c   :  { %v2562_v44 = vmul.f32 %v3540_v27, %v2546_v1  ;;  %v2648_v8 = vmul.f32 %v2561_v3, %v6756_v23  ;;  %v2552_v23 = vld [vmem:[%s6915_s7 + $0x38] sm:$0xff] }
 0x48d   :  { %v3318_v17 = vpack.c.bf16 %v2564_v35, %v2563_v24  ;;  %v2651_v63 = vmul.f32 %v6758_v55, %v2564_v35 }
 0x48e   :  { %v3315_v38 = vpack.c.bf16 %v2562_v44, %v2561_v3  ;;  %v2649_v56 = vmul.f32 %v2562_v44, %v6761_v10  ;;  %v2550_v10 = vld [vmem:[%s6915_s7 + $0x28] sm:$0xff] }
 0x48f   :  { %v3342_v28 = vpack.c.bf16 %v2651_v63, %v2650_v49 }
 0x490   :  { %v3542_v33 = vpop.eup %3541  ;;  %3316 = vmatpush3.bf16.msra.mxu1 %v3315_v38  ;;  %v3339_v60 = vpack.c.bf16 %v2649_v56, %v2648_v8 }
 0x491   :  { %v3544_v55 = vpop.eup %3543  ;;  %3317 = vmatprep.subr.bf16.mxu1 %v3580_v0  ;;  %v2567_v52 = vmul.f32 %v3542_v33, %v2551_v22  ;;  %v2559_v22 = vld [vmem:[%s6915_s7 + $0x70] sm:$0xff]  ;;  %v2560_v33 = vld [vmem:[%s6915_s7 + $0x78] sm:$0xff] }
 0x492   :  { %v3546_v61 = vpop.eup %3545  ;;  %3340 = vmatpush3.bf16.msra.mxu0 %v3339_v60  ;;  %v2565_v42 = vmul.f32 %v3544_v55, %v2549_v14 }
 0x493   :  { %v3548_v41 = vpop.eup %3547  ;;  %3341 = vmatprep.subr.bf16.mxu0 %v3580_v0  ;;  %v2568_v57 = vmul.f32 %v3546_v61, %v2552_v23  ;;  %v2654_v54 = vmul.f32 %v6764_v62, %v2567_v52  ;;  %v2558_v23 = vld [vmem:[%s6915_s7 + $0x68] sm:$0xff] }
 0x494   :  { %3319 = vmatpush3.bf16.msra.mxu1 %v3318_v17  ;;  %v2566_v18 = vmul.f32 %v3548_v41, %v2550_v10  ;;  %v2652_v58 = vmul.f32 %v2565_v42, %v6766_v25 }
 0x495   :  { %3320 = vmatprep.subr.bf16.mxu1 %v3580_v0  ;;  %v3324_v51 = vpack.c.bf16 %v2568_v57, %v2567_v52  ;;  %v2655_v6 = vmul.f32 %v6768_v37, %v2568_v57 }
 0x496   :  { %3343 = vmatpush3.bf16.msra.mxu0 %v3342_v28  ;;  %v3321_v16 = vpack.c.bf16 %v2566_v18, %v2565_v42  ;;  %v2653_v4 = vmul.f32 %v2566_v18, %v6771_v34  ;;  %v2557_v28 = vld [vmem:[%s6915_s7 + $0x60] sm:$0xff] }
 0x497   :  { %3344 = vmatprep.subr.bf16.mxu0 %v3580_v0  ;;  %v3348_v19 = vpack.c.bf16 %v2655_v6, %v2654_v54 }
 0x498   :  { %3322 = vmatpush3.bf16.msra.mxu1 %v3321_v16  ;;  %v3345_v2 = vpack.c.bf16 %v2653_v4, %v2652_v58 }
 0x499   :  { %3323 = vmatprep.subr.bf16.mxu1 %v3580_v0 }
 0x49a   :  { %3346 = vmatpush3.bf16.msra.mxu0 %v3345_v2 }
 0x49b   :  { %3347 = vmatprep.subr.bf16.mxu0 %v3580_v0 }
 0x49c   :  { %3325 = vmatpush3.bf16.msra.mxu1 %v3324_v51 }
 0x49d   :  { %3326 = vmatprep.subr.bf16.mxu1 %v3580_v0 }
 0x49e   :  { %3349 = vmatpush3.bf16.msra.mxu0 %v3348_v19 }
 0x49f   :  { %3350 = vmatprep.subr.bf16.mxu0 %v3580_v0 }
 0x4e3   :  { %v3207_v62 = vpop.f32.mrb[48].mxu1 }
 0x4e4   :  { %v2533_v25 = vmul.f32 1.442695, %v3207_v62  ;;  %v2361_v37 = vpop.f32.mrb[49].mxu1 }
 0x4e5   :  { %v2529_v34 = vmul.f32 1.442695, %v2361_v37  ;;  %v3208_v46 = vpop.f32.mrb[50].mxu1 }
 0x4e6   :  { %3549 = vpow2.f32 %v2533_v25  ;;  %v2535_v43 = vmul.f32 1.442695, %v3208_v46  ;;  %v2364_v15 = vpop.f32.mrb[51].mxu1  ;;  %v2959_v46 = vld [vmem:[%s6918_s10] ss:$0 sm:$0xff] }
 0x4e7   :  { %3551 = vpow2.f32 %v2529_v34  ;;  %v2531_v30 = vmul.f32 1.442695, %v2364_v15 }
 0x4e8   :  { %3553 = vpow2.f32 %v2535_v43 }
 0x4e9   :  { %3555 = vpow2.f32 %v2531_v30 }
 0x4f0   :  { %v3550_v12 = vpop.eup %3549 }
 0x4f1   :  { %v3552_v9 = vpop.eup %3551  ;;  %v2571_v47 = vmul.f32 %v3550_v12, %v2555_v13 }
 0x4f2   :  { %v3554_v11 = vpop.eup %3553  ;;  %v2569_v48 = vmul.f32 %v3552_v9, %v2553_v36 }
 0x4f3   :  { %v3556_v21 = vpop.eup %3555  ;;  %v2572_v59 = vmul.f32 %v3554_v11, %v2556_v31  ;;  %v2658_v1 = vmul.f32 %v6774_v53, %v2571_v47 }
 0x4f4   :  { %v2570_v24 = vmul.f32 %v3556_v21, %v2554_v26  ;;  %v2656_v40 = vmul.f32 %v2569_v48, %v6777_v32 }
 0x4f5   :  { %v3330_v3 = vpack.c.bf16 %v2572_v59, %v2571_v47  ;;  %v2659_v27 = vmul.f32 %v6780_v39, %v2572_v59 }
 0x4f6   :  { %v3327_v35 = vpack.c.bf16 %v2570_v24, %v2569_v48  ;;  %v2657_v49 = vmul.f32 %v2570_v24, %v6783_v50 }
 0x4f7   :  { %v3354_v44 = vpack.c.bf16 %v2659_v27, %v2658_v1 }
 0x4f8   :  { %3328 = vmatpush3.bf16.msra.mxu1 %v3327_v35  ;;  %v3351_v8 = vpack.c.bf16 %v2657_v49, %v2656_v40 }
 0x4f9   :  { %3329 = vmatprep.subr.bf16.mxu1 %v3580_v0 }
 0x4fa   :  { %3352 = vmatpush3.bf16.msra.mxu0 %v3351_v8 }
 0x4fb   :  { %3353 = vmatprep.subr.bf16.mxu0 %v3580_v0 }
 0x4fc   :  { %3331 = vmatpush3.bf16.msra.mxu1 %v3330_v3 }
 0x4fd   :  { %3332 = vmatprep.subr.bf16.mxu1 %v3580_v0 }
 0x4fe   :  { %3355 = vmatpush3.bf16.msra.mxu0 %v3354_v44 }
 0x4ff   :  { %3356 = vmatprep.subr.bf16.mxu0 %v3580_v0 }
 0x554   :  { %v3211_v53 = vpop.f32.mrb[52].mxu1 }
 0x555   :  { %v2541_v32 = vmul.f32 1.442695, %v3211_v53  ;;  %v2377_v39 = vpop.f32.mrb[53].mxu1 }
 0x556   :  { %v2537_v17 = vmul.f32 1.442695, %v2377_v39  ;;  %v3212_v63 = vpop.f32.mrb[54].mxu1 }
 0x557   :  { %3557 = vpow2.f32 %v2541_v32  ;;  %v2543_v50 = vmul.f32 1.442695, %v3212_v63  ;;  %v2380_v38 = vpop.f32.mrb[55].mxu1 }
 0x558   :  { %3559 = vpow2.f32 %v2537_v17  ;;  %v2539_v56 = vmul.f32 1.442695, %v2380_v38 }
 0x559   :  { %3561 = vpow2.f32 %v2543_v50 }
 0x55a   :  { %3563 = vpow2.f32 %v2539_v56 }
 0x561   :  { %v3558_v14 = vpop.eup %3557 }
 0x562   :  { %v3560_v60 = vpop.eup %3559  ;;  %v2575_v55 = vmul.f32 %v3558_v14, %v2559_v22 }
 0x563   :  { %v3562_v10 = vpop.eup %3561  ;;  %v2573_v52 = vmul.f32 %v3560_v60, %v2557_v28 }
 0x564   :  { %v3564_v61 = vpop.eup %3563  ;;  %v2576_v42 = vmul.f32 %v3562_v10, %v2560_v33  ;;  %v2662_v41 = vmul.f32 %v6790_v29, %v2575_v55  ;;  %v2577_v29 = vld [vmem:[%s6916_s8] sm:$0xff] }
 0x565   :  { %v2574_v57 = vmul.f32 %v3564_v61, %v2558_v23  ;;  %v2660_v54 = vmul.f32 %v2573_v52, %v6793_v20  ;;  %v2736_v20 = vld [vmem:[%s6917_s9] sm:$0xff] }
 0x566   :  { %v3336_v18 = vpack.c.bf16 %v2576_v42, %v2575_v55  ;;  %v2663_v58 = vmul.f32 %v6796_v5, %v2576_v42  ;;  %v2737_v5 = vld [vmem:[%s6917_s9 + $0x8] sm:$0xff] }
 0x567   :  { %v3333_v51 = vpack.c.bf16 %v2574_v57, %v2573_v52  ;;  %v2661_v6 = vmul.f32 %v2574_v57, %v6799_v45  ;;  %v3363_v45 = vpack.c.bf16 %v2737_v5, %v2736_v20 }
 0x568   :  { %v3360_v16 = vpack.c.bf16 %v2663_v58, %v2662_v41 }
 0x569   :  { %3334 = vmatpush3.bf16.msra.mxu1 %v3333_v51  ;;  %v3357_v4 = vpack.c.bf16 %v2661_v6, %v2660_v54 }
 0x56a   :  { %3335 = vmatprep.subr.bf16.mxu1 %v3580_v0 }
 0x56b   :  { %3358 = vmatpush3.bf16.msra.mxu0 %v3357_v4 }
 0x56c   :  { %3359 = vmatprep.subr.bf16.mxu0 %v3580_v0 }
 0x56d   :  { %3337 = vmatpush3.bf16.msra.mxu1 %v3336_v18 }
 0x56f   :  { %3361 = vmatpush3.bf16.msra.mxu0 %v3360_v16 }
 0x570   :  { %3268 = vmatmul.mubr.f32.vlgmr.msra.gmra.mrb[56].mxu1 %v2577_v29  ;;  %3362 = vmatprep.subr.bf16.mxu0 %v3580_v0  ;;  %v2738_v0 = vld [vmem:[%s6917_s9 + $0x10] sm:$0xff] }
 0x572   :  { %3303 = vmatmul.mubr.f32.vlgmr.msra.gmra.mrb[56].mxu0 %v2577_v29 }
 0x573   :  { %3311 = vmatprep.mubr.msk.f32.mxu0 %vm3581_vm4, %v7029_v7  ;;  %3364 = vmatpush3.bf16.msra.mxu0 %v3363_v45 }
 0x574   :  { %3309 = vmatprep.subr.mxu0 %v7029_v7 }
 0x577   :  { %3310 = vmatpush3.msra.mxu0 %v2738_v0 }
 0x643   :  { %v2644_v19 = vpop.f32.mrb[56].mxu1 }
 0x644   :  { %3565 = vrcp.f32 %v2644_v19  ;;  %v3269_v2 = vpop.f32.mrb[57].mxu1 }
 0x645   :  { %v2730_v62 = vpop.f32.mrb[56].mxu0 }
 0x646   :  { %v3304_v25 = vpop.f32.mrb[57].mxu0 }
 0x64e   :  { %v3566_v37 = vpop.eup %3565 }
 0x64f   :  { %v2735_v34 = vmul.f32 %v3566_v37, %v2730_v62 }
 0x651   :  { %3312 = vmatmul.mubr.msk.f32.vlgmr.msra.gmra.mrb[58].mxu0 %vm2746_vm6, %v2735_v34 }
 0x724   :  { %v2816_v43 = vpop.f32.mrb[58].mxu0 }
 0x725   :  { %v2817_v7 = vadd.f32 %v2959_v46, %v2816_v43  ;;  %v3313_v15 = vpop.f32.mrb[59].mxu0 }
 0x727   :  { %2820 = vst [vmem:[%s6919_s11] sm:$0xff] %v2817_v7 }

</bundles_post_ra>
